<compile_context>
chip_gen: v7x
topology: tpu7x:2x2x1
jax: 0.10.0
libtpu: 0.0.40
codegen_flags: <defaults>
</compile_context>

<pallas_src>
import functools
import math

import jax
import jax.numpy as jnp
from jax.experimental import pallas as pl
from jax.experimental.pallas import tpu as pltpu


# ------------------------------ fused kernel ------------------------------- #

def _fused_generator_kernel(
    emb_ref,     # [L*SP, E]   rows ordered (t, stream-batch); sb 0..B-1 = s, B..2B-1 = r
    rw_ref,      # [B, L]      attention reweight (applied along key axis)
    xt_ref,      # [B*L, F*D]  x tiled per output feature (f-major)
    w0_ref,      # [E, D]      first MLP layer
    wpack_ref,   # [D, TOTW]   all D-row weights, 128-aligned column segments
    bpack_ref,   # [1, TOTB]   all biases, same offsets as wpack (+ mlp_b0 at end)
    sel_ref,     # [F*D, F]    0/1 block-sum matrix for the dynamic-weight head
    o_ref,       # [B*L, F]
    h_sc,        # VMEM [L*SP, D]  GRU hidden states, rows (t, stream-batch)
    sr_sc,       # VMEM [B*L, D]   SAA_question + SAA_response summed output
    *, B, L, SP, D, F, H, GP, QP, off):
    dk = D // H
    inv_sqrt_dk = 1.0 / math.sqrt(float(dk))

    # ---- shared MLP (Linear -> Tanh -> Linear), all 2B streams in one matmul --
    b0 = bpack_ref[:, off["mlp_b0"]:off["mlp_b0"] + D]
    w1m = wpack_ref[:, off["mlp_w1"]:off["mlp_w1"] + D]
    b1m = bpack_ref[:, off["mlp_w1"]:off["mlp_w1"] + D]
    feat = jnp.tanh(
        jnp.dot(emb_ref[...], w0_ref[...], preferred_element_type=jnp.float32) + b0)
    feat = jnp.dot(feat, w1m, preferred_element_type=jnp.float32) + b1m      # [L*SP, D]

    # ---- GRU: input-side matmul hoisted out of the recurrence; gates 128-aligned
    wih = wpack_ref[:, off["wih"]:off["wih"] + 3 * GP]
    bih = bpack_ref[:, off["wih"]:off["wih"] + 3 * GP]
    whh = wpack_ref[:, off["whh"]:off["whh"] + 3 * GP]
    bhh = bpack_ref[:, off["whh"]:off["whh"] + 3 * GP]
    gx = jnp.dot(feat, wih, preferred_element_type=jnp.float32) + bih        # [L*SP, 3GP]

    h = jnp.zeros((SP, D), jnp.float32)
    for t in range(L):  # serial recurrence; per-step scratch store bounds liveness
        gx_t = gx[t * SP:(t + 1) * SP, :]                                    # [SP, 3GP]
        gh = jnp.dot(h, whh, preferred_element_type=jnp.float32) + bhh       # [SP, 3GP]
        r_g = jax.nn.sigmoid(gx_t[:, 0:D] + gh[:, 0:D])
        z_g = jax.nn.sigmoid(gx_t[:, GP:GP + D] + gh[:, GP:GP + D])
        n_g = jnp.tanh(gx_t[:, 2 * GP:2 * GP + D] + r_g * gh[:, 2 * GP:2 * GP + D])
        h = (1.0 - z_g) * n_g + z_g * h
        h_sc[t * SP:(t + 1) * SP, :] = h

    # ---- both SAA blocks: one fused QKV projection for all streams & batches --
    wqkv = wpack_ref[:, off["wqkv"]:off["wqkv"] + 6 * QP]
    bqkv = bpack_ref[:, off["wqkv"]:off["wqkv"] + 6 * QP]
    qkv = jnp.dot(h_sc[...], wqkv, preferred_element_type=jnp.float32) + bqkv  # [L*SP, 6QP]
    qkv3 = qkv.reshape(L, SP, 6 * QP)

    row = jax.lax.broadcasted_iota(jnp.int32, (L, L), 0)
    col = jax.lax.broadcasted_iota(jnp.int32, (L, L), 1)
    # the reference masks before the /sqrt(dk) scale, so pre-scale the mask value
    causal_neg = jnp.where(col > row, 1e9 * inv_sqrt_dk, 0.0)                # [L, L]
    lane = jax.lax.broadcasted_iota(jnp.int32, (1, D), 1)
    head_masks = [jnp.where((lane >= hd * dk) & (lane < (hd + 1) * dk), 1.0, 0.0)
                  for hd in range(H)]                                         # [1, D] each

    wo_q = wpack_ref[:, off["wo_q"]:off["wo_q"] + D]
    bo_q = bpack_ref[:, off["wo_q"]:off["wo_q"] + D]
    wo_r = wpack_ref[:, off["wo_r"]:off["wo_r"] + D]
    bo_r = bpack_ref[:, off["wo_r"]:off["wo_r"] + D]

    def attend(qkv_b, rw_row, causal):
        # qkv_b: [L, 3*QP] with q at [0:D], k at [QP:QP+D], v at [2QP:2QP+D]
        q = qkv_b[:, 0:D] * inv_sqrt_dk
        k = qkv_b[:, QP:QP + D]
        v = qkv_b[:, 2 * QP:2 * QP + D]
        attn = jnp.zeros((L, D), jnp.float32)
        for hm in head_masks:  # lane-mask the heads (VPU) instead of dk-wide slices
            scores = jax.lax.dot_general(
                q * hm, k * hm, (((1,), (1,)), ((), ())),
                preferred_element_type=jnp.float32)                          # [L, L]
            if causal:
                scores = scores - causal_neg
            scores = scores * rw_row                                         # key-axis reweight
            m = jnp.max(scores, axis=-1, keepdims=True)
            e = jnp.exp(scores - m)
            w = e / jnp.sum(e, axis=-1, keepdims=True)
            attn = attn + jnp.dot(w, v * hm, preferred_element_type=jnp.float32)
        return attn

    for b in range(B):  # B is a small compile-time constant
        rw_row = rw_ref[b:b + 1, :]                                          # [1, L]
        s_qkv = qkv3[:, b, 0:3 * QP]              # question weights, s-stream
        r_qkv = qkv3[:, B + b, 3 * QP:6 * QP]     # response weights, r-stream (causal)
        attn_s = attend(s_qkv, rw_row, causal=False)
        attn_r = attend(r_qkv, rw_row, causal=True)
        sr_sc[b * L:(b + 1) * L, :] = (
            jnp.dot(attn_s, wo_q, preferred_element_type=jnp.float32) + bo_q
            + jnp.dot(attn_r, wo_r, preferred_element_type=jnp.float32) + bo_r)

    # ---- dynamic-weight head (rank == 0): elementwise * tiled x, MXU block-reduce
    sr = sr_sc[...]                                                          # [B*L, D]
    w1 = wpack_ref[:, off["w1"]:off["w1"] + F * D]
    b1 = bpack_ref[:, off["w1"]:off["w1"] + F * D]
    w2 = wpack_ref[:, off["w2"]:off["w2"] + F]
    b2 = bpack_ref[:, off["w2"]:off["w2"] + F]
    wcols = jnp.dot(sr, w1, preferred_element_type=jnp.float32) + b1         # [B*L, F*D]
    bias = jnp.dot(sr, w2, preferred_element_type=jnp.float32) + b2          # [B*L, F]
    prod = wcols * xt_ref[...]                                               # [B*L, F*D]
    out = jnp.dot(prod, sel_ref[...], preferred_element_type=jnp.float32) + bias
    # TODO(synk): at large B*L a lane-dense [1, B*L*F] output layout would avoid
    # masked partial stores; at 16x8 the store is negligible.
    o_ref[...] = out.astype(o_ref.dtype)


# ------------------------------ glue: packing ------------------------------ #

def _pad_cols_to_128(a):
    c = a.shape[1]
    pc = ((c + 127) // 128) * 128
    if pc == c:
        return a
    return jnp.pad(a, ((0, 0), (0, pc - c)))


def _gate_pad(w, D, GP):
    """[rows, 3*D] -> [rows, 3*GP]; gate g occupies columns [g*GP, g*GP + D)."""
    out = jnp.zeros((w.shape[0], 3 * GP), jnp.float32)
    for g in range(3):
        out = out.at[:, g * GP:g * GP + D].set(w[:, g * D:(g + 1) * D])
    return out


def _block_pad(ws, P):
    """list of [rows, D] -> [rows, len(ws)*P]; block i occupies [i*P, i*P + D)."""
    rows, Dw = ws[0].shape
    out = jnp.zeros((rows, len(ws) * P), jnp.float32)
    for i, w in enumerate(ws):
        out = out.at[:, i * P:i * P + Dw].set(w)
    return out


def _build_packs(params, D, F, GP, QP):
    """Pack all [D, *] weights into one [D, TOTW] array (128-aligned segments)
    and all biases into a matching [1, TOTB] array with the same offsets."""
    sq, sa_r = params["saa_q"], params["saa_r"]
    # f-major permutation of w1/b1: column f*D + d holds original column d*F + f.
    w1p = params["w1"].reshape(D, D, F).transpose(0, 2, 1).reshape(D, F * D)
    b1p = params["b1"].reshape(D, F).T.reshape(1, F * D)
    segs = [
        ("mlp_w1", params["mlp_w1"], params["mlp_b1"][None, :]),
        ("wih", _gate_pad(params["gru_wih"], D, GP),
                _gate_pad(params["gru_bih"][None, :], D, GP)),
        ("whh", _gate_pad(params["gru_whh"], D, GP),
                _gate_pad(params["gru_bhh"][None, :], D, GP)),
        ("wqkv", _block_pad([sq["wq"], sq["wk"], sq["wv"],
                             sa_r["wq"], sa_r["wk"], sa_r["wv"]], QP),
                 _block_pad([sq["bq"][None, :], sq["bk"][None, :], sq["bv"][None, :],
                             sa_r["bq"][None, :], sa_r["bk"][None, :],
                             sa_r["bv"][None, :]], QP)),
        ("wo_q", sq["wo"], sq["bo"][None, :]),
        ("wo_r", sa_r["wo"], sa_r["bo"][None, :]),
        ("w1", w1p, b1p),
        ("w2", params["w2"], params["b2"][None, :]),
    ]
    w_parts, b_parts, off, pos = [], [], {}, 0
    for name, w, bvec in segs:
        w = _pad_cols_to_128(w)
        bvec = _pad_cols_to_128(bvec)
        off[name] = pos
        pos += w.shape[1]
        w_parts.append(w)
        b_parts.append(bvec)
    wpack = jnp.concatenate(w_parts, axis=1)                                 # [D, TOTW]
    off["mlp_b0"] = pos
    b_parts.append(_pad_cols_to_128(params["mlp_b0"][None, :]))
    bpack = jnp.concatenate(b_parts, axis=1)                                 # [1, TOTB]
    return wpack, bpack, off


# ------------------------------ model wrapper ------------------------------ #

def generator_forward(params, x, r, s, attention_reweight, num_heads, out_feature):
    B, L = s.shape
    D = x.shape[-1]
    E = params["embed"].shape[-1]
    F = out_feature
    GP = ((D + 127) // 128) * 128            # 128-lane-aligned gate / projection blocks
    QP = GP
    SP = max(8, ((2 * B + 7) // 8) * 8)      # stream-batch rows, padded to a sublane tile

    # Embedding gather + stream interleave stay in JAX glue (tiny).
    s_emb = jnp.take(params["embed"], s, axis=0).astype(jnp.float32)         # [B, L, E]
    r_emb = jnp.take(params["embed"], r, axis=0).astype(jnp.float32)
    emb = jnp.zeros((L, SP, E), jnp.float32)
    emb = emb.at[:, 0:B, :].set(jnp.transpose(s_emb, (1, 0, 2)))
    emb = emb.at[:, B:2 * B, :].set(jnp.transpose(r_emb, (1, 0, 2)))
    emb_flat = emb.reshape(L * SP, E)

    rw = attention_reweight.astype(jnp.float32)                              # [B, L]
    x_tiled = jnp.tile(x.reshape(B * L, D), (1, F)).astype(jnp.float32)      # [B*L, F*D]
    sel = jnp.repeat(jnp.eye(F, dtype=jnp.float32), D, axis=0)               # [F*D, F]

    wpack, bpack, off = _build_packs(params, D, F, GP, QP)

    kernel = functools.partial(
        _fused_generator_kernel, B=B, L=L, SP=SP, D=D, F=F, H=num_heads,
        GP=GP, QP=QP, off=off)

    inputs = (emb_flat, rw, x_tiled, params["mlp_w0"], wpack, bpack, sel)
    out = pl.pallas_call(
        kernel,
        out_shape=jax.ShapeDtypeStruct((B * L, F), jnp.float32),
        grid=(1,),                           # single fused program (see TODOs above)
        in_specs=[pl.BlockSpec(a.shape, lambda i: (0, 0)) for a in inputs],
        out_specs=pl.BlockSpec((B * L, F), lambda i: (0, 0)),
        scratch_shapes=[pltpu.VMEM((L * SP, D), jnp.float32),
                        pltpu.VMEM((B * L, D), jnp.float32)],
        compiler_params=pltpu.CompilerParams(dimension_semantics=("arbitrary",)),
    )(*inputs)
    return out.reshape(B, L, F)


# ------------------------------ pure-JAX reference ------------------------- #

def _reference_forward(params, x, r, s, attention_reweight, num_heads, out_feature):
    B, L = s.shape
    D = x.shape[-1]
    H = num_heads
    dk = D // H
    F = out_feature

    def mlp(e):
        h = jnp.tanh(e @ params["mlp_w0"] + params["mlp_b0"])
        return h @ params["mlp_w1"] + params["mlp_b1"]

    def gru(seq):  # [B, L, D] -> [B, L, D]
        wih, whh = params["gru_wih"], params["gru_whh"]
        bih, bhh = params["gru_bih"], params["gru_bhh"]

        def step(h, x_t):
            gx = x_t @ wih + bih
            gh = h @ whh + bhh
            r_g = jax.nn.sigmoid(gx[:, 0:D] + gh[:, 0:D])
            z_g = jax.nn.sigmoid(gx[:, D:2 * D] + gh[:, D:2 * D])
            n_g = jnp.tanh(gx[:, 2 * D:] + r_g * gh[:, 2 * D:])
            h_new = (1.0 - z_g) * n_g + z_g * h
            return h_new, h_new

        _, hs = jax.lax.scan(step, jnp.zeros((B, D), jnp.float32),
                             jnp.transpose(seq, (1, 0, 2)))
        return jnp.transpose(hs, (1, 0, 2))

    def saa(inp, p, mask, rw):
        q = inp @ p["wq"] + p["bq"]
        k = inp @ p["wk"] + p["bk"]
        v = inp @ p["wv"] + p["bv"]

        def split(t):
            return jnp.transpose(t.reshape(B, L, H, dk), (0, 2, 1, 3))

        q, k, v = split(q), split(k), split(v)
        scores = jnp.einsum("bhqd,bhkd->bhqk", q, k)
        if mask:
            tri = jnp.triu(jnp.ones((L, L), jnp.float32), k=1)
            scores = scores - tri * 1e9
        scores = scores / jnp.sqrt(jnp.float32(dk))
        scores = scores * rw[:, None, None, :]
        w = jax.nn.softmax(scores, axis=-1)
        o = jnp.einsum("bhqk,bhkd->bhqd", w, v)
        o = jnp.transpose(o, (0, 2, 1, 3)).reshape(B, L, H * dk)
        return o @ p["wo"] + p["bo"]

    s_h = gru(mlp(jnp.take(params["embed"], s, axis=0)))
    r_h = gru(mlp(jnp.take(params["embed"], r, axis=0)))
    s_a = saa(s_h, params["saa_q"], False, attention_reweight)
    r_a = saa(r_h, params["saa_r"], True, attention_reweight)
    sr = (s_a + r_a).reshape(B * L, D)
    xf = x.reshape(B * L, D)
    weight = sr @ params["w1"] + params["b1"]
    bias = sr @ params["w2"] + params["b2"]
    out = jnp.einsum("md,mdf->mf", xf, weight.reshape(B * L, D, F)) + bias
    return out.reshape(B, L, F)


# ------------------------------ param init --------------------------------- #

def init_params(key, num_skills, out_feature, embed_size, in_dimension, num_heads):
    ks = iter(jax.random.split(key, 64))

    def dense(fan_in, fan_out):
        w = jax.random.normal(next(ks), (fan_in, fan_out), jnp.float32) / jnp.sqrt(float(fan_in))
        b = jax.random.normal(next(ks), (fan_out,), jnp.float32) * 0.01
        return w, b

    D = in_dimension
    params = {}
    params["embed"] = jax.random.normal(next(ks), (num_skills, embed_size), jnp.float32)

    params["mlp_w0"], params["mlp_b0"] = dense(embed_size, D)
    params["mlp_w1"], params["mlp_b1"] = dense(D, D)

    params["gru_wih"], params["gru_bih"] = dense(D, 3 * D)
    params["gru_whh"], params["gru_bhh"] = dense(D, 3 * D)

    def saa_params():
        p = {}
        p["wq"], p["bq"] = dense(D, D)
        p["wk"], p["bk"] = dense(D, D)
        p["wv"], p["bv"] = dense(D, D)
        p["wo"], p["bo"] = dense(D, D)
        return p

    params["saa_q"] = saa_params()
    params["saa_r"] = saa_params()

    # rank == 0 branch of the original module (dense w1).
    # TODO(synk): rank > 0 low-rank branch (s @ B @ C) not exercised here.
    params["w1"], params["b1"] = dense(D, D * out_feature)
    params["w2"], params["b2"] = dense(D, out_feature)
    return params


# --------------------------------- main ------------------------------------ #

if __name__ == "__main__":
    num_skills = 50
    out_feature = 8
    embed_size = 32
    in_dimension = 32
    num_heads = 2
    B, L = 2, 8

    key = jax.random.PRNGKey(0)
    kp, kx, kr, ksid, kw = jax.random.split(key, 5)
    params = init_params(kp, num_skills, out_feature, embed_size, in_dimension, num_heads)

    x = jax.random.normal(kx, (B, L, in_dimension), jnp.float32)
    r = jax.random.randint(kr, (B, L), 0, num_skills, dtype=jnp.int32)
    s = jax.random.randint(ksid, (B, L), 0, num_skills, dtype=jnp.int32)
    attention_reweight = jax.random.uniform(kw, (B, L), jnp.float32, 0.5, 1.5)

    fwd = jax.jit(functools.partial(generator_forward,
                                    num_heads=num_heads, out_feature=out_feature))
    out = jax.block_until_ready(fwd(params, x, r, s, attention_reweight))
    assert out.shape == (B, L, out_feature)
    assert bool(jnp.all(jnp.isfinite(out)))

    ref = _reference_forward(params, x, r, s, attention_reweight, num_heads, out_feature)
    assert bool(jnp.max(jnp.abs(out - ref)) < 1e-2), "kernel mismatch vs JAX reference"
    print("KERNEL_OK")
</pallas_src>

<mosaic_0001>
module attributes {stable_mosaic.version = 11 : i64} {
  func.func @_fused_generator_kernel(%arg0: i32, %arg1: memref<64x32xf32, #tpu.memory_space<vmem>>, %arg2: memref<2x8xf32, #tpu.memory_space<vmem>>, %arg3: memref<16x256xf32, #tpu.memory_space<vmem>>, %arg4: memref<32x32xf32, #tpu.memory_space<vmem>>, %arg5: memref<32x2304xf32, #tpu.memory_space<vmem>>, %arg6: memref<1x2432xf32, #tpu.memory_space<vmem>>, %arg7: memref<256x8xf32, #tpu.memory_space<vmem>>, %arg8: memref<16x8xf32, #tpu.memory_space<vmem>>, %arg9: memref<64x32xf32, #tpu.memory_space<vmem>>, %arg10: memref<16x32xf32, #tpu.memory_space<vmem>>) attributes {dimension_semantics = [#tpu.dimension_semantics<arbitrary>], iteration_bounds = array<i64: 1>, scalar_prefetch = 0 : i64, scratch_operands = 2 : i64, tpu.core_type = #tpu.core_type<tc>, window_params = [{pipeline_mode = #tpu.pipeline_mode<synchronous>, transform_indices = @transform_0, window_bounds = array<i64: 64, 32>}, {pipeline_mode = #tpu.pipeline_mode<synchronous>, transform_indices = @transform_1, window_bounds = array<i64: 2, 8>}, {pipeline_mode = #tpu.pipeline_mode<synchronous>, transform_indices = @transform_2, window_bounds = array<i64: 16, 256>}, {pipeline_mode = #tpu.pipeline_mode<synchronous>, transform_indices = @transform_3, window_bounds = array<i64: 32, 32>}, {pipeline_mode = #tpu.pipeline_mode<synchronous>, transform_indices = @transform_4, window_bounds = array<i64: 32, 2304>}, {pipeline_mode = #tpu.pipeline_mode<synchronous>, transform_indices = @transform_5, window_bounds = array<i64: 1, 2432>}, {pipeline_mode = #tpu.pipeline_mode<synchronous>, transform_indices = @transform_6, window_bounds = array<i64: 256, 8>}, {pipeline_mode = #tpu.pipeline_mode<synchronous>, transform_indices = @transform_7, window_bounds = array<i64: 16, 8>}]} {
    %c0 = arith.constant 0 : index
    %c2304 = arith.constant 2304 : index
    %0 = vector.load %arg6[%c0, %c2304] : memref<1x2432xf32, #tpu.memory_space<vmem>>, vector<1x32xf32>
    %c0_0 = arith.constant 0 : index
    %c0_1 = arith.constant 0 : index
    %1 = vector.load %arg5[%c0_0, %c0_1] : memref<32x2304xf32, #tpu.memory_space<vmem>>, vector<32x32xf32>
    %c0_2 = arith.constant 0 : index
    %c0_3 = arith.constant 0 : index
    %2 = vector.load %arg6[%c0_2, %c0_3] : memref<1x2432xf32, #tpu.memory_space<vmem>>, vector<1x32xf32>
    %c0_4 = arith.constant 0 : index
    %c0_5 = arith.constant 0 : index
    %3 = vector.load %arg1[%c0_4, %c0_5] : memref<64x32xf32, #tpu.memory_space<vmem>>, vector<64x32xf32>
    %c0_6 = arith.constant 0 : index
    %c0_7 = arith.constant 0 : index
    %4 = vector.load %arg4[%c0_6, %c0_7] : memref<32x32xf32, #tpu.memory_space<vmem>>, vector<32x32xf32>
    %cst = arith.constant dense<0.000000e+00> : vector<64x32xf32>
    %5 = tpu.matmul %3, %4, %cst {dimension_numbers = #tpu.dot_dimension_numbers<[1], [0], [0], [1], [0, 0, 1, 1], [], []>} : vector<64x32xf32>, vector<32x32xf32>, vector<64x32xf32> -> vector<64x32xf32>
    %6 = vector.broadcast %0 : vector<1x32xf32> to vector<64x32xf32>
    %7 = arith.addf %5, %6 : vector<64x32xf32>
    %8 = math.tanh %7 : vector<64x32xf32>
    %cst_8 = arith.constant dense<0.000000e+00> : vector<64x32xf32>
    %9 = tpu.matmul %8, %1, %cst_8 {dimension_numbers = #tpu.dot_dimension_numbers<[1], [0], [0], [1], [0, 0, 1, 1], [], []>} : vector<64x32xf32>, vector<32x32xf32>, vector<64x32xf32> -> vector<64x32xf32>
    %10 = vector.broadcast %2 : vector<1x32xf32> to vector<64x32xf32>
    %11 = arith.addf %9, %10 : vector<64x32xf32>
    %c0_9 = arith.constant 0 : index
    %c128 = arith.constant 128 : index
    %12 = vector.load %arg5[%c0_9, %c128] : memref<32x2304xf32, #tpu.memory_space<vmem>>, vector<32x384xf32>
    %c0_10 = arith.constant 0 : index
    %c128_11 = arith.constant 128 : index
    %13 = vector.load %arg6[%c0_10, %c128_11] : memref<1x2432xf32, #tpu.memory_space<vmem>>, vector<1x384xf32>
    %c0_12 = arith.constant 0 : index
    %c512 = arith.constant 512 : index
    %14 = vector.load %arg5[%c0_12, %c512] : memref<32x2304xf32, #tpu.memory_space<vmem>>, vector<32x384xf32>
    %c0_13 = arith.constant 0 : index
    %c512_14 = arith.constant 512 : index
    %15 = vector.load %arg6[%c0_13, %c512_14] : memref<1x2432xf32, #tpu.memory_space<vmem>>, vector<1x384xf32>
    %cst_15 = arith.constant dense<0.000000e+00> : vector<64x384xf32>
    %16 = tpu.matmul %11, %12, %cst_15 {dimension_numbers = #tpu.dot_dimension_numbers<[1], [0], [0], [1], [0, 0, 1, 1], [], []>} : vector<64x32xf32>, vector<32x384xf32>, vector<64x384xf32> -> vector<64x384xf32>
    %17 = vector.broadcast %13 : vector<1x384xf32> to vector<64x384xf32>
    %18 = arith.addf %16, %17 : vector<64x384xf32>
    %cst_16 = arith.constant 0.000000e+00 : f32
    %19 = vector.broadcast %cst_16 : f32 to vector<8x32xf32>
    %20 = vector.extract_strided_slice %18 {offsets = [0, 0], sizes = [8, 384], strides = [1, 1]} : vector<64x384xf32> to vector<8x384xf32>
    %cst_17 = arith.constant dense<0.000000e+00> : vector<8x384xf32>
    %21 = tpu.matmul %19, %14, %cst_17 {dimension_numbers = #tpu.dot_dimension_numbers<[1], [0], [0], [1], [0, 0, 1, 1], [], []>} : vector<8x32xf32>, vector<32x384xf32>, vector<8x384xf32> -> vector<8x384xf32>
    %22 = vector.broadcast %15 : vector<1x384xf32> to vector<8x384xf32>
    %23 = arith.addf %21, %22 : vector<8x384xf32>
    %24 = vector.extract_strided_slice %20 {offsets = [0, 0], sizes = [8, 32], strides = [1, 1]} : vector<8x384xf32> to vector<8x32xf32>
    %25 = vector.extract_strided_slice %23 {offsets = [0, 0], sizes = [8, 32], strides = [1, 1]} : vector<8x384xf32> to vector<8x32xf32>
    %26 = arith.addf %24, %25 : vector<8x32xf32>
    %27 = arith.negf %26 : vector<8x32xf32>
    %28 = math.exp %27 : vector<8x32xf32>
    %cst_18 = arith.constant 1.000000e+00 : f32
    %29 = vector.broadcast %cst_18 : f32 to vector<8x32xf32>
    %30 = arith.addf %29, %28 : vector<8x32xf32>
    %31 = arith.divf %29, %30 : vector<8x32xf32>
    %32 = vector.extract_strided_slice %20 {offsets = [0, 128], sizes = [8, 32], strides = [1, 1]} : vector<8x384xf32> to vector<8x32xf32>
    %33 = vector.extract_strided_slice %23 {offsets = [0, 128], sizes = [8, 32], strides = [1, 1]} : vector<8x384xf32> to vector<8x32xf32>
    %34 = arith.addf %32, %33 : vector<8x32xf32>
    %35 = arith.negf %34 : vector<8x32xf32>
    %36 = math.exp %35 : vector<8x32xf32>
    %cst_19 = arith.constant 1.000000e+00 : f32
    %37 = vector.broadcast %cst_19 : f32 to vector<8x32xf32>
    %38 = arith.addf %37, %36 : vector<8x32xf32>
    %39 = arith.divf %37, %38 : vector<8x32xf32>
    %40 = vector.extract_strided_slice %20 {offsets = [0, 256], sizes = [8, 32], strides = [1, 1]} : vector<8x384xf32> to vector<8x32xf32>
    %41 = vector.extract_strided_slice %23 {offsets = [0, 256], sizes = [8, 32], strides = [1, 1]} : vector<8x384xf32> to vector<8x32xf32>
    %42 = arith.mulf %31, %41 : vector<8x32xf32>
    %43 = arith.addf %40, %42 : vector<8x32xf32>
    %44 = math.tanh %43 : vector<8x32xf32>
    %cst_20 = arith.constant 1.000000e+00 : f32
    %45 = vector.broadcast %cst_20 : f32 to vector<8x32xf32>
    %46 = arith.subf %45, %39 : vector<8x32xf32>
    %47 = arith.mulf %46, %44 : vector<8x32xf32>
    %48 = arith.mulf %39, %19 : vector<8x32xf32>
    %49 = arith.addf %47, %48 : vector<8x32xf32>
    %c0_21 = arith.constant 0 : index
    %c0_22 = arith.constant 0 : index
    %50 = vector.load %arg9[%c0_21, %c0_22] : memref<64x32xf32, #tpu.memory_space<vmem>>, vector<8x32xf32>
    tpu.vector_store %arg9[%c0_21, %c0_22], %49 {strides = array<i32>} : memref<64x32xf32, #tpu.memory_space<vmem>>, vector<8x32xf32>,
    %51 = vector.extract_strided_slice %18 {offsets = [8, 0], sizes = [8, 384], strides = [1, 1]} : vector<64x384xf32> to vector<8x384xf32>
    %cst_23 = arith.constant dense<0.000000e+00> : vector<8x384xf32>
    %52 = tpu.matmul %49, %14, %cst_23 {dimension_numbers = #tpu.dot_dimension_numbers<[1], [0], [0], [1], [0, 0, 1, 1], [], []>} : vector<8x32xf32>, vector<32x384xf32>, vector<8x384xf32> -> vector<8x384xf32>
    %53 = vector.broadcast %15 : vector<1x384xf32> to vector<8x384xf32>
    %54 = arith.addf %52, %53 : vector<8x384xf32>
    %55 = vector.extract_strided_slice %51 {offsets = [0, 0], sizes = [8, 32], strides = [1, 1]} : vector<8x384xf32> to vector<8x32xf32>
    %56 = vector.extract_strided_slice %54 {offsets = [0, 0], sizes = [8, 32], strides = [1, 1]} : vector<8x384xf32> to vector<8x32xf32>
    %57 = arith.addf %55, %56 : vector<8x32xf32>
    %58 = arith.negf %57 : vector<8x32xf32>
    %59 = math.exp %58 : vector<8x32xf32>
    %cst_24 = arith.constant 1.000000e+00 : f32
    %60 = vector.broadcast %cst_24 : f32 to vector<8x32xf32>
    %61 = arith.addf %60, %59 : vector<8x32xf32>
    %62 = arith.divf %60, %61 : vector<8x32xf32>
    %63 = vector.extract_strided_slice %51 {offsets = [0, 128], sizes = [8, 32], strides = [1, 1]} : vector<8x384xf32> to vector<8x32xf32>
    %64 = vector.extract_strided_slice %54 {offsets = [0, 128], sizes = [8, 32], strides = [1, 1]} : vector<8x384xf32> to vector<8x32xf32>
    %65 = arith.addf %63, %64 : vector<8x32xf32>
    %66 = arith.negf %65 : vector<8x32xf32>
    %67 = math.exp %66 : vector<8x32xf32>
    %cst_25 = arith.constant 1.000000e+00 : f32
    %68 = vector.broadcast %cst_25 : f32 to vector<8x32xf32>
    %69 = arith.addf %68, %67 : vector<8x32xf32>
    %70 = arith.divf %68, %69 : vector<8x32xf32>
    %71 = vector.extract_strided_slice %51 {offsets = [0, 256], sizes = [8, 32], strides = [1, 1]} : vector<8x384xf32> to vector<8x32xf32>
    %72 = vector.extract_strided_slice %54 {offsets = [0, 256], sizes = [8, 32], strides = [1, 1]} : vector<8x384xf32> to vector<8x32xf32>
    %73 = arith.mulf %62, %72 : vector<8x32xf32>
    %74 = arith.addf %71, %73 : vector<8x32xf32>
    %75 = math.tanh %74 : vector<8x32xf32>
    %cst_26 = arith.constant 1.000000e+00 : f32
    %76 = vector.broadcast %cst_26 : f32 to vector<8x32xf32>
    %77 = arith.subf %76, %70 : vector<8x32xf32>
    %78 = arith.mulf %77, %75 : vector<8x32xf32>
    %79 = arith.mulf %70, %49 : vector<8x32xf32>
    %80 = arith.addf %78, %79 : vector<8x32xf32>
    %c8 = arith.constant 8 : index
    %c0_27 = arith.constant 0 : index
    %81 = vector.load %arg9[%c8, %c0_27] : memref<64x32xf32, #tpu.memory_space<vmem>>, vector<8x32xf32>
    tpu.vector_store %arg9[%c8, %c0_27], %80 {strides = array<i32>} : memref<64x32xf32, #tpu.memory_space<vmem>>, vector<8x32xf32>,
    %82 = vector.extract_strided_slice %18 {offsets = [16, 0], sizes = [8, 384], strides = [1, 1]} : vector<64x384xf32> to vector<8x384xf32>
    %cst_28 = arith.constant dense<0.000000e+00> : vector<8x384xf32>
    %83 = tpu.matmul %80, %14, %cst_28 {dimension_numbers = #tpu.dot_dimension_numbers<[1], [0], [0], [1], [0, 0, 1, 1], [], []>} : vector<8x32xf32>, vector<32x384xf32>, vector<8x384xf32> -> vector<8x384xf32>
    %84 = vector.broadcast %15 : vector<1x384xf32> to vector<8x384xf32>
    %85 = arith.addf %83, %84 : vector<8x384xf32>
    %86 = vector.extract_strided_slice %82 {offsets = [0, 0], sizes = [8, 32], strides = [1, 1]} : vector<8x384xf32> to vector<8x32xf32>
    %87 = vector.extract_strided_slice %85 {offsets = [0, 0], sizes = [8, 32], strides = [1, 1]} : vector<8x384xf32> to vector<8x32xf32>
    %88 = arith.addf %86, %87 : vector<8x32xf32>
    %89 = arith.negf %88 : vector<8x32xf32>
    %90 = math.exp %89 : vector<8x32xf32>
    %cst_29 = arith.constant 1.000000e+00 : f32
    %91 = vector.broadcast %cst_29 : f32 to vector<8x32xf32>
    %92 = arith.addf %91, %90 : vector<8x32xf32>
    %93 = arith.divf %91, %92 : vector<8x32xf32>
    %94 = vector.extract_strided_slice %82 {offsets = [0, 128], sizes = [8, 32], strides = [1, 1]} : vector<8x384xf32> to vector<8x32xf32>
    %95 = vector.extract_strided_slice %85 {offsets = [0, 128], sizes = [8, 32], strides = [1, 1]} : vector<8x384xf32> to vector<8x32xf32>
    %96 = arith.addf %94, %95 : vector<8x32xf32>
    %97 = arith.negf %96 : vector<8x32xf32>
    %98 = math.exp %97 : vector<8x32xf32>
    %cst_30 = arith.constant 1.000000e+00 : f32
    %99 = vector.broadcast %cst_30 : f32 to vector<8x32xf32>
    %100 = arith.addf %99, %98 : vector<8x32xf32>
    %101 = arith.divf %99, %100 : vector<8x32xf32>
    %102 = vector.extract_strided_slice %82 {offsets = [0, 256], sizes = [8, 32], strides = [1, 1]} : vector<8x384xf32> to vector<8x32xf32>
    %103 = vector.extract_strided_slice %85 {offsets = [0, 256], sizes = [8, 32], strides = [1, 1]} : vector<8x384xf32> to vector<8x32xf32>
    %104 = arith.mulf %93, %103 : vector<8x32xf32>
    %105 = arith.addf %102, %104 : vector<8x32xf32>
    %106 = math.tanh %105 : vector<8x32xf32>
    %cst_31 = arith.constant 1.000000e+00 : f32
    %107 = vector.broadcast %cst_31 : f32 to vector<8x32xf32>
    %108 = arith.subf %107, %101 : vector<8x32xf32>
    %109 = arith.mulf %108, %106 : vector<8x32xf32>
    %110 = arith.mulf %101, %80 : vector<8x32xf32>
    %111 = arith.addf %109, %110 : vector<8x32xf32>
    %c16 = arith.constant 16 : index
    %c0_32 = arith.constant 0 : index
    %112 = vector.load %arg9[%c16, %c0_32] : memref<64x32xf32, #tpu.memory_space<vmem>>, vector<8x32xf32>
    tpu.vector_store %arg9[%c16, %c0_32], %111 {strides = array<i32>} : memref<64x32xf32, #tpu.memory_space<vmem>>, vector<8x32xf32>,
    %113 = vector.extract_strided_slice %18 {offsets = [24, 0], sizes = [8, 384], strides = [1, 1]} : vector<64x384xf32> to vector<8x384xf32>
    %cst_33 = arith.constant dense<0.000000e+00> : vector<8x384xf32>
    %114 = tpu.matmul %111, %14, %cst_33 {dimension_numbers = #tpu.dot_dimension_numbers<[1], [0], [0], [1], [0, 0, 1, 1], [], []>} : vector<8x32xf32>, vector<32x384xf32>, vector<8x384xf32> -> vector<8x384xf32>
    %115 = vector.broadcast %15 : vector<1x384xf32> to vector<8x384xf32>
    %116 = arith.addf %114, %115 : vector<8x384xf32>
    %117 = vector.extract_strided_slice %113 {offsets = [0, 0], sizes = [8, 32], strides = [1, 1]} : vector<8x384xf32> to vector<8x32xf32>
    %118 = vector.extract_strided_slice %116 {offsets = [0, 0], sizes = [8, 32], strides = [1, 1]} : vector<8x384xf32> to vector<8x32xf32>
    %119 = arith.addf %117, %118 : vector<8x32xf32>
    %120 = arith.negf %119 : vector<8x32xf32>
    %121 = math.exp %120 : vector<8x32xf32>
    %cst_34 = arith.constant 1.000000e+00 : f32
    %122 = vector.broadcast %cst_34 : f32 to vector<8x32xf32>
    %123 = arith.addf %122, %121 : vector<8x32xf32>
    %124 = arith.divf %122, %123 : vector<8x32xf32>
    %125 = vector.extract_strided_slice %113 {offsets = [0, 128], sizes = [8, 32], strides = [1, 1]} : vector<8x384xf32> to vector<8x32xf32>
    %126 = vector.extract_strided_slice %116 {offsets = [0, 128], sizes = [8, 32], strides = [1, 1]} : vector<8x384xf32> to vector<8x32xf32>
    %127 = arith.addf %125, %126 : vector<8x32xf32>
    %128 = arith.negf %127 : vector<8x32xf32>
    %129 = math.exp %128 : vector<8x32xf32>
    %cst_35 = arith.constant 1.000000e+00 : f32
    %130 = vector.broadcast %cst_35 : f32 to vector<8x32xf32>
    %131 = arith.addf %130, %129 : vector<8x32xf32>
    %132 = arith.divf %130, %131 : vector<8x32xf32>
    %133 = vector.extract_strided_slice %113 {offsets = [0, 256], sizes = [8, 32], strides = [1, 1]} : vector<8x384xf32> to vector<8x32xf32>
    %134 = vector.extract_strided_slice %116 {offsets = [0, 256], sizes = [8, 32], strides = [1, 1]} : vector<8x384xf32> to vector<8x32xf32>
    %135 = arith.mulf %124, %134 : vector<8x32xf32>
    %136 = arith.addf %133, %135 : vector<8x32xf32>
    %137 = math.tanh %136 : vector<8x32xf32>
    %cst_36 = arith.constant 1.000000e+00 : f32
    %138 = vector.broadcast %cst_36 : f32 to vector<8x32xf32>
    %139 = arith.subf %138, %132 : vector<8x32xf32>
    %140 = arith.mulf %139, %137 : vector<8x32xf32>
    %141 = arith.mulf %132, %111 : vector<8x32xf32>
    %142 = arith.addf %140, %141 : vector<8x32xf32>
    %c24 = arith.constant 24 : index
    %c0_37 = arith.constant 0 : index
    %143 = vector.load %arg9[%c24, %c0_37] : memref<64x32xf32, #tpu.memory_space<vmem>>, vector<8x32xf32>
    tpu.vector_store %arg9[%c24, %c0_37], %142 {strides = array<i32>} : memref<64x32xf32, #tpu.memory_space<vmem>>, vector<8x32xf32>,
    %144 = vector.extract_strided_slice %18 {offsets = [32, 0], sizes = [8, 384], strides = [1, 1]} : vector<64x384xf32> to vector<8x384xf32>
    %cst_38 = arith.constant dense<0.000000e+00> : vector<8x384xf32>
    %145 = tpu.matmul %142, %14, %cst_38 {dimension_numbers = #tpu.dot_dimension_numbers<[1], [0], [0], [1], [0, 0, 1, 1], [], []>} : vector<8x32xf32>, vector<32x384xf32>, vector<8x384xf32> -> vector<8x384xf32>
    %146 = vector.broadcast %15 : vector<1x384xf32> to vector<8x384xf32>
    %147 = arith.addf %145, %146 : vector<8x384xf32>
    %148 = vector.extract_strided_slice %144 {offsets = [0, 0], sizes = [8, 32], strides = [1, 1]} : vector<8x384xf32> to vector<8x32xf32>
    %149 = vector.extract_strided_slice %147 {offsets = [0, 0], sizes = [8, 32], strides = [1, 1]} : vector<8x384xf32> to vector<8x32xf32>
    %150 = arith.addf %148, %149 : vector<8x32xf32>
    %151 = arith.negf %150 : vector<8x32xf32>
    %152 = math.exp %151 : vector<8x32xf32>
    %cst_39 = arith.constant 1.000000e+00 : f32
    %153 = vector.broadcast %cst_39 : f32 to vector<8x32xf32>
    %154 = arith.addf %153, %152 : vector<8x32xf32>
    %155 = arith.divf %153, %154 : vector<8x32xf32>
    %156 = vector.extract_strided_slice %144 {offsets = [0, 128], sizes = [8, 32], strides = [1, 1]} : vector<8x384xf32> to vector<8x32xf32>
    %157 = vector.extract_strided_slice %147 {offsets = [0, 128], sizes = [8, 32], strides = [1, 1]} : vector<8x384xf32> to vector<8x32xf32>
    %158 = arith.addf %156, %157 : vector<8x32xf32>
    %159 = arith.negf %158 : vector<8x32xf32>
    %160 = math.exp %159 : vector<8x32xf32>
    %cst_40 = arith.constant 1.000000e+00 : f32
    %161 = vector.broadcast %cst_40 : f32 to vector<8x32xf32>
    %162 = arith.addf %161, %160 : vector<8x32xf32>
    %163 = arith.divf %161, %162 : vector<8x32xf32>
    %164 = vector.extract_strided_slice %144 {offsets = [0, 256], sizes = [8, 32], strides = [1, 1]} : vector<8x384xf32> to vector<8x32xf32>
    %165 = vector.extract_strided_slice %147 {offsets = [0, 256], sizes = [8, 32], strides = [1, 1]} : vector<8x384xf32> to vector<8x32xf32>
    %166 = arith.mulf %155, %165 : vector<8x32xf32>
    %167 = arith.addf %164, %166 : vector<8x32xf32>
    %168 = math.tanh %167 : vector<8x32xf32>
    %cst_41 = arith.constant 1.000000e+00 : f32
    %169 = vector.broadcast %cst_41 : f32 to vector<8x32xf32>
    %170 = arith.subf %169, %163 : vector<8x32xf32>
    %171 = arith.mulf %170, %168 : vector<8x32xf32>
    %172 = arith.mulf %163, %142 : vector<8x32xf32>
    %173 = arith.addf %171, %172 : vector<8x32xf32>
    %c32 = arith.constant 32 : index
    %c0_42 = arith.constant 0 : index
    %174 = vector.load %arg9[%c32, %c0_42] : memref<64x32xf32, #tpu.memory_space<vmem>>, vector<8x32xf32>
    tpu.vector_store %arg9[%c32, %c0_42], %173 {strides = array<i32>} : memref<64x32xf32, #tpu.memory_space<vmem>>, vector<8x32xf32>,
    %175 = vector.extract_strided_slice %18 {offsets = [40, 0], sizes = [8, 384], strides = [1, 1]} : vector<64x384xf32> to vector<8x384xf32>
    %cst_43 = arith.constant dense<0.000000e+00> : vector<8x384xf32>
    %176 = tpu.matmul %173, %14, %cst_43 {dimension_numbers = #tpu.dot_dimension_numbers<[1], [0], [0], [1], [0, 0, 1, 1], [], []>} : vector<8x32xf32>, vector<32x384xf32>, vector<8x384xf32> -> vector<8x384xf32>
    %177 = vector.broadcast %15 : vector<1x384xf32> to vector<8x384xf32>
    %178 = arith.addf %176, %177 : vector<8x384xf32>
    %179 = vector.extract_strided_slice %175 {offsets = [0, 0], sizes = [8, 32], strides = [1, 1]} : vector<8x384xf32> to vector<8x32xf32>
    %180 = vector.extract_strided_slice %178 {offsets = [0, 0], sizes = [8, 32], strides = [1, 1]} : vector<8x384xf32> to vector<8x32xf32>
    %181 = arith.addf %179, %180 : vector<8x32xf32>
    %182 = arith.negf %181 : vector<8x32xf32>
    %183 = math.exp %182 : vector<8x32xf32>
    %cst_44 = arith.constant 1.000000e+00 : f32
    %184 = vector.broadcast %cst_44 : f32 to vector<8x32xf32>
    %185 = arith.addf %184, %183 : vector<8x32xf32>
    %186 = arith.divf %184, %185 : vector<8x32xf32>
    %187 = vector.extract_strided_slice %175 {offsets = [0, 128], sizes = [8, 32], strides = [1, 1]} : vector<8x384xf32> to vector<8x32xf32>
    %188 = vector.extract_strided_slice %178 {offsets = [0, 128], sizes = [8, 32], strides = [1, 1]} : vector<8x384xf32> to vector<8x32xf32>
    %189 = arith.addf %187, %188 : vector<8x32xf32>
    %190 = arith.negf %189 : vector<8x32xf32>
    %191 = math.exp %190 : vector<8x32xf32>
    %cst_45 = arith.constant 1.000000e+00 : f32
    %192 = vector.broadcast %cst_45 : f32 to vector<8x32xf32>
    %193 = arith.addf %192, %191 : vector<8x32xf32>
    %194 = arith.divf %192, %193 : vector<8x32xf32>
    %195 = vector.extract_strided_slice %175 {offsets = [0, 256], sizes = [8, 32], strides = [1, 1]} : vector<8x384xf32> to vector<8x32xf32>
    %196 = vector.extract_strided_slice %178 {offsets = [0, 256], sizes = [8, 32], strides = [1, 1]} : vector<8x384xf32> to vector<8x32xf32>
    %197 = arith.mulf %186, %196 : vector<8x32xf32>
    %198 = arith.addf %195, %197 : vector<8x32xf32>
    %199 = math.tanh %198 : vector<8x32xf32>
    %cst_46 = arith.constant 1.000000e+00 : f32
    %200 = vector.broadcast %cst_46 : f32 to vector<8x32xf32>
    %201 = arith.subf %200, %194 : vector<8x32xf32>
    %202 = arith.mulf %201, %199 : vector<8x32xf32>
    %203 = arith.mulf %194, %173 : vector<8x32xf32>
    %204 = arith.addf %202, %203 : vector<8x32xf32>
    %c40 = arith.constant 40 : index
    %c0_47 = arith.constant 0 : index
    %205 = vector.load %arg9[%c40, %c0_47] : memref<64x32xf32, #tpu.memory_space<vmem>>, vector<8x32xf32>
    tpu.vector_store %arg9[%c40, %c0_47], %204 {strides = array<i32>} : memref<64x32xf32, #tpu.memory_space<vmem>>, vector<8x32xf32>,
    %206 = vector.extract_strided_slice %18 {offsets = [48, 0], sizes = [8, 384], strides = [1, 1]} : vector<64x384xf32> to vector<8x384xf32>
    %cst_48 = arith.constant dense<0.000000e+00> : vector<8x384xf32>
    %207 = tpu.matmul %204, %14, %cst_48 {dimension_numbers = #tpu.dot_dimension_numbers<[1], [0], [0], [1], [0, 0, 1, 1], [], []>} : vector<8x32xf32>, vector<32x384xf32>, vector<8x384xf32> -> vector<8x384xf32>
    %208 = vector.broadcast %15 : vector<1x384xf32> to vector<8x384xf32>
    %209 = arith.addf %207, %208 : vector<8x384xf32>
    %210 = vector.extract_strided_slice %206 {offsets = [0, 0], sizes = [8, 32], strides = [1, 1]} : vector<8x384xf32> to vector<8x32xf32>
    %211 = vector.extract_strided_slice %209 {offsets = [0, 0], sizes = [8, 32], strides = [1, 1]} : vector<8x384xf32> to vector<8x32xf32>
    %212 = arith.addf %210, %211 : vector<8x32xf32>
    %213 = arith.negf %212 : vector<8x32xf32>
    %214 = math.exp %213 : vector<8x32xf32>
    %cst_49 = arith.constant 1.000000e+00 : f32
    %215 = vector.broadcast %cst_49 : f32 to vector<8x32xf32>
    %216 = arith.addf %215, %214 : vector<8x32xf32>
    %217 = arith.divf %215, %216 : vector<8x32xf32>
    %218 = vector.extract_strided_slice %206 {offsets = [0, 128], sizes = [8, 32], strides = [1, 1]} : vector<8x384xf32> to vector<8x32xf32>
    %219 = vector.extract_strided_slice %209 {offsets = [0, 128], sizes = [8, 32], strides = [1, 1]} : vector<8x384xf32> to vector<8x32xf32>
    %220 = arith.addf %218, %219 : vector<8x32xf32>
    %221 = arith.negf %220 : vector<8x32xf32>
    %222 = math.exp %221 : vector<8x32xf32>
    %cst_50 = arith.constant 1.000000e+00 : f32
    %223 = vector.broadcast %cst_50 : f32 to vector<8x32xf32>
    %224 = arith.addf %223, %222 : vector<8x32xf32>
    %225 = arith.divf %223, %224 : vector<8x32xf32>
    %226 = vector.extract_strided_slice %206 {offsets = [0, 256], sizes = [8, 32], strides = [1, 1]} : vector<8x384xf32> to vector<8x32xf32>
    %227 = vector.extract_strided_slice %209 {offsets = [0, 256], sizes = [8, 32], strides = [1, 1]} : vector<8x384xf32> to vector<8x32xf32>
    %228 = arith.mulf %217, %227 : vector<8x32xf32>
    %229 = arith.addf %226, %228 : vector<8x32xf32>
    %230 = math.tanh %229 : vector<8x32xf32>
    %cst_51 = arith.constant 1.000000e+00 : f32
    %231 = vector.broadcast %cst_51 : f32 to vector<8x32xf32>
    %232 = arith.subf %231, %225 : vector<8x32xf32>
    %233 = arith.mulf %232, %230 : vector<8x32xf32>
    %234 = arith.mulf %225, %204 : vector<8x32xf32>
    %235 = arith.addf %233, %234 : vector<8x32xf32>
    %c48 = arith.constant 48 : index
    %c0_52 = arith.constant 0 : index
    %236 = vector.load %arg9[%c48, %c0_52] : memref<64x32xf32, #tpu.memory_space<vmem>>, vector<8x32xf32>
    tpu.vector_store %arg9[%c48, %c0_52], %235 {strides = array<i32>} : memref<64x32xf32, #tpu.memory_space<vmem>>, vector<8x32xf32>,
    %237 = vector.extract_strided_slice %18 {offsets = [56, 0], sizes = [8, 384], strides = [1, 1]} : vector<64x384xf32> to vector<8x384xf32>
    %cst_53 = arith.constant dense<0.000000e+00> : vector<8x384xf32>
    %238 = tpu.matmul %235, %14, %cst_53 {dimension_numbers = #tpu.dot_dimension_numbers<[1], [0], [0], [1], [0, 0, 1, 1], [], []>} : vector<8x32xf32>, vector<32x384xf32>, vector<8x384xf32> -> vector<8x384xf32>
    %239 = vector.broadcast %15 : vector<1x384xf32> to vector<8x384xf32>
    %240 = arith.addf %238, %239 : vector<8x384xf32>
    %241 = vector.extract_strided_slice %237 {offsets = [0, 0], sizes = [8, 32], strides = [1, 1]} : vector<8x384xf32> to vector<8x32xf32>
    %242 = vector.extract_strided_slice %240 {offsets = [0, 0], sizes = [8, 32], strides = [1, 1]} : vector<8x384xf32> to vector<8x32xf32>
    %243 = arith.addf %241, %242 : vector<8x32xf32>
    %244 = arith.negf %243 : vector<8x32xf32>
    %245 = math.exp %244 : vector<8x32xf32>
    %cst_54 = arith.constant 1.000000e+00 : f32
    %246 = vector.broadcast %cst_54 : f32 to vector<8x32xf32>
    %247 = arith.addf %246, %245 : vector<8x32xf32>
    %248 = arith.divf %246, %247 : vector<8x32xf32>
    %249 = vector.extract_strided_slice %237 {offsets = [0, 128], sizes = [8, 32], strides = [1, 1]} : vector<8x384xf32> to vector<8x32xf32>
    %250 = vector.extract_strided_slice %240 {offsets = [0, 128], sizes = [8, 32], strides = [1, 1]} : vector<8x384xf32> to vector<8x32xf32>
    %251 = arith.addf %249, %250 : vector<8x32xf32>
    %252 = arith.negf %251 : vector<8x32xf32>
    %253 = math.exp %252 : vector<8x32xf32>
    %cst_55 = arith.constant 1.000000e+00 : f32
    %254 = vector.broadcast %cst_55 : f32 to vector<8x32xf32>
    %255 = arith.addf %254, %253 : vector<8x32xf32>
    %256 = arith.divf %254, %255 : vector<8x32xf32>
    %257 = vector.extract_strided_slice %237 {offsets = [0, 256], sizes = [8, 32], strides = [1, 1]} : vector<8x384xf32> to vector<8x32xf32>
    %258 = vector.extract_strided_slice %240 {offsets = [0, 256], sizes = [8, 32], strides = [1, 1]} : vector<8x384xf32> to vector<8x32xf32>
    %259 = arith.mulf %248, %258 : vector<8x32xf32>
    %260 = arith.addf %257, %259 : vector<8x32xf32>
    %261 = math.tanh %260 : vector<8x32xf32>
    %cst_56 = arith.constant 1.000000e+00 : f32
    %262 = vector.broadcast %cst_56 : f32 to vector<8x32xf32>
    %263 = arith.subf %262, %256 : vector<8x32xf32>
    %264 = arith.mulf %263, %261 : vector<8x32xf32>
    %265 = arith.mulf %256, %235 : vector<8x32xf32>
    %266 = arith.addf %264, %265 : vector<8x32xf32>
    %c56 = arith.constant 56 : index
    %c0_57 = arith.constant 0 : index
    %267 = vector.load %arg9[%c56, %c0_57] : memref<64x32xf32, #tpu.memory_space<vmem>>, vector<8x32xf32>
    tpu.vector_store %arg9[%c56, %c0_57], %266 {strides = array<i32>} : memref<64x32xf32, #tpu.memory_space<vmem>>, vector<8x32xf32>,
    %c0_58 = arith.constant 0 : index
    %c896 = arith.constant 896 : index
    %268 = vector.load %arg5[%c0_58, %c896] : memref<32x2304xf32, #tpu.memory_space<vmem>>, vector<32x768xf32>
    %c0_59 = arith.constant 0 : index
    %c896_60 = arith.constant 896 : index
    %269 = vector.load %arg6[%c0_59, %c896_60] : memref<1x2432xf32, #tpu.memory_space<vmem>>, vector<1x768xf32>
    %c0_61 = arith.constant 0 : index
    %c0_62 = arith.constant 0 : index
    %270 = vector.load %arg9[%c0_61, %c0_62] : memref<64x32xf32, #tpu.memory_space<vmem>>, vector<64x32xf32>
    %cst_63 = arith.constant dense<0.000000e+00> : vector<64x768xf32>
    %271 = tpu.matmul %270, %268, %cst_63 {dimension_numbers = #tpu.dot_dimension_numbers<[1], [0], [0], [1], [0, 0, 1, 1], [], []>} : vector<64x32xf32>, vector<32x768xf32>, vector<64x768xf32> -> vector<64x768xf32>
    %272 = vector.broadcast %269 : vector<1x768xf32> to vector<64x768xf32>
    %273 = arith.addf %271, %272 : vector<64x768xf32>
    %274 = vector.shape_cast %273 : vector<64x768xf32> to vector<8x8x768xf32>
    %275 = tpu.iota {dimensions = array<i32: 0>} : vector<8x8xi32>
    %276 = tpu.iota {dimensions = array<i32: 1>} : vector<8x8xi32>
    %277 = arith.cmpi sgt, %276, %275 : vector<8x8xi32>
    %cst_64 = arith.constant 2.500000e+08 : f32
    %cst_65 = arith.constant 0.000000e+00 : f32
    %278 = vector.broadcast %cst_64 : f32 to vector<8x8xf32>
    %279 = vector.broadcast %cst_65 : f32 to vector<8x8xf32>
    %280 = arith.select %277, %278, %279 : vector<8x8xi1>, vector<8x8xf32>
    %281 = tpu.iota {dimensions = array<i32: 1>} : vector<1x32xi32>
    %c0_i32 = arith.constant 0 : i32
    %282 = vector.broadcast %c0_i32 : i32 to vector<1x32xi32>
    %283 = arith.cmpi sge, %281, %282 : vector<1x32xi32>
    %c16_i32 = arith.constant 16 : i32
    %284 = vector.broadcast %c16_i32 : i32 to vector<1x32xi32>
    %285 = arith.cmpi slt, %281, %284 : vector<1x32xi32>
    %286 = arith.andi %283, %285 : vector<1x32xi1>
    %cst_66 = arith.constant 1.000000e+00 : f32
    %cst_67 = arith.constant 0.000000e+00 : f32
    %287 = vector.broadcast %cst_66 : f32 to vector<1x32xf32>
    %288 = vector.broadcast %cst_67 : f32 to vector<1x32xf32>
    %289 = arith.select %286, %287, %288 : vector<1x32xi1>, vector<1x32xf32>
    %c16_i32_68 = arith.constant 16 : i32
    %290 = vector.broadcast %c16_i32_68 : i32 to vector<1x32xi32>
    %291 = arith.cmpi sge, %281, %290 : vector<1x32xi32>
    %c32_i32 = arith.constant 32 : i32
    %292 = vector.broadcast %c32_i32 : i32 to vector<1x32xi32>
    %293 = arith.cmpi slt, %281, %292 : vector<1x32xi32>
    %294 = arith.andi %291, %293 : vector<1x32xi1>
    %cst_69 = arith.constant 1.000000e+00 : f32
    %cst_70 = arith.constant 0.000000e+00 : f32
    %295 = vector.broadcast %cst_69 : f32 to vector<1x32xf32>
    %296 = vector.broadcast %cst_70 : f32 to vector<1x32xf32>
    %297 = arith.select %294, %295, %296 : vector<1x32xi1>, vector<1x32xf32>
    %c0_71 = arith.constant 0 : index
    %c1664 = arith.constant 1664 : index
    %298 = vector.load %arg5[%c0_71, %c1664] : memref<32x2304xf32, #tpu.memory_space<vmem>>, vector<32x32xf32>
    %c0_72 = arith.constant 0 : index
    %c1664_73 = arith.constant 1664 : index
    %299 = vector.load %arg6[%c0_72, %c1664_73] : memref<1x2432xf32, #tpu.memory_space<vmem>>, vector<1x32xf32>
    %c0_74 = arith.constant 0 : index
    %c1792 = arith.constant 1792 : index
    %300 = vector.load %arg5[%c0_74, %c1792] : memref<32x2304xf32, #tpu.memory_space<vmem>>, vector<32x32xf32>
    %c0_75 = arith.constant 0 : index
    %c1792_76 = arith.constant 1792 : index
    %301 = vector.load %arg6[%c0_75, %c1792_76] : memref<1x2432xf32, #tpu.memory_space<vmem>>, vector<1x32xf32>
    %c0_77 = arith.constant 0 : index
    %c0_78 = arith.constant 0 : index
    %302 = vector.load %arg2[%c0_77, %c0_78] : memref<2x8xf32, #tpu.memory_space<vmem>>, vector<1x8xf32>
    %303 = vector.extract_strided_slice %274 {offsets = [0, 0, 0], sizes = [8, 1, 384], strides = [1, 1, 1]} : vector<8x8x768xf32> to vector<8x1x384xf32>
    %304 = vector.shape_cast %303 : vector<8x1x384xf32> to vector<8x384xf32>
    %305 = vector.extract_strided_slice %274 {offsets = [0, 2, 384], sizes = [8, 1, 384], strides = [1, 1, 1]} : vector<8x8x768xf32> to vector<8x1x384xf32>
    %306 = vector.shape_cast %305 : vector<8x1x384xf32> to vector<8x384xf32>
    %307 = vector.extract_strided_slice %304 {offsets = [0, 0], sizes = [8, 32], strides = [1, 1]} : vector<8x384xf32> to vector<8x32xf32>
    %cst_79 = arith.constant 2.500000e-01 : f32
    %308 = vector.broadcast %cst_79 : f32 to vector<8x32xf32>
    %309 = arith.mulf %307, %308 : vector<8x32xf32>
    %310 = vector.extract_strided_slice %304 {offsets = [0, 128], sizes = [8, 32], strides = [1, 1]} : vector<8x384xf32> to vector<8x32xf32>
    %311 = vector.extract_strided_slice %304 {offsets = [0, 256], sizes = [8, 32], strides = [1, 1]} : vector<8x384xf32> to vector<8x32xf32>
    %cst_80 = arith.constant 0.000000e+00 : f32
    %312 = vector.broadcast %cst_80 : f32 to vector<8x32xf32>
    %313 = vector.broadcast %289 : vector<1x32xf32> to vector<8x32xf32>
    %314 = arith.mulf %309, %313 : vector<8x32xf32>
    %315 = vector.broadcast %289 : vector<1x32xf32> to vector<8x32xf32>
    %316 = arith.mulf %310, %315 : vector<8x32xf32>
    %cst_81 = arith.constant dense<0.000000e+00> : vector<8x8xf32>
    %317 = tpu.matmul %314, %316, %cst_81 {dimension_numbers = #tpu.dot_dimension_numbers<[1], [1], [0], [0], [0, 0, 1, 0], [], []>} : vector<8x32xf32>, vector<8x32xf32>, vector<8x8xf32> -> vector<8x8xf32>
    %318 = vector.broadcast %302 : vector<1x8xf32> to vector<8x8xf32>
    %319 = arith.mulf %317, %318 : vector<8x8xf32>
    %cst_82 = arith.constant dense<0xFF800000> : vector<8xf32>
    %320 = vector.multi_reduction <maximumf>, %319, %cst_82 [1] : vector<8x8xf32> to vector<8xf32>
    %321 = vector.shape_cast %320 : vector<8xf32> to vector<8x1xf32>
    %322 = vector.broadcast %321 : vector<8x1xf32> to vector<8x8xf32>
    %323 = arith.subf %319, %322 : vector<8x8xf32>
    %324 = math.exp %323 : vector<8x8xf32>
    %cst_83 = arith.constant dense<0.000000e+00> : vector<8xf32>
    %325 = vector.multi_reduction <add>, %324, %cst_83 [1] : vector<8x8xf32> to vector<8xf32>
    %326 = vector.shape_cast %325 : vector<8xf32> to vector<8x1xf32>
    %327 = vector.broadcast %326 : vector<8x1xf32> to vector<8x8xf32>
    %328 = arith.divf %324, %327 : vector<8x8xf32>
    %329 = vector.broadcast %289 : vector<1x32xf32> to vector<8x32xf32>
    %330 = arith.mulf %311, %329 : vector<8x32xf32>
    %cst_84 = arith.constant dense<0.000000e+00> : vector<8x32xf32>
    %331 = tpu.matmul %328, %330, %cst_84 {dimension_numbers = #tpu.dot_dimension_numbers<[1], [0], [0], [1], [0, 0, 1, 1], [], []>} : vector<8x8xf32>, vector<8x32xf32>, vector<8x32xf32> -> vector<8x32xf32>
    %332 = arith.addf %312, %331 : vector<8x32xf32>
    %333 = vector.broadcast %297 : vector<1x32xf32> to vector<8x32xf32>
    %334 = arith.mulf %309, %333 : vector<8x32xf32>
    %335 = vector.broadcast %297 : vector<1x32xf32> to vector<8x32xf32>
    %336 = arith.mulf %310, %335 : vector<8x32xf32>
    %cst_85 = arith.constant dense<0.000000e+00> : vector<8x8xf32>
    %337 = tpu.matmul %334, %336, %cst_85 {dimension_numbers = #tpu.dot_dimension_numbers<[1], [1], [0], [0], [0, 0, 1, 0], [], []>} : vector<8x32xf32>, vector<8x32xf32>, vector<8x8xf32> -> vector<8x8xf32>
    %338 = vector.broadcast %302 : vector<1x8xf32> to vector<8x8xf32>
    %339 = arith.mulf %337, %338 : vector<8x8xf32>
    %cst_86 = arith.constant dense<0xFF800000> : vector<8xf32>
    %340 = vector.multi_reduction <maximumf>, %339, %cst_86 [1] : vector<8x8xf32> to vector<8xf32>
    %341 = vector.shape_cast %340 : vector<8xf32> to vector<8x1xf32>
    %342 = vector.broadcast %341 : vector<8x1xf32> to vector<8x8xf32>
    %343 = arith.subf %339, %342 : vector<8x8xf32>
    %344 = math.exp %343 : vector<8x8xf32>
    %cst_87 = arith.constant dense<0.000000e+00> : vector<8xf32>
    %345 = vector.multi_reduction <add>, %344, %cst_87 [1] : vector<8x8xf32> to vector<8xf32>
    %346 = vector.shape_cast %345 : vector<8xf32> to vector<8x1xf32>
    %347 = vector.broadcast %346 : vector<8x1xf32> to vector<8x8xf32>
    %348 = arith.divf %344, %347 : vector<8x8xf32>
    %349 = vector.broadcast %297 : vector<1x32xf32> to vector<8x32xf32>
    %350 = arith.mulf %311, %349 : vector<8x32xf32>
    %cst_88 = arith.constant dense<0.000000e+00> : vector<8x32xf32>
    %351 = tpu.matmul %348, %350, %cst_88 {dimension_numbers = #tpu.dot_dimension_numbers<[1], [0], [0], [1], [0, 0, 1, 1], [], []>} : vector<8x8xf32>, vector<8x32xf32>, vector<8x32xf32> -> vector<8x32xf32>
    %352 = arith.addf %332, %351 : vector<8x32xf32>
    %353 = vector.extract_strided_slice %306 {offsets = [0, 0], sizes = [8, 32], strides = [1, 1]} : vector<8x384xf32> to vector<8x32xf32>
    %cst_89 = arith.constant 2.500000e-01 : f32
    %354 = vector.broadcast %cst_89 : f32 to vector<8x32xf32>
    %355 = arith.mulf %353, %354 : vector<8x32xf32>
    %356 = vector.extract_strided_slice %306 {offsets = [0, 128], sizes = [8, 32], strides = [1, 1]} : vector<8x384xf32> to vector<8x32xf32>
    %357 = vector.extract_strided_slice %306 {offsets = [0, 256], sizes = [8, 32], strides = [1, 1]} : vector<8x384xf32> to vector<8x32xf32>
    %cst_90 = arith.constant 0.000000e+00 : f32
    %358 = vector.broadcast %cst_90 : f32 to vector<8x32xf32>
    %359 = vector.broadcast %289 : vector<1x32xf32> to vector<8x32xf32>
    %360 = arith.mulf %355, %359 : vector<8x32xf32>
    %361 = vector.broadcast %289 : vector<1x32xf32> to vector<8x32xf32>
    %362 = arith.mulf %356, %361 : vector<8x32xf32>
    %cst_91 = arith.constant dense<0.000000e+00> : vector<8x8xf32>
    %363 = tpu.matmul %360, %362, %cst_91 {dimension_numbers = #tpu.dot_dimension_numbers<[1], [1], [0], [0], [0, 0, 1, 0], [], []>} : vector<8x32xf32>, vector<8x32xf32>, vector<8x8xf32> -> vector<8x8xf32>
    %364 = arith.subf %363, %280 : vector<8x8xf32>
    %365 = vector.broadcast %302 : vector<1x8xf32> to vector<8x8xf32>
    %366 = arith.mulf %364, %365 : vector<8x8xf32>
    %cst_92 = arith.constant dense<0xFF800000> : vector<8xf32>
    %367 = vector.multi_reduction <maximumf>, %366, %cst_92 [1] : vector<8x8xf32> to vector<8xf32>
    %368 = vector.shape_cast %367 : vector<8xf32> to vector<8x1xf32>
    %369 = vector.broadcast %368 : vector<8x1xf32> to vector<8x8xf32>
    %370 = arith.subf %366, %369 : vector<8x8xf32>
    %371 = math.exp %370 : vector<8x8xf32>
    %cst_93 = arith.constant dense<0.000000e+00> : vector<8xf32>
    %372 = vector.multi_reduction <add>, %371, %cst_93 [1] : vector<8x8xf32> to vector<8xf32>
    %373 = vector.shape_cast %372 : vector<8xf32> to vector<8x1xf32>
    %374 = vector.broadcast %373 : vector<8x1xf32> to vector<8x8xf32>
    %375 = arith.divf %371, %374 : vector<8x8xf32>
    %376 = vector.broadcast %289 : vector<1x32xf32> to vector<8x32xf32>
    %377 = arith.mulf %357, %376 : vector<8x32xf32>
    %cst_94 = arith.constant dense<0.000000e+00> : vector<8x32xf32>
    %378 = tpu.matmul %375, %377, %cst_94 {dimension_numbers = #tpu.dot_dimension_numbers<[1], [0], [0], [1], [0, 0, 1, 1], [], []>} : vector<8x8xf32>, vector<8x32xf32>, vector<8x32xf32> -> vector<8x32xf32>
    %379 = arith.addf %358, %378 : vector<8x32xf32>
    %380 = vector.broadcast %297 : vector<1x32xf32> to vector<8x32xf32>
    %381 = arith.mulf %355, %380 : vector<8x32xf32>
    %382 = vector.broadcast %297 : vector<1x32xf32> to vector<8x32xf32>
    %383 = arith.mulf %356, %382 : vector<8x32xf32>
    %cst_95 = arith.constant dense<0.000000e+00> : vector<8x8xf32>
    %384 = tpu.matmul %381, %383, %cst_95 {dimension_numbers = #tpu.dot_dimension_numbers<[1], [1], [0], [0], [0, 0, 1, 0], [], []>} : vector<8x32xf32>, vector<8x32xf32>, vector<8x8xf32> -> vector<8x8xf32>
    %385 = arith.subf %384, %280 : vector<8x8xf32>
    %386 = vector.broadcast %302 : vector<1x8xf32> to vector<8x8xf32>
    %387 = arith.mulf %385, %386 : vector<8x8xf32>
    %cst_96 = arith.constant dense<0xFF800000> : vector<8xf32>
    %388 = vector.multi_reduction <maximumf>, %387, %cst_96 [1] : vector<8x8xf32> to vector<8xf32>
    %389 = vector.shape_cast %388 : vector<8xf32> to vector<8x1xf32>
    %390 = vector.broadcast %389 : vector<8x1xf32> to vector<8x8xf32>
    %391 = arith.subf %387, %390 : vector<8x8xf32>
    %392 = math.exp %391 : vector<8x8xf32>
    %cst_97 = arith.constant dense<0.000000e+00> : vector<8xf32>
    %393 = vector.multi_reduction <add>, %392, %cst_97 [1] : vector<8x8xf32> to vector<8xf32>
    %394 = vector.shape_cast %393 : vector<8xf32> to vector<8x1xf32>
    %395 = vector.broadcast %394 : vector<8x1xf32> to vector<8x8xf32>
    %396 = arith.divf %392, %395 : vector<8x8xf32>
    %397 = vector.broadcast %297 : vector<1x32xf32> to vector<8x32xf32>
    %398 = arith.mulf %357, %397 : vector<8x32xf32>
    %cst_98 = arith.constant dense<0.000000e+00> : vector<8x32xf32>
    %399 = tpu.matmul %396, %398, %cst_98 {dimension_numbers = #tpu.dot_dimension_numbers<[1], [0], [0], [1], [0, 0, 1, 1], [], []>} : vector<8x8xf32>, vector<8x32xf32>, vector<8x32xf32> -> vector<8x32xf32>
    %400 = arith.addf %379, %399 : vector<8x32xf32>
    %cst_99 = arith.constant dense<0.000000e+00> : vector<8x32xf32>
    %401 = tpu.matmul %352, %298, %cst_99 {dimension_numbers = #tpu.dot_dimension_numbers<[1], [0], [0], [1], [0, 0, 1, 1], [], []>} : vector<8x32xf32>, vector<32x32xf32>, vector<8x32xf32> -> vector<8x32xf32>
    %402 = vector.broadcast %299 : vector<1x32xf32> to vector<8x32xf32>
    %403 = arith.addf %401, %402 : vector<8x32xf32>
    %cst_100 = arith.constant dense<0.000000e+00> : vector<8x32xf32>
    %404 = tpu.matmul %400, %300, %cst_100 {dimension_numbers = #tpu.dot_dimension_numbers<[1], [0], [0], [1], [0, 0, 1, 1], [], []>} : vector<8x32xf32>, vector<32x32xf32>, vector<8x32xf32> -> vector<8x32xf32>
    %405 = arith.addf %403, %404 : vector<8x32xf32>
    %406 = vector.broadcast %301 : vector<1x32xf32> to vector<8x32xf32>
    %407 = arith.addf %405, %406 : vector<8x32xf32>
    %c0_101 = arith.constant 0 : index
    %c0_102 = arith.constant 0 : index
    %408 = vector.load %arg10[%c0_101, %c0_102] : memref<16x32xf32, #tpu.memory_space<vmem>>, vector<8x32xf32>
    tpu.vector_store %arg10[%c0_101, %c0_102], %407 {strides = array<i32>} : memref<16x32xf32, #tpu.memory_space<vmem>>, vector<8x32xf32>,
    %c1 = arith.constant 1 : index
    %c0_103 = arith.constant 0 : index
    %409 = vector.load %arg2[%c1, %c0_103] : memref<2x8xf32, #tpu.memory_space<vmem>>, vector<1x8xf32>
    %410 = vector.extract_strided_slice %274 {offsets = [0, 1, 0], sizes = [8, 1, 384], strides = [1, 1, 1]} : vector<8x8x768xf32> to vector<8x1x384xf32>
    %411 = vector.shape_cast %410 : vector<8x1x384xf32> to vector<8x384xf32>
    %412 = vector.extract_strided_slice %274 {offsets = [0, 3, 384], sizes = [8, 1, 384], strides = [1, 1, 1]} : vector<8x8x768xf32> to vector<8x1x384xf32>
    %413 = vector.shape_cast %412 : vector<8x1x384xf32> to vector<8x384xf32>
    %414 = vector.extract_strided_slice %411 {offsets = [0, 0], sizes = [8, 32], strides = [1, 1]} : vector<8x384xf32> to vector<8x32xf32>
    %cst_104 = arith.constant 2.500000e-01 : f32
    %415 = vector.broadcast %cst_104 : f32 to vector<8x32xf32>
    %416 = arith.mulf %414, %415 : vector<8x32xf32>
    %417 = vector.extract_strided_slice %411 {offsets = [0, 128], sizes = [8, 32], strides = [1, 1]} : vector<8x384xf32> to vector<8x32xf32>
    %418 = vector.extract_strided_slice %411 {offsets = [0, 256], sizes = [8, 32], strides = [1, 1]} : vector<8x384xf32> to vector<8x32xf32>
    %cst_105 = arith.constant 0.000000e+00 : f32
    %419 = vector.broadcast %cst_105 : f32 to vector<8x32xf32>
    %420 = vector.broadcast %289 : vector<1x32xf32> to vector<8x32xf32>
    %421 = arith.mulf %416, %420 : vector<8x32xf32>
    %422 = vector.broadcast %289 : vector<1x32xf32> to vector<8x32xf32>
    %423 = arith.mulf %417, %422 : vector<8x32xf32>
    %cst_106 = arith.constant dense<0.000000e+00> : vector<8x8xf32>
    %424 = tpu.matmul %421, %423, %cst_106 {dimension_numbers = #tpu.dot_dimension_numbers<[1], [1], [0], [0], [0, 0, 1, 0], [], []>} : vector<8x32xf32>, vector<8x32xf32>, vector<8x8xf32> -> vector<8x8xf32>
    %425 = vector.broadcast %409 : vector<1x8xf32> to vector<8x8xf32>
    %426 = arith.mulf %424, %425 : vector<8x8xf32>
    %cst_107 = arith.constant dense<0xFF800000> : vector<8xf32>
    %427 = vector.multi_reduction <maximumf>, %426, %cst_107 [1] : vector<8x8xf32> to vector<8xf32>
    %428 = vector.shape_cast %427 : vector<8xf32> to vector<8x1xf32>
    %429 = vector.broadcast %428 : vector<8x1xf32> to vector<8x8xf32>
    %430 = arith.subf %426, %429 : vector<8x8xf32>
    %431 = math.exp %430 : vector<8x8xf32>
    %cst_108 = arith.constant dense<0.000000e+00> : vector<8xf32>
    %432 = vector.multi_reduction <add>, %431, %cst_108 [1] : vector<8x8xf32> to vector<8xf32>
    %433 = vector.shape_cast %432 : vector<8xf32> to vector<8x1xf32>
    %434 = vector.broadcast %433 : vector<8x1xf32> to vector<8x8xf32>
    %435 = arith.divf %431, %434 : vector<8x8xf32>
    %436 = vector.broadcast %289 : vector<1x32xf32> to vector<8x32xf32>
    %437 = arith.mulf %418, %436 : vector<8x32xf32>
    %cst_109 = arith.constant dense<0.000000e+00> : vector<8x32xf32>
    %438 = tpu.matmul %435, %437, %cst_109 {dimension_numbers = #tpu.dot_dimension_numbers<[1], [0], [0], [1], [0, 0, 1, 1], [], []>} : vector<8x8xf32>, vector<8x32xf32>, vector<8x32xf32> -> vector<8x32xf32>
    %439 = arith.addf %419, %438 : vector<8x32xf32>
    %440 = vector.broadcast %297 : vector<1x32xf32> to vector<8x32xf32>
    %441 = arith.mulf %416, %440 : vector<8x32xf32>
    %442 = vector.broadcast %297 : vector<1x32xf32> to vector<8x32xf32>
    %443 = arith.mulf %417, %442 : vector<8x32xf32>
    %cst_110 = arith.constant dense<0.000000e+00> : vector<8x8xf32>
    %444 = tpu.matmul %441, %443, %cst_110 {dimension_numbers = #tpu.dot_dimension_numbers<[1], [1], [0], [0], [0, 0, 1, 0], [], []>} : vector<8x32xf32>, vector<8x32xf32>, vector<8x8xf32> -> vector<8x8xf32>
    %445 = vector.broadcast %409 : vector<1x8xf32> to vector<8x8xf32>
    %446 = arith.mulf %444, %445 : vector<8x8xf32>
    %cst_111 = arith.constant dense<0xFF800000> : vector<8xf32>
    %447 = vector.multi_reduction <maximumf>, %446, %cst_111 [1] : vector<8x8xf32> to vector<8xf32>
    %448 = vector.shape_cast %447 : vector<8xf32> to vector<8x1xf32>
    %449 = vector.broadcast %448 : vector<8x1xf32> to vector<8x8xf32>
    %450 = arith.subf %446, %449 : vector<8x8xf32>
    %451 = math.exp %450 : vector<8x8xf32>
    %cst_112 = arith.constant dense<0.000000e+00> : vector<8xf32>
    %452 = vector.multi_reduction <add>, %451, %cst_112 [1] : vector<8x8xf32> to vector<8xf32>
    %453 = vector.shape_cast %452 : vector<8xf32> to vector<8x1xf32>
    %454 = vector.broadcast %453 : vector<8x1xf32> to vector<8x8xf32>
    %455 = arith.divf %451, %454 : vector<8x8xf32>
    %456 = vector.broadcast %297 : vector<1x32xf32> to vector<8x32xf32>
    %457 = arith.mulf %418, %456 : vector<8x32xf32>
    %cst_113 = arith.constant dense<0.000000e+00> : vector<8x32xf32>
    %458 = tpu.matmul %455, %457, %cst_113 {dimension_numbers = #tpu.dot_dimension_numbers<[1], [0], [0], [1], [0, 0, 1, 1], [], []>} : vector<8x8xf32>, vector<8x32xf32>, vector<8x32xf32> -> vector<8x32xf32>
    %459 = arith.addf %439, %458 : vector<8x32xf32>
    %460 = vector.extract_strided_slice %413 {offsets = [0, 0], sizes = [8, 32], strides = [1, 1]} : vector<8x384xf32> to vector<8x32xf32>
    %cst_114 = arith.constant 2.500000e-01 : f32
    %461 = vector.broadcast %cst_114 : f32 to vector<8x32xf32>
    %462 = arith.mulf %460, %461 : vector<8x32xf32>
    %463 = vector.extract_strided_slice %413 {offsets = [0, 128], sizes = [8, 32], strides = [1, 1]} : vector<8x384xf32> to vector<8x32xf32>
    %464 = vector.extract_strided_slice %413 {offsets = [0, 256], sizes = [8, 32], strides = [1, 1]} : vector<8x384xf32> to vector<8x32xf32>
    %cst_115 = arith.constant 0.000000e+00 : f32
    %465 = vector.broadcast %cst_115 : f32 to vector<8x32xf32>
    %466 = vector.broadcast %289 : vector<1x32xf32> to vector<8x32xf32>
    %467 = arith.mulf %462, %466 : vector<8x32xf32>
    %468 = vector.broadcast %289 : vector<1x32xf32> to vector<8x32xf32>
    %469 = arith.mulf %463, %468 : vector<8x32xf32>
    %cst_116 = arith.constant dense<0.000000e+00> : vector<8x8xf32>
    %470 = tpu.matmul %467, %469, %cst_116 {dimension_numbers = #tpu.dot_dimension_numbers<[1], [1], [0], [0], [0, 0, 1, 0], [], []>} : vector<8x32xf32>, vector<8x32xf32>, vector<8x8xf32> -> vector<8x8xf32>
    %471 = arith.subf %470, %280 : vector<8x8xf32>
    %472 = vector.broadcast %409 : vector<1x8xf32> to vector<8x8xf32>
    %473 = arith.mulf %471, %472 : vector<8x8xf32>
    %cst_117 = arith.constant dense<0xFF800000> : vector<8xf32>
    %474 = vector.multi_reduction <maximumf>, %473, %cst_117 [1] : vector<8x8xf32> to vector<8xf32>
    %475 = vector.shape_cast %474 : vector<8xf32> to vector<8x1xf32>
    %476 = vector.broadcast %475 : vector<8x1xf32> to vector<8x8xf32>
    %477 = arith.subf %473, %476 : vector<8x8xf32>
    %478 = math.exp %477 : vector<8x8xf32>
    %cst_118 = arith.constant dense<0.000000e+00> : vector<8xf32>
    %479 = vector.multi_reduction <add>, %478, %cst_118 [1] : vector<8x8xf32> to vector<8xf32>
    %480 = vector.shape_cast %479 : vector<8xf32> to vector<8x1xf32>
    %481 = vector.broadcast %480 : vector<8x1xf32> to vector<8x8xf32>
    %482 = arith.divf %478, %481 : vector<8x8xf32>
    %483 = vector.broadcast %289 : vector<1x32xf32> to vector<8x32xf32>
    %484 = arith.mulf %464, %483 : vector<8x32xf32>
    %cst_119 = arith.constant dense<0.000000e+00> : vector<8x32xf32>
    %485 = tpu.matmul %482, %484, %cst_119 {dimension_numbers = #tpu.dot_dimension_numbers<[1], [0], [0], [1], [0, 0, 1, 1], [], []>} : vector<8x8xf32>, vector<8x32xf32>, vector<8x32xf32> -> vector<8x32xf32>
    %486 = arith.addf %465, %485 : vector<8x32xf32>
    %487 = vector.broadcast %297 : vector<1x32xf32> to vector<8x32xf32>
    %488 = arith.mulf %462, %487 : vector<8x32xf32>
    %489 = vector.broadcast %297 : vector<1x32xf32> to vector<8x32xf32>
    %490 = arith.mulf %463, %489 : vector<8x32xf32>
    %cst_120 = arith.constant dense<0.000000e+00> : vector<8x8xf32>
    %491 = tpu.matmul %488, %490, %cst_120 {dimension_numbers = #tpu.dot_dimension_numbers<[1], [1], [0], [0], [0, 0, 1, 0], [], []>} : vector<8x32xf32>, vector<8x32xf32>, vector<8x8xf32> -> vector<8x8xf32>
    %492 = arith.subf %491, %280 : vector<8x8xf32>
    %493 = vector.broadcast %409 : vector<1x8xf32> to vector<8x8xf32>
    %494 = arith.mulf %492, %493 : vector<8x8xf32>
    %cst_121 = arith.constant dense<0xFF800000> : vector<8xf32>
    %495 = vector.multi_reduction <maximumf>, %494, %cst_121 [1] : vector<8x8xf32> to vector<8xf32>
    %496 = vector.shape_cast %495 : vector<8xf32> to vector<8x1xf32>
    %497 = vector.broadcast %496 : vector<8x1xf32> to vector<8x8xf32>
    %498 = arith.subf %494, %497 : vector<8x8xf32>
    %499 = math.exp %498 : vector<8x8xf32>
    %cst_122 = arith.constant dense<0.000000e+00> : vector<8xf32>
    %500 = vector.multi_reduction <add>, %499, %cst_122 [1] : vector<8x8xf32> to vector<8xf32>
    %501 = vector.shape_cast %500 : vector<8xf32> to vector<8x1xf32>
    %502 = vector.broadcast %501 : vector<8x1xf32> to vector<8x8xf32>
    %503 = arith.divf %499, %502 : vector<8x8xf32>
    %504 = vector.broadcast %297 : vector<1x32xf32> to vector<8x32xf32>
    %505 = arith.mulf %464, %504 : vector<8x32xf32>
    %cst_123 = arith.constant dense<0.000000e+00> : vector<8x32xf32>
    %506 = tpu.matmul %503, %505, %cst_123 {dimension_numbers = #tpu.dot_dimension_numbers<[1], [0], [0], [1], [0, 0, 1, 1], [], []>} : vector<8x8xf32>, vector<8x32xf32>, vector<8x32xf32> -> vector<8x32xf32>
    %507 = arith.addf %486, %506 : vector<8x32xf32>
    %cst_124 = arith.constant dense<0.000000e+00> : vector<8x32xf32>
    %508 = tpu.matmul %459, %298, %cst_124 {dimension_numbers = #tpu.dot_dimension_numbers<[1], [0], [0], [1], [0, 0, 1, 1], [], []>} : vector<8x32xf32>, vector<32x32xf32>, vector<8x32xf32> -> vector<8x32xf32>
    %509 = vector.broadcast %299 : vector<1x32xf32> to vector<8x32xf32>
    %510 = arith.addf %508, %509 : vector<8x32xf32>
    %cst_125 = arith.constant dense<0.000000e+00> : vector<8x32xf32>
    %511 = tpu.matmul %507, %300, %cst_125 {dimension_numbers = #tpu.dot_dimension_numbers<[1], [0], [0], [1], [0, 0, 1, 1], [], []>} : vector<8x32xf32>, vector<32x32xf32>, vector<8x32xf32> -> vector<8x32xf32>
    %512 = arith.addf %510, %511 : vector<8x32xf32>
    %513 = vector.broadcast %301 : vector<1x32xf32> to vector<8x32xf32>
    %514 = arith.addf %512, %513 : vector<8x32xf32>
    %c8_126 = arith.constant 8 : index
    %c0_127 = arith.constant 0 : index
    %515 = vector.load %arg10[%c8_126, %c0_127] : memref<16x32xf32, #tpu.memory_space<vmem>>, vector<8x32xf32>
    tpu.vector_store %arg10[%c8_126, %c0_127], %514 {strides = array<i32>} : memref<16x32xf32, #tpu.memory_space<vmem>>, vector<8x32xf32>,
    %c0_128 = arith.constant 0 : index
    %c0_129 = arith.constant 0 : index
    %516 = vector.load %arg10[%c0_128, %c0_129] : memref<16x32xf32, #tpu.memory_space<vmem>>, vector<16x32xf32>
    %c0_130 = arith.constant 0 : index
    %c1920 = arith.constant 1920 : index
    %517 = vector.load %arg5[%c0_130, %c1920] : memref<32x2304xf32, #tpu.memory_space<vmem>>, vector<32x256xf32>
    %c0_131 = arith.constant 0 : index
    %c1920_132 = arith.constant 1920 : index
    %518 = vector.load %arg6[%c0_131, %c1920_132] : memref<1x2432xf32, #tpu.memory_space<vmem>>, vector<1x256xf32>
    %c0_133 = arith.constant 0 : index
    %c2176 = arith.constant 2176 : index
    %519 = vector.load %arg5[%c0_133, %c2176] : memref<32x2304xf32, #tpu.memory_space<vmem>>, vector<32x8xf32>
    %c0_134 = arith.constant 0 : index
    %c2176_135 = arith.constant 2176 : index
    %520 = vector.load %arg6[%c0_134, %c2176_135] : memref<1x2432xf32, #tpu.memory_space<vmem>>, vector<1x8xf32>
    %cst_136 = arith.constant dense<0.000000e+00> : vector<16x256xf32>
    %521 = tpu.matmul %516, %517, %cst_136 {dimension_numbers = #tpu.dot_dimension_numbers<[1], [0], [0], [1], [0, 0, 1, 1], [], []>} : vector<16x32xf32>, vector<32x256xf32>, vector<16x256xf32> -> vector<16x256xf32>
    %522 = vector.broadcast %518 : vector<1x256xf32> to vector<16x256xf32>
    %523 = arith.addf %521, %522 : vector<16x256xf32>
    %cst_137 = arith.constant dense<0.000000e+00> : vector<16x8xf32>
    %524 = tpu.matmul %516, %519, %cst_137 {dimension_numbers = #tpu.dot_dimension_numbers<[1], [0], [0], [1], [0, 0, 1, 1], [], []>} : vector<16x32xf32>, vector<32x8xf32>, vector<16x8xf32> -> vector<16x8xf32>
    %525 = vector.broadcast %520 : vector<1x8xf32> to vector<16x8xf32>
    %526 = arith.addf %524, %525 : vector<16x8xf32>
    %c0_138 = arith.constant 0 : index
    %c0_139 = arith.constant 0 : index
    %527 = vector.load %arg3[%c0_138, %c0_139] : memref<16x256xf32, #tpu.memory_space<vmem>>, vector<16x256xf32>
    %528 = arith.mulf %523, %527 : vector<16x256xf32>
    %c0_140 = arith.constant 0 : index
    %c0_141 = arith.constant 0 : index
    %529 = vector.load %arg7[%c0_140, %c0_141] : memref<256x8xf32, #tpu.memory_space<vmem>>, vector<256x8xf32>
    %cst_142 = arith.constant dense<0.000000e+00> : vector<16x8xf32>
    %530 = tpu.matmul %528, %529, %cst_142 {dimension_numbers = #tpu.dot_dimension_numbers<[1], [0], [0], [1], [0, 0, 1, 1], [], []>} : vector<16x256xf32>, vector<256x8xf32>, vector<16x8xf32> -> vector<16x8xf32>
    %531 = arith.addf %530, %526 : vector<16x8xf32>
    %c0_143 = arith.constant 0 : index
    %c0_144 = arith.constant 0 : index
    %532 = vector.load %arg8[%c0_143, %c0_144] : memref<16x8xf32, #tpu.memory_space<vmem>>, vector<16x8xf32>
    tpu.vector_store %arg8[%c0_143, %c0_144], %531 {strides = array<i32>} : memref<16x8xf32, #tpu.memory_space<vmem>>, vector<16x8xf32>,
    return
  }
  func.func @transform_0(%arg0: i32) -> (i32, i32) {
    %c0_i32 = arith.constant 0 : i32
    %c0_i32_0 = arith.constant 0 : i32
    %c0_i32_1 = arith.constant 0 : i32
    return %c0_i32, %c0_i32_0 : i32, i32
  }
  func.func @transform_1(%arg0: i32) -> (i32, i32) {
    %c0_i32 = arith.constant 0 : i32
    %c0_i32_0 = arith.constant 0 : i32
    %c0_i32_1 = arith.constant 0 : i32
    return %c0_i32, %c0_i32_0 : i32, i32
  }
  func.func @transform_2(%arg0: i32) -> (i32, i32) {
    %c0_i32 = arith.constant 0 : i32
    %c0_i32_0 = arith.constant 0 : i32
    %c0_i32_1 = arith.constant 0 : i32
    return %c0_i32, %c0_i32_0 : i32, i32
  }
  func.func @transform_3(%arg0: i32) -> (i32, i32) {
    %c0_i32 = arith.constant 0 : i32
    %c0_i32_0 = arith.constant 0 : i32
    %c0_i32_1 = arith.constant 0 : i32
    return %c0_i32, %c0_i32_0 : i32, i32
  }
  func.func @transform_4(%arg0: i32) -> (i32, i32) {
    %c0_i32 = arith.constant 0 : i32
    %c0_i32_0 = arith.constant 0 : i32
    %c0_i32_1 = arith.constant 0 : i32
    return %c0_i32, %c0_i32_0 : i32, i32
  }
  func.func @transform_5(%arg0: i32) -> (i32, i32) {
    %c0_i32 = arith.constant 0 : i32
    %c0_i32_0 = arith.constant 0 : i32
    %c0_i32_1 = arith.constant 0 : i32
    return %c0_i32, %c0_i32_0 : i32, i32
  }
  func.func @transform_6(%arg0: i32) -> (i32, i32) {
    %c0_i32 = arith.constant 0 : i32
    %c0_i32_0 = arith.constant 0 : i32
    %c0_i32_1 = arith.constant 0 : i32
    return %c0_i32, %c0_i32_0 : i32, i32
  }
  func.func @transform_7(%arg0: i32) -> (i32, i32) {
    %c0_i32 = arith.constant 0 : i32
    %c0_i32_0 = arith.constant 0 : i32
    %c0_i32_1 = arith.constant 0 : i32
    return %c0_i32, %c0_i32_0 : i32, i32
  }
}

</mosaic_0001>

<bundles_post_ra>
// kernel: tile.7
= control target key start
LH: loop header
LB: loop body
LE: loop exit
PB: predicated region body
PF: predicated region fallthrough
CT: control target
= control target key end

     0   :  { %vm48_vm0 = vcmask 1047556   ;;  %s227_s14 = smov 96   ;;  %vm3_vm1 = vcmask 261120   ;;  %s228_s20 = smov 64   ;;  %vm52_vm2 = vcmask 1048320   ;;  %vm95_vm3 = vcmask 785920   ;;  %s436_s0 = inlined_call_operand.vmem [shape: f32[16,8,32], index: 0, kind: input, shape index: {}]   ;;  %s437_s1 = inlined_call_operand.vmem [shape: f32[16,256], index: 1, kind: output, shape index: {}]  }
   0x1   :  { %v196_v0 = vld [vmem:[%s436_s0 + $0x43] ss:$8 sm:$0xf]   ;;  %v199_v6 = vld [vmem:[%s436_s0 + $0x47] ss:$8 sm:$0xf]  }
   0x2   :  { %v197_v1 = vld [vmem:[%s436_s0 + $0x43] ss:$8 sm:$0xf0]   ;;  %v200_v7 = vld [vmem:[%s436_s0 + $0x47] ss:$8 sm:$0xf0]  }
   0x3   :  { %v70_v2 = vsel %vm48_vm0, %v197_v1, %v196_v0  ;;  %v191_v3 = vld [vmem:[%s436_s0 + $0x3] ss:$8 sm:$0xf]   ;;  %v81_v8 = vsel %vm48_vm0, %v200_v7, %v199_v6  ;;  %v193_v9 = vld [vmem:[%s436_s0 + $0x7] ss:$8 sm:$0xf]  }
   0x4   :  { %v192_v4 = vld [vmem:[%s436_s0 + $0x3] ss:$8 sm:$0xf0]   ;;  %71 = vrot.lane.b32.xlu1 %v70_v2, %s227_s14  ;;  %v194_v10 = vld [vmem:[%s436_s0 + $0x7] ss:$8 sm:$0xf0]  }
   0x5   :  { %v49_v5 = vsel %vm48_vm0, %v192_v4, %v191_v3  ;;  %v59_v11 = vsel %vm48_vm0, %v194_v10, %v193_v9  ;;  %v204_v12 = vld [vmem:[%s436_s0 + $0x6] ss:$8 sm:$0xf]   ;;  %v202_v14 = vld [vmem:[%s436_s0 + $0x2] ss:$8 sm:$0xf]  }
   0x6   :  { %50 = vrot.lane.b32.xlu0 %v49_v5, %s227_s14  ;;  %v205_v13 = vld [vmem:[%s436_s0 + $0x6] ss:$8 sm:$0xf0]   ;;  %v203_v15 = vld [vmem:[%s436_s0 + $0x2] ss:$8 sm:$0xf0]  }
   0x7   :  { %v102_v16 = vsel %vm48_vm0, %v205_v13, %v204_v12  ;;  %v210_v17 = vld [vmem:[%s436_s0 + $0x46] ss:$8 sm:$0xf]   ;;  %v92_v18 = vsel %vm48_vm0, %v203_v15, %v202_v14  ;;  %v2_v20 = vld [vmem:[%s436_s0] ss:$4 sm:$0xff]   ;;  %vm138_vm4 = vcmask 523520  }
   0x8   :  { %82 = vrot.lane.b32.xlu1 %v81_v8, %s227_s14  ;;  %v211_v19 = vld [vmem:[%s436_s0 + $0x46] ss:$8 sm:$0xf0]   ;;  %v207_v21 = vld [vmem:[%s436_s0 + $0x42] ss:$8 sm:$0xf]  }
   0x9   :  { %v208_v22 = vld [vmem:[%s436_s0 + $0x42] ss:$8 sm:$0xf0]   ;;  %4 = vst.msk [vmem:[%s437_s1] ss:$8 sm:$0x3] %vm3_vm1, %v2_v20   ;;  %v124_v24 = vsel %vm48_vm0, %v211_v19, %v210_v17 }
   0xa   :  { %60 = vrot.lane.b32.xlu0 %v59_v11, %s227_s14  ;;  %173 = vst.msk [vmem:[%s437_s1 - $0xf] ss:$8 sm:$0xc] %vm3_vm1, %v2_v20   ;;  %174 = vst.msk [vmem:[%s437_s1 - $0x1e] ss:$8 sm:$0x30] %vm3_vm1, %v2_v20   ;;  %v113_v27 = vsel %vm48_vm0, %v208_v22, %v207_v21 }
   0xb   :  { %175 = vst.msk [vmem:[%s437_s1 - $0x2d] ss:$8 sm:$0xc0] %vm3_vm1, %v2_v20   ;;  %v215_v23 = vld [vmem:[%s436_s0 + $0x5] ss:$8 sm:$0xf]  }
   0xc   :  { %103 = vrot.lane.b32.xlu1 %v102_v16, %s228_s20  ;;  %v216_v25 = vld [vmem:[%s436_s0 + $0x5] ss:$8 sm:$0xf0]   ;;  %v213_v26 = vld [vmem:[%s436_s0 + $0x1] ss:$8 sm:$0xf]  }
   0xd   :  { %v214_v28 = vld [vmem:[%s436_s0 + $0x1] ss:$8 sm:$0xf0]   ;;  %v176_v29 = vld [vmem:[%s436_s0 + $0x20] ss:$4 sm:$0xff]   ;;  %v145_v32 = vsel %vm48_vm0, %v216_v25, %v215_v23 }
   0xe   :  { %93 = vrot.lane.b32.xlu0 %v92_v18, %s228_s20  ;;  %177 = vst.msk [vmem:[%s437_s1 + $0x4] ss:$8 sm:$0x3] %vm3_vm1, %v176_v29   ;;  %178 = vst.msk [vmem:[%s437_s1 - $0xb] ss:$8 sm:$0xc] %vm3_vm1, %v176_v29   ;;  %v135_v33 = vsel %vm48_vm0, %v214_v28, %v213_v26 }
   0xf   :  { %179 = vst.msk [vmem:[%s437_s1 - $0x1a] ss:$8 sm:$0x30] %vm3_vm1, %v176_v29   ;;  %180 = vst.msk [vmem:[%s437_s1 - $0x29] ss:$8 sm:$0xc0] %vm3_vm1, %v176_v29  }
  0x10   :  { %v181_v30 = vld [vmem:[%s436_s0 + $0x40] ss:$4 sm:$0xff]   ;;  %125 = vrot.lane.b32.xlu1 %v124_v24, %s228_s20  ;;  %v221_v34 = vld [vmem:[%s436_s0 + $0x45] ss:$8 sm:$0xf]  }
  0x11   :  { %v186_v31 = vld [vmem:[%s436_s0 + $0x60] ss:$4 sm:$0xff]   ;;  %182 = vst.msk [vmem:[%s437_s1 + $0x10] ss:$8 sm:$0x3] %vm3_vm1, %v181_v30  }
  0x12   :  { %183 = vst.msk [vmem:[%s437_s1 + $0x1] ss:$8 sm:$0xc] %vm3_vm1, %v181_v30   ;;  %184 = vst.msk [vmem:[%s437_s1 - $0xe] ss:$8 sm:$0x30] %vm3_vm1, %v181_v30   ;;  %114 = vrot.lane.b32.xlu0 %v113_v27, %s228_s20 }
  0x13   :  { %185 = vst.msk [vmem:[%s437_s1 - $0x1d] ss:$8 sm:$0xc0] %vm3_vm1, %v181_v30   ;;  %187 = vst.msk [vmem:[%s437_s1 + $0x14] ss:$8 sm:$0x3] %vm3_vm1, %v186_v31  }
  0x14   :  { %188 = vst.msk [vmem:[%s437_s1 + $0x5] ss:$8 sm:$0xc] %vm3_vm1, %v186_v31   ;;  %189 = vst.msk [vmem:[%s437_s1 - $0xa] ss:$8 sm:$0x30] %vm3_vm1, %v186_v31  }
  0x15   :  { %190 = vst.msk [vmem:[%s437_s1 - $0x19] ss:$8 sm:$0xc0] %vm3_vm1, %v186_v31   ;;  %v222_v35 = vld [vmem:[%s436_s0 + $0x45] ss:$8 sm:$0xf0]  }
  0x16   :  { %v218_v36 = vld [vmem:[%s436_s0 + $0x41] ss:$8 sm:$0xf]   ;;  %v167_v38 = vsel %vm48_vm0, %v222_v35, %v221_v34 }
  0x17   :  { %v219_v37 = vld [vmem:[%s436_s0 + $0x41] ss:$8 sm:$0xf0]   ;;  %s229_s0 = smov 32  }
  0x18   :  { %146 = vrot.lane.b32.xlu1 %v145_v32, %s229_s0  ;;  %136 = vrot.lane.b32.xlu0 %v135_v33, %s229_s0  ;;  %v156_v39 = vsel %vm48_vm0, %v219_v37, %v218_v36 }
  0x1c   :  { %168 = vrot.lane.b32.xlu1 %v167_v38, %s229_s0  ;;  %157 = vrot.lane.b32.xlu0 %v156_v39, %s229_s0 }
  0x76   :  { %v72_v40 = vpop.permute.xlu1 %71  }
  0x77   :  { %198 = vst.msk [vmem:[%s437_s1 + $0x10] sm:$0xff] %vm52_vm2, %v72_v40  }
  0x78   :  { %v51_v41 = vpop.permute.xlu0 %50  }
  0x79   :  { %53 = vst.msk [vmem:[%s437_s1] sm:$0xff] %vm52_vm2, %v51_v41  }
  0x7a   :  { %v83_v42 = vpop.permute.xlu1 %82  }
  0x7b   :  { %201 = vst.msk [vmem:[%s437_s1 + $0x18] sm:$0xff] %vm52_vm2, %v83_v42  }
  0x7c   :  { %v61_v43 = vpop.permute.xlu0 %60  }
  0x7d   :  { %195 = vst.msk [vmem:[%s437_s1 + $0x8] sm:$0xff] %vm52_vm2, %v61_v43  }
  0x7e   :  { %v104_v44 = vpop.permute.xlu1 %103  }
  0x7f   :  { %206 = vst.msk [vmem:[%s437_s1 + $0x8] sm:$0xff] %vm95_vm3, %v104_v44  }
  0x80   :  { %v94_v45 = vpop.permute.xlu0 %93  }
  0x81   :  { %96 = vst.msk [vmem:[%s437_s1] sm:$0xff] %vm95_vm3, %v94_v45  }
  0x82   :  { %v126_v46 = vpop.permute.xlu1 %125  }
  0x83   :  { %212 = vst.msk [vmem:[%s437_s1 + $0x18] sm:$0xff] %vm95_vm3, %v126_v46  }
  0x84   :  { %v115_v47 = vpop.permute.xlu0 %114  }
  0x85   :  { %209 = vst.msk [vmem:[%s437_s1 + $0x10] sm:$0xff] %vm95_vm3, %v115_v47  }
  0x8a   :  { %v147_v48 = vpop.permute.xlu1 %146   ;;  %v137_v49 = vpop.permute.xlu0 %136  }
  0x8b   :  { %217 = vst.msk [vmem:[%s437_s1 + $0x8] sm:$0xff] %vm138_vm4, %v147_v48   ;;  %139 = vst.msk [vmem:[%s437_s1] sm:$0xff] %vm138_vm4, %v137_v49  }
  0x8e   :  { %v169_v50 = vpop.permute.xlu1 %168   ;;  %v158_v51 = vpop.permute.xlu0 %157  }
  0x8f   :  { %223 = vst.msk [vmem:[%s437_s1 + $0x18] sm:$0xff] %vm138_vm4, %v169_v50   ;;  %220 = vst.msk [vmem:[%s437_s1 + $0x10] sm:$0xff] %vm138_vm4, %v158_v51  }

// kernel: generator_forward.1
= control target key start
LH: loop header
LB: loop body
LE: loop exit
PB: predicated region body
PF: predicated region fallthrough
CT: control target
= control target key end

     0   :  { %vm51_vm0 = vcmask 261120   ;;  %s7513_s0 = inlined_call_operand.vmem [shape: f32[64,32], index: 0, kind: input, shape index: {}]   ;;  %s7514_s1 = inlined_call_operand.vmem [shape: f32[2,8], index: 1, kind: input, shape index: {}]   ;;  %s7515_s2 = inlined_call_operand.vmem [shape: f32[16,256], index: 2, kind: input, shape index: {}]   ;;  %s7516_s3 = inlined_call_operand.vmem [shape: f32[32,32], index: 3, kind: input, shape index: {}]   ;;  %s7517_s4 = inlined_call_operand.vmem [shape: f32[32,2304], index: 4, kind: input, shape index: {}]   ;;  %s7518_s5 = inlined_call_operand.vmem [shape: f32[1,2432], index: 5, kind: input, shape index: {}]   ;;  %s7519_s6 = inlined_call_operand.vmem [shape: f32[256,8], index: 6, kind: input, shape index: {}]   ;;  %s7520_s7 = inlined_call_operand.hbm [shape: f32[16,8], index: 7, kind: output, shape index: {}]  }
   0x1   :  { %v41_v0 = vld [vmem:[%s7516_s3] sm:$0xff]  ;;  %v42_v1 = vld [vmem:[%s7516_s3 + $0x8] sm:$0xff]  ;;  %v43_v2 = vld [vmem:[%s7516_s3 + $0x10] sm:$0xff] }
   0x2   :  { %v5463_v3 = vpack.c.bf16 %v42_v1, %v41_v0  ;;  %v44_v4 = vld [vmem:[%s7516_s3 + $0x18] sm:$0xff]  ;;  %v33_v5 = vld [vmem:[%s7513_s0] sm:$0xff] }
   0x3   :  { %v5467_v6 = vpack.c.bf16 %v44_v4, %v43_v2  ;;  %5188 = vmatprep.mubr.msk.f32.mxu0 %vm51_vm0, %v33_v5 }
   0x4   :  { %5464 = vmatprep.subr.bf16.mxu0 %v5463_v3 }
   0x5   :  { %5466 = vmatpush3.bf16.msra.mxu0 %v5463_v3 }
   0x6   :  { %12 = vsyncpa [#allocation5], 0  ;;  %5468 = vmatprep.subr.bf16.mxu0 %v5467_v6  ;;  %v34_v7 = vld [vmem:[%s7513_s0 + $0x8] sm:$0xff]  ;;  %v35_v8 = vld [vmem:[%s7513_s0 + $0x10] sm:$0xff]  ;;  %v7523_v63 = vmov 0.0   ;;  %v7521_v3 = vmov 0.0|0.0  }
   0x7   :  { %v36_v9 = vld [vmem:[%s7513_s0 + $0x18] sm:$0xff]  ;;  %v37_v10 = vld [vmem:[%s7513_s0 + $0x20] sm:$0xff]  ;;  %v38_v11 = vld [vmem:[%s7513_s0 + $0x28] sm:$0xff]  ;;  %vm5919_vm1 = vmmov 0   ;;  %vm2437_vm6 = vcmask 1041409   ;;  %vm2440_vm7 = vcmask 1042434  }
   0x8   :  { %v39_v12 = vld [vmem:[%s7513_s0 + $0x30] sm:$0xff]  ;;  %v40_v13 = vld [vmem:[%s7513_s0 + $0x38] sm:$0xff]  ;;  %v28_v14 = vld [vmem:[%s7517_s4] sm:$0xff]  ;;  %vm2443_vm8 = vcmask 1043459   ;;  %vm2446_vm9 = vcmask 1044484   ;;  %vm2449_vm10 = vcmask 1045509  }
   0x9   :  { %5470 = vmatpush3.bf16.msra.mxu0 %v5467_v6  ;;  %v29_v15 = vld [vmem:[%s7517_s4 + $0x90] sm:$0xff]  ;;  %v30_v17 = vld [vmem:[%s7517_s4 + $0x120] sm:$0xff]  ;;  %v326_v23 = vld [vmem:[%s7517_s4 + $0x18] sm:$0xff]  ;;  %vm2452_vm11 = vcmask 1046534   ;;  %vm2455_vm12 = vcmask 1047559   ;;  %vm2558_vm13 = vcmask 64512  }
   0xa   :  { %v5471_v16 = vpack.c.bf16 %v29_v15, %v28_v14  ;;  %v31_v18 = vld [vmem:[%s7517_s4 + $0x1b0] sm:$0xff]  ;;  %v328_v21 = vld [vmem:[%s7517_s4 + $0xa0] sm:$0xff]  ;;  %v329_v24 = vld [vmem:[%s7517_s4 + $0xa8] sm:$0xff] }
   0xb   :  { %v5475_v19 = vpack.c.bf16 %v31_v18, %v30_v17  ;;  %v325_v20 = vld [vmem:[%s7517_s4 + $0x10] sm:$0xff]  ;;  %v5487_v25 = vpack.c.bf16 %v329_v24, %v326_v23  ;;  %v324_v39 = vld [vmem:[%s7517_s4 + $0x8] sm:$0xff]  ;;  %v327_v40 = vld [vmem:[%s7517_s4 + $0x98] sm:$0xff] }
   0xc   :  { %5189 = vmatmul.mubr.msk.f32.vlgmr.msra.gmra.mrb[0].mxu0 %vm51_vm0, %v34_v7  ;;  %5472 = vmatprep.subr.bf16.mxu0 %v5471_v16  ;;  %v5479_v22 = vpack.c.bf16 %v328_v21, %v325_v20  ;;  %v4883_v26 = vld [vmem:[%s7518_s5 + $0x12] ss:$0 sm:$0xff]  ;;  %v5481_v44 = vpack.c.bf16 %v327_v40, %v324_v39  ;;  %v334_v55 = vld [vmem:[%s7517_s4 + $0x1c0] sm:$0xff]  ;;  %v330_v57 = vld [vmem:[%s7517_s4 + $0x128] sm:$0xff] }
   0xd   :  { %5191 = vmatprep.mubr.msk.f32.mxu0 %vm51_vm0, %v35_v8  ;;  %5474 = vmatpush3.bf16.msra.mxu0 %v5471_v16  ;;  %v331_v54 = vld [vmem:[%s7517_s4 + $0x130] sm:$0xff]  ;;  %v333_v58 = vld [vmem:[%s7517_s4 + $0x1b8] sm:$0xff]  ;;  %v335_v61 = vld [vmem:[%s7517_s4 + $0x1c8] sm:$0xff] }
   0xe   :  { %5476 = vmatprep.subr.bf16.mxu0 %v5475_v19  ;;  %5488 = vmatprep.subr.bf16.mxu1 %v5487_v25  ;;  %v5483_v56 = vpack.c.bf16 %v334_v55, %v331_v54  ;;  %v332_v59 = vld [vmem:[%s7517_s4 + $0x138] sm:$0xff]  ;;  %v5485_v60 = vpack.c.bf16 %v333_v58, %v330_v57  ;;  %v338_v0 = vld [vmem:[%s7517_s4 + $0x28] sm:$0xff]  ;;  %v4892_v4 = vld [vmem:[%s7518_s5] ss:$0 sm:$0xff] }
   0xf   :  { %5490 = vmatpush3.bf16.msra.mxu1 %v5487_v25  ;;  %v5491_v62 = vpack.c.bf16 %v335_v61, %v332_v59  ;;  %v341_v1 = vld [vmem:[%s7517_s4 + $0xb8] sm:$0xff]  ;;  %v337_v5 = vld [vmem:[%s7517_s4 + $0x20] sm:$0xff]  ;;  %v340_v6 = vld [vmem:[%s7517_s4 + $0xb0] sm:$0xff] }
  0x10   :  { %5192 = vmatmul.mubr.msk.f32.gmra.mrb[2].mxu0 %vm51_vm0, %v36_v9  ;;  %v6073_v2 = vpack.c.bf16 %v341_v1, %v338_v0  ;;  %v339_v7 = vld [vmem:[%s7517_s4 + $0x30] sm:$0xff]  ;;  %v342_v8 = vld [vmem:[%s7517_s4 + $0xc0] sm:$0xff]  ;;  %v6098_v14 = vpack.c.bf16 %v340_v6, %v337_v5 }
  0x11   :  { %5194 = vmatprep.mubr.msk.f32.mxu0 %vm51_vm0, %v37_v10  ;;  %5478 = vmatpush3.bf16.msra.mxu0 %v5475_v19  ;;  %v344_v10 = vld [vmem:[%s7517_s4 + $0x148] sm:$0xff]  ;;  %v343_v15 = vld [vmem:[%s7517_s4 + $0x140] sm:$0xff]  ;;  %v6103_v16 = vpack.c.bf16 %v342_v8, %v339_v7  ;;  %v346_v19 = vld [vmem:[%s7517_s4 + $0x1d0] sm:$0xff] }
  0x12   :  { %5480 = vmatprep.subr.bf16.mxu0 %v5479_v22  ;;  %5492 = vmatprep.subr.bf16.mxu1 %v5491_v62  ;;  %v345_v20 = vld [vmem:[%s7517_s4 + $0x150] sm:$0xff]  ;;  %v348_v21 = vld [vmem:[%s7517_s4 + $0x1e0] sm:$0xff] }
  0x13   :  { %5494 = vmatpush3.bf16.msra.mxu1 %v5491_v62  ;;  %v336_v39 = vld [vmem:[%s7518_s5 + $0x1] sm:$0x7]  ;;  %v349_v59 = vld [vmem:[%s7518_s5 + $0x4] sm:$0x7] }
  0x14   :  { %5195 = vmatmul.mubr.msk.f32.gmra.mrb[4].mxu0 %vm51_vm0, %v38_v11  ;;  %5503 = vmatprep.subr.bf16.mxu1 %v7521_v3  ;;  %v347_v11 = vld [vmem:[%s7517_s4 + $0x1d8] sm:$0xff] }
  0x15   :  { %5197 = vmatprep.mubr.msk.f32.mxu0 %vm51_vm0, %v39_v12  ;;  %v6105_v18 = vpack.c.bf16 %v347_v11, %v344_v10 }
  0x18   :  { %5198 = vmatmul.mubr.msk.f32.gmra.mrb[6].mxu0 %vm51_vm0, %v40_v13 }
  0xdf   :  { %v5190_v27 = vpop.f32.mrb[0].mxu0 }
  0xe0   :  { %v148_v28 = vadd.f32 %v5190_v27, %v4883_v26  ;;  %v142_v29 = vpop.f32.mrb[1].mxu0  ;;  %v6124_v27 = vpack.c.bf16 %v348_v21, %v345_v20 }
  0xe1   :  { %v143_v30 = vadd.f32 %v4883_v26, %v142_v29 }
  0xe3   :  { %5765 = vtanh.f32 %v143_v30  ;;  %v5193_v31 = vpop.f32.mrb[2].mxu0 }
  0xe4   :  { %5767 = vtanh.f32 %v148_v28  ;;  %v158_v32 = vadd.f32 %v5193_v31, %v4883_v26  ;;  %v152_v33 = vpop.f32.mrb[3].mxu0 }
  0xe5   :  { %v153_v34 = vadd.f32 %v4883_v26, %v152_v33 }
  0xe6   :  { %5769 = vtanh.f32 %v158_v32 }
  0xe7   :  { %5771 = vtanh.f32 %v153_v34  ;;  %v5196_v35 = vpop.f32.mrb[4].mxu0 }
  0xe8   :  { %v168_v36 = vadd.f32 %v5196_v35, %v4883_v26  ;;  %v162_v37 = vpop.f32.mrb[5].mxu0 }
  0xe9   :  { %v163_v38 = vadd.f32 %v4883_v26, %v162_v37 }
  0xea   :  { %5773 = vtanh.f32 %v168_v36  ;;  %v351_v36 = vlaneseq }
  0xeb   :  { %5775 = vtanh.f32 %v163_v38  ;;  %v5199_v41 = vpop.f32.mrb[6].mxu0 }
  0xec   :  { %v178_v42 = vadd.f32 %v5199_v41, %v4883_v26  ;;  %v172_v43 = vpop.f32.mrb[7].mxu0  ;;  %v6168_v37 = vshrl.u32 %v351_v36, 7 }
  0xed   :  { %v5766_v45 = vpop.eup %5765  ;;  %v173_v46 = vadd.f32 %v4883_v26, %v172_v43  ;;  %v6121_v26 = vpack.c.bf16 %v346_v19, %v343_v15 }
  0xee   :  { %v5768_v47 = vpop.eup %5767  ;;  %5208 = vmatprep.mubr.msk.f32.mxu0 %vm51_vm0, %v5766_v45  ;;  %5777 = vtanh.f32 %v178_v42  ;;  %7534 = vst [vmem:[#allocation7_spill] sm:$0xff] %v6168_v37  ;;  %v6171_v38 = vsub.s32 2, %v6168_v37  ;;  %v6192_v58 = vsub.s32 0, %v6168_v37 }
  0xef   :  { %5209 = vmatmul.mubr.msk.f32.vlgmr.msra.gmra.mrb[8].mxu0 %vm51_vm0, %v5768_v47  ;;  %5779 = vtanh.f32 %v173_v46 }
  0xf0   :  { %v5770_v48 = vpop.eup %5769  ;;  %5482 = vmatpush1.bf16.msra.mxu0 %v5481_v44  ;;  %v362_v40 = vrot.slane %v336_v39, %v6171_v38  ;;  %7535 = vst [vmem:[#allocation8_spill] sm:$0xff] %v6192_v58  ;;  %v354_v61 = vrot.slane %v336_v39, %v6192_v58  ;;  %v612_v62 = vrot.slane %v349_v59, %v6192_v58 }
  0xf1   :  { %v5772_v49 = vpop.eup %5771  ;;  %5484 = vmatprep.subr.bf16.mxu0 %v5483_v56  ;;  %v6211_v15 = vrot.slane %v349_v59, %v6171_v38 }
  0xf2   :  { %5211 = vmatprep.mubr.msk.f32.mxu0 %vm51_vm0, %v5772_v49 }
  0xf3   :  { %5212 = vmatmul.mubr.msk.f32.gmra.mrb[10].mxu0 %vm51_vm0, %v5770_v48 }
  0xf4   :  { %v5774_v50 = vpop.eup %5773  ;;  %5486 = vmatpush1.bf16.msra.mxu0 %v5485_v60  ;;  %v6198_v60 = vsub.s32 1, %v6168_v37 }
  0xf5   :  { %v5776_v51 = vpop.eup %5775  ;;  %5496 = vmatprep.subr.bf16.mxu0 %v6073_v2 }
  0xf6   :  { %5214 = vmatprep.mubr.msk.f32.mxu0 %vm51_vm0, %v5776_v51  ;;  %7536 = vst [vmem:[#allocation9_spill] sm:$0xff] %v6198_v60  ;;  %v358_v0 = vrot.slane %v336_v39, %v6198_v60  ;;  %v616_v1 = vrot.slane %v349_v59, %v6198_v60 }
  0xf7   :  { %5215 = vmatmul.mubr.msk.f32.gmra.mrb[12].mxu0 %vm51_vm0, %v5774_v50 }
  0xf8   :  { %v5778_v52 = vpop.eup %5777  ;;  %v6206_v6 = vadd.f32 %v616_v1, %v358_v0 }
  0xf9   :  { %v5780_v53 = vpop.eup %5779 }
  0xfa   :  { %5217 = vmatprep.mubr.msk.f32.mxu0 %vm51_vm0, %v5780_v53 }
  0xfb   :  { %5218 = vmatmul.mubr.msk.f32.gmra.mrb[14].mxu0 %vm51_vm0, %v5778_v52 }
  0xfc   :  { %454 = vmatprep.mubr.f32.mxu0 %v7523_v63 }
 0x1c2   :  { %v5210_v9 = vpop.f32.mrb[8].mxu0 }
 0x1c3   :  { %v285_v12 = vpop.f32.mrb[9].mxu0  ;;  %v291_v17 = vadd.f32 %v5210_v9, %v4892_v4 }
 0x1c4   :  { %v286_v13 = vadd.f32 %v4892_v4, %v285_v12 }
 0x1c6   :  { %v5213_v22 = vpop.f32.mrb[10].mxu0  ;;  %4901 = vmatmul.mubr.msk.f32.vlgmr.msra.gmra.mrb[16].mxu0 %vm51_vm0, %v286_v13  ;;  %5228 = vmatprep.mubr.msk.f32.mxu1 %vm51_vm0, %v286_v13 }
 0x1c7   :  { %v301_v23 = vadd.f32 %v5213_v22, %v4892_v4  ;;  %v295_v24 = vpop.f32.mrb[11].mxu0  ;;  %5229 = vmatmul.mubr.msk.f32.vlgmr.msra.gmra.mrb[0].mxu1 %vm51_vm0, %v291_v17  ;;  %460 = vmatprep.mubr.f32.mxu0 %v7523_v63 }
 0x1c8   :  { %v296_v25 = vadd.f32 %v4892_v4, %v295_v24  ;;  %5498 = vmatpush1.bf16.msra.mxu0 %v6098_v14  ;;  %5505 = vmatpush3.bf16.msra.mxu1 %v6103_v16 }
 0x1c9   :  { %5500 = vmatprep.subr.bf16.mxu0 %v6105_v18  ;;  %5506 = vmatprep.subr.bf16.mxu1 %v7521_v3 }
 0x1ca   :  { %4902 = vmatmul.mubr.msk.f32.gmra.mrb[18].mxu0 %vm51_vm0, %v291_v17  ;;  %5231 = vmatprep.mubr.msk.f32.mxu1 %vm51_vm0, %v296_v25  ;;  %v5216_v28 = vpop.f32.mrb[12].mxu0 }
 0x1cb   :  { %5232 = vmatmul.mubr.msk.f32.gmra.mrb[2].mxu1 %vm51_vm0, %v301_v23  ;;  %v311_v29 = vadd.f32 %v5216_v28, %v4892_v4  ;;  %466 = vmatprep.mubr.f32.mxu0 %v7523_v63  ;;  %v305_v30 = vpop.f32.mrb[13].mxu0 }
 0x1cc   :  { %v306_v31 = vadd.f32 %v4892_v4, %v305_v30  ;;  %5502 = vmatpush1.bf16.msra.mxu0 %v6121_v26  ;;  %5508 = vmatpush3.bf16.msra.mxu1 %v6124_v27 }
 0x1cd   :  { %5510 = vmatprep.subr.bf16.mxu0 %v6073_v2  ;;  %5517 = vmatprep.subr.bf16.mxu1 %v7521_v3 }
 0x1ce   :  { %4903 = vmatmul.mubr.msk.f32.gmra.mrb[20].mxu0 %vm51_vm0, %v296_v25  ;;  %5234 = vmatprep.mubr.msk.f32.mxu1 %vm51_vm0, %v306_v31  ;;  %v5219_v32 = vpop.f32.mrb[14].mxu0 }
 0x1cf   :  { %472 = vmatprep.mubr.f32.mxu0 %v7523_v63  ;;  %5235 = vmatmul.mubr.msk.f32.gmra.mrb[4].mxu1 %vm51_vm0, %v311_v29  ;;  %v321_v33 = vadd.f32 %v5219_v32, %v4892_v4  ;;  %v315_v34 = vpop.f32.mrb[15].mxu0 }
 0x1d0   :  { %v316_v35 = vadd.f32 %v4892_v4, %v315_v34  ;;  %v6204_v4 = vadd.f32 %v612_v62, %v354_v61 }
 0x1d2   :  { %4904 = vmatmul.mubr.msk.f32.gmra.mrb[22].mxu0 %vm51_vm0, %v301_v23  ;;  %5237 = vmatprep.mubr.msk.f32.mxu1 %vm51_vm0, %v316_v35 }
 0x1d3   :  { %478 = vmatprep.mubr.f32.mxu0 %v7523_v63  ;;  %5238 = vmatmul.mubr.msk.f32.gmra.mrb[6].mxu1 %vm51_vm0, %v321_v33 }
 0x1d4   :  { %5248 = vmatprep.mubr.msk.f32.mxu1 %vm5919_vm1, %v7523_v63 }
 0x1d6   :  { %4905 = vmatmul.mubr.msk.f32.gmra.mrb[24].mxu0 %vm51_vm0, %v306_v31 }
 0x1d7   :  { %484 = vmatprep.mubr.f32.mxu0 %v7523_v63  ;;  %5249 = vmatmul.mubr.f32.vlgmr.msra.gmra.mrb[8].mxu1 %v7523_v63 }
 0x1d8   :  { %5519 = vmatpush3.bf16.msra.mxu1 %v6103_v16  ;;  %5259 = vmatprep.mubr.msk.f32.mxu1 %vm5919_vm1, %v7523_v63 }
 0x1d9   :  { %5520 = vmatprep.subr.bf16.mxu1 %v7521_v3 }
 0x1da   :  { %4906 = vmatmul.mubr.msk.f32.gmra.mrb[26].mxu0 %vm51_vm0, %v311_v29 }
 0x1db   :  { %490 = vmatprep.mubr.f32.mxu0 %v7523_v63 }
 0x1dc   :  { %5522 = vmatpush3.bf16.msra.mxu1 %v6124_v27 }
 0x1dd   :  { %5531 = vmatprep.subr.bf16.mxu1 %v7521_v3 }
 0x1de   :  { %4907 = vmatmul.mubr.msk.f32.gmra.mrb[28].mxu0 %vm51_vm0, %v316_v35 }
 0x1df   :  { %496 = vmatprep.mubr.f32.mxu0 %v7523_v63 }
 0x1e2   :  { %4908 = vmatmul.mubr.msk.f32.gmra.mrb[30].mxu0 %vm51_vm0, %v321_v33 }
 0x1e3   :  { %691 = vmatprep.mubr.f32.mxu0 %v7523_v63 }
 0x1e6   :  { %692 = vmatmul.mubr.f32.vlgmr.msra.gmra.mrb[16].mxu0 %v7523_v63 }
 0x1e7   :  { %5512 = vmatpush1.bf16.msra.mxu0 %v6098_v14  ;;  %857 = vmatprep.mubr.f32.mxu0 %v7523_v63 }
 0x1e8   :  { %5514 = vmatprep.subr.bf16.mxu0 %v6105_v18 }
 0x1eb   :  { %5516 = vmatpush1.bf16.msra.mxu0 %v6121_v26 }
 0x1ec   :  { %5524 = vmatprep.subr.bf16.mxu0 %v6073_v2 }
 0x29a   :  { %v5230_v41 = vpop.f32.mrb[0].mxu1 }
 0x29b   :  { %v6177_v42 = vadd.f32 %v5230_v41, %v362_v40  ;;  %v569_v43 = vpop.f32.mrb[1].mxu1 }
 0x29c   :  { %v570_v22 = vadd.f32 %v569_v43, %v362_v40 }
 0x29e   :  { %v5233_v44 = vpop.f32.mrb[2].mxu1 }
 0x29f   :  { %v6179_v45 = vadd.f32 %v5233_v44, %v362_v40  ;;  %v579_v46 = vpop.f32.mrb[3].mxu1 }
 0x2a0   :  { %v6181_v47 = vadd.f32 %v579_v46, %v362_v40 }
 0x2a2   :  { %v5236_v48 = vpop.f32.mrb[4].mxu1 }
 0x2a3   :  { %v6183_v49 = vadd.f32 %v5236_v48, %v362_v40  ;;  %v589_v50 = vpop.f32.mrb[5].mxu1 }
 0x2a4   :  { %v6185_v51 = vadd.f32 %v589_v50, %v362_v40 }
 0x2a6   :  { %v5239_v52 = vpop.f32.mrb[6].mxu1 }
 0x2a7   :  { %v6187_v53 = vadd.f32 %v5239_v52, %v362_v40  ;;  %v599_v54 = vpop.f32.mrb[7].mxu1 }
 0x2a8   :  { %v6189_v55 = vadd.f32 %v599_v54, %v362_v40 }
 0x2aa   :  { %v764_v56 = vpop.f32.mrb[8].mxu1 }
 0x2ab   :  { %v5250_v57 = vpop.f32.mrb[9].mxu1  ;;  %v765_v20 = vadd.f32 %v764_v56, %v6211_v15 }
 0x2b9   :  { %v693_v5 = vpop.f32.mrb[16].mxu0 }
 0x2ba   :  { %v5704_v7 = vadd.f32 %v6204_v4, %v693_v5  ;;  %v695_v8 = vpop.f32.mrb[17].mxu0 }
 0x2bb   :  { %v5706_v10 = vadd.f32 %v6206_v6, %v695_v8 }
 0x2bc   :  { %v4917_v9 = vmul.f32 -1.442695, %v5704_v7 }
 0x2bd   :  { %v4918_v11 = vmul.f32 -1.442695, %v5706_v10 }
 0x2be   :  { %5781 = vpow2.f32 %v4917_v9 }
 0x2bf   :  { %5783 = vpow2.f32 %v4918_v11 }
 0x2c8   :  { %v5782_v12 = vpop.eup %5781 }
 0x2c9   :  { %v772_v13 = vadd.f32 1.0, %v5782_v12  ;;  %v5784_v17 = vpop.eup %5783 }
 0x2ca   :  { %v779_v19 = vadd.f32 1.0, %v5784_v17 }
 0x2cb   :  { %5785 = vrcp.f32 %v772_v13 }
 0x2cc   :  { %5787 = vrcp.f32 %v779_v19 }
 0x2d5   :  { %v5786_v21 = vpop.eup %5785 }
 0x2d6   :  { %v782_v23 = vmul.f32 %v5786_v21, %v765_v20  ;;  %v5788_v25 = vpop.eup %5787 }
 0x2d7   :  { %v785_v28 = vsub.f32 1.0, %v5788_v25  ;;  %v787_v31 = vmul.f32 0.0, %v5788_v25 }
 0x2d8   :  { %v783_v24 = vadd.f32 %v782_v23, %v570_v22 }
 0x2da   :  { %5789 = vtanh.f32 %v783_v24 }
 0x2e4   :  { %v5790_v29 = vpop.eup %5789 }
 0x2e5   :  { %v786_v30 = vmul.f32 %v5790_v29, %v785_v28 }
 0x2e7   :  { %v788_v32 = vadd.f32 %v787_v31, %v786_v30 }
 0x2e9   :  { %789 = vst.msk [vmem:[#allocation2] sm:$0xff] %vm51_vm0, %v788_v32  ;;  %4919 = vmatmul.mubr.msk.f32.vlgmr.msra.gmra.mrb[18].mxu0 %vm51_vm0, %v788_v32  ;;  %5260 = vmatmul.mubr.msk.f32.vlgmr.msra.gmra.mrb[10].mxu1 %vm51_vm0, %v788_v32 }
 0x2ea   :  { %5526 = vmatpush1.bf16.msra.mxu0 %v6098_v14  ;;  %5533 = vmatpush3.bf16.msra.mxu1 %v6103_v16 }
 0x2eb   :  { %5528 = vmatprep.subr.bf16.mxu0 %v6105_v18  ;;  %5534 = vmatprep.subr.bf16.mxu1 %v7521_v3 }
 0x2ec   :  { %1023 = vmatprep.mubr.f32.mxu0 %v7523_v63  ;;  %5270 = vmatprep.mubr.msk.f32.mxu1 %vm5919_vm1, %v7523_v63 }
 0x2ee   :  { %5530 = vmatpush1.bf16.msra.mxu0 %v6121_v26  ;;  %5536 = vmatpush3.bf16.msra.mxu1 %v6124_v27 }
 0x2ef   :  { %5538 = vmatprep.subr.bf16.mxu0 %v6073_v2  ;;  %5545 = vmatprep.subr.bf16.mxu1 %v7521_v3 }
 0x3bc   :  { %v859_v33 = vpop.f32.mrb[18].mxu0  ;;  %v930_v34 = vpop.f32.mrb[10].mxu1 }
 0x3bd   :  { %v5708_v35 = vadd.f32 %v6204_v4, %v859_v33  ;;  %v861_v39 = vpop.f32.mrb[19].mxu0  ;;  %v5261_v40 = vpop.f32.mrb[11].mxu1  ;;  %v931_v54 = vadd.f32 %v930_v34, %v6211_v15 }
 0x3be   :  { %v5710_v43 = vadd.f32 %v6206_v6, %v861_v39 }
 0x3bf   :  { %v4921_v41 = vmul.f32 -1.442695, %v5708_v35 }
 0x3c0   :  { %v4922_v44 = vmul.f32 -1.442695, %v5710_v43 }
 0x3c1   :  { %5791 = vpow2.f32 %v4921_v41 }
 0x3c2   :  { %5793 = vpow2.f32 %v4922_v44 }
 0x3cb   :  { %v5792_v46 = vpop.eup %5791 }
 0x3cc   :  { %v938_v48 = vadd.f32 1.0, %v5792_v46  ;;  %v5794_v50 = vpop.eup %5793 }
 0x3cd   :  { %v945_v52 = vadd.f32 1.0, %v5794_v50 }
 0x3ce   :  { %5795 = vrcp.f32 %v938_v48 }
 0x3cf   :  { %5797 = vrcp.f32 %v945_v52 }
 0x3d8   :  { %v5796_v56 = vpop.eup %5795 }
 0x3d9   :  { %v948_v57 = vmul.f32 %v5796_v56, %v931_v54  ;;  %v5798_v61 = vpop.eup %5797 }
 0x3da   :  { %v951_v62 = vsub.f32 1.0, %v5798_v61  ;;  %v953_v5 = vmul.f32 %v5798_v61, %v788_v32 }
 0x3db   :  { %v949_v59 = vadd.f32 %v948_v57, %v6177_v42 }
 0x3dd   :  { %5799 = vtanh.f32 %v949_v59 }
 0x3e7   :  { %v5800_v0 = vpop.eup %5799 }
 0x3e8   :  { %v952_v1 = vmul.f32 %v5800_v0, %v951_v62 }
 0x3ea   :  { %v954_v7 = vadd.f32 %v953_v5, %v952_v1 }
 0x3ec   :  { %955 = vst.msk [vmem:[#allocation2 + $0x8] sm:$0xff] %vm51_vm0, %v954_v7  ;;  %4923 = vmatmul.mubr.msk.f32.vlgmr.msra.gmra.mrb[20].mxu0 %vm51_vm0, %v954_v7  ;;  %5271 = vmatmul.mubr.msk.f32.vlgmr.msra.gmra.mrb[12].mxu1 %vm51_vm0, %v954_v7 }
 0x3ed   :  { %5540 = vmatpush1.bf16.msra.mxu0 %v6098_v14  ;;  %5547 = vmatpush3.bf16.msra.mxu1 %v6103_v16 }
 0x3ee   :  { %5542 = vmatprep.subr.bf16.mxu0 %v6105_v18  ;;  %5548 = vmatprep.subr.bf16.mxu1 %v7521_v3 }
 0x3ef   :  { %1189 = vmatprep.mubr.f32.mxu0 %v7523_v63  ;;  %5281 = vmatprep.mubr.msk.f32.mxu1 %vm5919_vm1, %v7523_v63 }
 0x3f1   :  { %5544 = vmatpush1.bf16.msra.mxu0 %v6121_v26  ;;  %5550 = vmatpush3.bf16.msra.mxu1 %v6124_v27 }
 0x3f2   :  { %5552 = vmatprep.subr.bf16.mxu0 %v6073_v2  ;;  %5559 = vmatprep.subr.bf16.mxu1 %v7521_v3 }
 0x4bf   :  { %v1025_v42 = vpop.f32.mrb[20].mxu0  ;;  %v1096_v8 = vpop.f32.mrb[12].mxu1 }
 0x4c0   :  { %v5712_v9 = vadd.f32 %v6204_v4, %v1025_v42  ;;  %v1027_v10 = vpop.f32.mrb[21].mxu0  ;;  %v5272_v11 = vpop.f32.mrb[13].mxu1  ;;  %v1097_v23 = vadd.f32 %v1096_v8, %v6211_v15 }
 0x4c1   :  { %v5714_v13 = vadd.f32 %v6206_v6, %v1027_v10 }
 0x4c2   :  { %v4925_v12 = vmul.f32 -1.442695, %v5712_v9 }
 0x4c3   :  { %v4926_v17 = vmul.f32 -1.442695, %v5714_v13 }
 0x4c4   :  { %5801 = vpow2.f32 %v4925_v12 }
 0x4c5   :  { %5803 = vpow2.f32 %v4926_v17 }
 0x4ce   :  { %v5802_v19 = vpop.eup %5801 }
 0x4cf   :  { %v1104_v20 = vadd.f32 1.0, %v5802_v19  ;;  %v5804_v21 = vpop.eup %5803 }
 0x4d0   :  { %v1111_v22 = vadd.f32 1.0, %v5804_v21 }
 0x4d1   :  { %5805 = vrcp.f32 %v1104_v20 }
 0x4d2   :  { %5807 = vrcp.f32 %v1111_v22 }
 0x4db   :  { %v5806_v24 = vpop.eup %5805 }
 0x4dc   :  { %v1114_v25 = vmul.f32 %v5806_v24, %v1097_v23  ;;  %v5808_v29 = vpop.eup %5807 }
 0x4dd   :  { %v1117_v30 = vsub.f32 1.0, %v5808_v29  ;;  %v1119_v33 = vmul.f32 %v5808_v29, %v954_v7 }
 0x4de   :  { %v1115_v28 = vadd.f32 %v1114_v25, %v6181_v47 }
 0x4e0   :  { %5809 = vtanh.f32 %v1115_v28 }
 0x4ea   :  { %v5810_v31 = vpop.eup %5809 }
 0x4eb   :  { %v1118_v32 = vmul.f32 %v5810_v31, %v1117_v30 }
 0x4ed   :  { %v1120_v34 = vadd.f32 %v1119_v33, %v1118_v32 }
 0x4ef   :  { %1121 = vst.msk [vmem:[#allocation2 + $0x10] sm:$0xff] %vm51_vm0, %v1120_v34  ;;  %4927 = vmatmul.mubr.msk.f32.vlgmr.msra.gmra.mrb[22].mxu0 %vm51_vm0, %v1120_v34  ;;  %5282 = vmatmul.mubr.msk.f32.vlgmr.msra.gmra.mrb[14].mxu1 %vm51_vm0, %v1120_v34 }
 0x4f0   :  { %5554 = vmatpush1.bf16.msra.mxu0 %v6098_v14  ;;  %5561 = vmatpush3.bf16.msra.mxu1 %v6103_v16 }
 0x4f1   :  { %5556 = vmatprep.subr.bf16.mxu0 %v6105_v18  ;;  %5562 = vmatprep.subr.bf16.mxu1 %v7521_v3 }
 0x4f2   :  { %1355 = vmatprep.mubr.f32.mxu0 %v7523_v63  ;;  %5292 = vmatprep.mubr.msk.f32.mxu1 %vm5919_vm1, %v7523_v63 }
 0x4f4   :  { %5558 = vmatpush1.bf16.msra.mxu0 %v6121_v26  ;;  %5564 = vmatpush3.bf16.msra.mxu1 %v6124_v27 }
 0x4f5   :  { %5566 = vmatprep.subr.bf16.mxu0 %v6073_v2  ;;  %5573 = vmatprep.subr.bf16.mxu1 %v7521_v3 }
 0x5c2   :  { %v1191_v47 = vpop.f32.mrb[22].mxu0  ;;  %v1262_v35 = vpop.f32.mrb[14].mxu1 }
 0x5c3   :  { %v5716_v39 = vadd.f32 %v6204_v4, %v1191_v47  ;;  %v1193_v40 = vpop.f32.mrb[23].mxu0  ;;  %v5283_v41 = vpop.f32.mrb[15].mxu1  ;;  %v1263_v56 = vadd.f32 %v1262_v35, %v6211_v15 }
 0x5c4   :  { %v5718_v44 = vadd.f32 %v6206_v6, %v1193_v40 }
 0x5c5   :  { %v4929_v43 = vmul.f32 -1.442695, %v5716_v39 }
 0x5c6   :  { %v4930_v46 = vmul.f32 -1.442695, %v5718_v44 }
 0x5c7   :  { %5811 = vpow2.f32 %v4929_v43 }
 0x5c8   :  { %5813 = vpow2.f32 %v4930_v46 }
 0x5d1   :  { %v5812_v48 = vpop.eup %5811 }
 0x5d2   :  { %v1270_v50 = vadd.f32 1.0, %v5812_v48  ;;  %v5814_v52 = vpop.eup %5813 }
 0x5d3   :  { %v1277_v54 = vadd.f32 1.0, %v5814_v52 }
 0x5d4   :  { %5815 = vrcp.f32 %v1270_v50 }
 0x5d5   :  { %5817 = vrcp.f32 %v1277_v54 }
 0x5de   :  { %v5816_v57 = vpop.eup %5815 }
 0x5df   :  { %v1280_v59 = vmul.f32 %v5816_v57, %v1263_v56  ;;  %v5818_v62 = vpop.eup %5817 }
 0x5e0   :  { %v1283_v0 = vsub.f32 1.0, %v5818_v62  ;;  %v1285_v7 = vmul.f32 %v5818_v62, %v1120_v34 }
 0x5e1   :  { %v1281_v61 = vadd.f32 %v1280_v59, %v6179_v45 }
 0x5e3   :  { %5819 = vtanh.f32 %v1281_v61 }
 0x5ed   :  { %v5820_v1 = vpop.eup %5819 }
 0x5ee   :  { %v1284_v5 = vmul.f32 %v5820_v1, %v1283_v0 }
 0x5f0   :  { %v1286_v42 = vadd.f32 %v1285_v7, %v1284_v5  ;;  %v1961_v7 = vld [vmem:[%s7517_s4 + $0xe0] sm:$0xff] }
 0x5f2   :  { %1287 = vst.msk [vmem:[#allocation2 + $0x18] sm:$0xff] %vm51_vm0, %v1286_v42  ;;  %4931 = vmatmul.mubr.msk.f32.vlgmr.msra.gmra.mrb[24].mxu0 %vm51_vm0, %v1286_v42  ;;  %5293 = vmatmul.mubr.msk.f32.vlgmr.msra.gmra.mrb[16].mxu1 %vm51_vm0, %v1286_v42 }
 0x5f3   :  { %5568 = vmatpush1.bf16.msra.mxu0 %v6098_v14  ;;  %5575 = vmatpush3.bf16.msra.mxu1 %v6103_v16 }
 0x5f4   :  { %5570 = vmatprep.subr.bf16.mxu0 %v6105_v18  ;;  %5576 = vmatprep.subr.bf16.mxu1 %v7521_v3 }
 0x5f5   :  { %1521 = vmatprep.mubr.f32.mxu0 %v7523_v63  ;;  %5303 = vmatprep.mubr.msk.f32.mxu1 %vm5919_vm1, %v7523_v63 }
 0x5f7   :  { %5572 = vmatpush1.bf16.msra.mxu0 %v6121_v26  ;;  %5578 = vmatpush3.bf16.msra.mxu1 %v6124_v27 }
 0x5f8   :  { %5580 = vmatprep.subr.bf16.mxu0 %v6073_v2  ;;  %5587 = vmatprep.subr.bf16.mxu1 %v7521_v3 }
 0x6c5   :  { %v1357_v45 = vpop.f32.mrb[24].mxu0  ;;  %v1428_v8 = vpop.f32.mrb[16].mxu1 }
 0x6c6   :  { %v5720_v9 = vadd.f32 %v6204_v4, %v1357_v45  ;;  %v1359_v10 = vpop.f32.mrb[25].mxu0  ;;  %v5294_v11 = vpop.f32.mrb[17].mxu1  ;;  %v1429_v23 = vadd.f32 %v1428_v8, %v6211_v15 }
 0x6c7   :  { %v5722_v13 = vadd.f32 %v6206_v6, %v1359_v10 }
 0x6c8   :  { %v4933_v12 = vmul.f32 -1.442695, %v5720_v9 }
 0x6c9   :  { %v4934_v17 = vmul.f32 -1.442695, %v5722_v13 }
 0x6ca   :  { %5821 = vpow2.f32 %v4933_v12 }
 0x6cb   :  { %5823 = vpow2.f32 %v4934_v17 }
 0x6d4   :  { %v5822_v19 = vpop.eup %5821 }
 0x6d5   :  { %v1436_v20 = vadd.f32 1.0, %v5822_v19  ;;  %v5824_v21 = vpop.eup %5823 }
 0x6d6   :  { %v1443_v22 = vadd.f32 1.0, %v5824_v21 }
 0x6d7   :  { %5825 = vrcp.f32 %v1436_v20 }
 0x6d8   :  { %5827 = vrcp.f32 %v1443_v22 }
 0x6e1   :  { %v5826_v24 = vpop.eup %5825 }
 0x6e2   :  { %v1446_v25 = vmul.f32 %v5826_v24, %v1429_v23  ;;  %v5828_v29 = vpop.eup %5827 }
 0x6e3   :  { %v1449_v30 = vsub.f32 1.0, %v5828_v29  ;;  %v1451_v33 = vmul.f32 %v5828_v29, %v1286_v42  ;;  %v1958_v29 = vld [vmem:[%s7517_s4 + $0xc8] sm:$0xff] }
 0x6e4   :  { %v1447_v28 = vadd.f32 %v1446_v25, %v6185_v51 }
 0x6e6   :  { %5829 = vtanh.f32 %v1447_v28  ;;  %v1952_v28 = vld [vmem:[%s7517_s4 + $0x38] sm:$0xff] }
 0x6f0   :  { %v5830_v31 = vpop.eup %5829 }
 0x6f1   :  { %v1450_v32 = vmul.f32 %v5830_v31, %v1449_v30  ;;  %v1954_v31 = vld [vmem:[%s7517_s4 + $0x48] sm:$0xff] }
 0x6f3   :  { %v1452_v34 = vadd.f32 %v1451_v33, %v1450_v32  ;;  %v1960_v32 = vld [vmem:[%s7517_s4 + $0xd8] sm:$0xff] }
 0x6f5   :  { %1453 = vst.msk [vmem:[#allocation2 + $0x20] sm:$0xff] %vm51_vm0, %v1452_v34  ;;  %4935 = vmatmul.mubr.msk.f32.vlgmr.msra.gmra.mrb[26].mxu0 %vm51_vm0, %v1452_v34  ;;  %5304 = vmatmul.mubr.msk.f32.vlgmr.msra.gmra.mrb[18].mxu1 %vm51_vm0, %v1452_v34 }
 0x6f6   :  { %5582 = vmatpush1.bf16.msra.mxu0 %v6098_v14  ;;  %5589 = vmatpush3.bf16.msra.mxu1 %v6103_v16 }
 0x6f7   :  { %5584 = vmatprep.subr.bf16.mxu0 %v6105_v18  ;;  %5590 = vmatprep.subr.bf16.mxu1 %v7521_v3 }
 0x6f8   :  { %1687 = vmatprep.mubr.f32.mxu0 %v7523_v63  ;;  %5314 = vmatprep.mubr.msk.f32.mxu1 %vm5919_vm1, %v7523_v63 }
 0x6fa   :  { %5586 = vmatpush1.bf16.msra.mxu0 %v6121_v26  ;;  %5592 = vmatpush3.bf16.msra.mxu1 %v6124_v27 }
 0x6fb   :  { %5594 = vmatprep.subr.bf16.mxu0 %v6073_v2  ;;  %5601 = vmatprep.subr.bf16.mxu1 %v7521_v3 }
 0x7c8   :  { %v1523_v51 = vpop.f32.mrb[26].mxu0  ;;  %v1594_v47 = vpop.f32.mrb[18].mxu1 }
 0x7c9   :  { %v5724_v35 = vadd.f32 %v6204_v4, %v1523_v51  ;;  %v1525_v39 = vpop.f32.mrb[27].mxu0  ;;  %v5305_v40 = vpop.f32.mrb[19].mxu1  ;;  %v1595_v2 = vadd.f32 %v1594_v47, %v6211_v15  ;;  %v1967_v51 = vld [vmem:[%s7517_s4 + $0x170] sm:$0xff]  ;;  %v1973_v47 = vld [vmem:[%s7517_s4 + $0x200] sm:$0xff] }
 0x7ca   :  { %v5726_v43 = vadd.f32 %v6206_v6, %v1525_v39  ;;  %v5609_v40 = vpack.c.bf16 %v1958_v29, %v1952_v28 }
 0x7cb   :  { %v4937_v41 = vmul.f32 -1.442695, %v5724_v35 }
 0x7cc   :  { %v4938_v44 = vmul.f32 -1.442695, %v5726_v43  ;;  %v1964_v43 = vld [vmem:[%s7517_s4 + $0x158] sm:$0xff] }
 0x7cd   :  { %5831 = vpow2.f32 %v4937_v41  ;;  %v5617_v41 = vpack.c.bf16 %v1960_v32, %v1954_v31 }
 0x7ce   :  { %5833 = vpow2.f32 %v4938_v44 }
 0x7d7   :  { %v5832_v46 = vpop.eup %5831 }
 0x7d8   :  { %v1602_v48 = vadd.f32 1.0, %v5832_v46  ;;  %v5834_v50 = vpop.eup %5833 }
 0x7d9   :  { %v1609_v52 = vadd.f32 1.0, %v5834_v50  ;;  %v1970_v50 = vld [vmem:[%s7517_s4 + $0x1e8] sm:$0xff] }
 0x7da   :  { %5835 = vrcp.f32 %v1602_v48  ;;  %v5619_v48 = vpack.c.bf16 %v1973_v47, %v1967_v51 }
 0x7db   :  { %5837 = vrcp.f32 %v1609_v52  ;;  %v1966_v52 = vld [vmem:[%s7517_s4 + $0x168] sm:$0xff] }
 0x7e4   :  { %v5836_v54 = vpop.eup %5835 }
 0x7e5   :  { %v1612_v56 = vmul.f32 %v5836_v54, %v1595_v2  ;;  %v5838_v59 = vpop.eup %5837  ;;  %v1972_v2 = vld [vmem:[%s7517_s4 + $0x1f8] sm:$0xff]  ;;  %v5613_v54 = vpack.c.bf16 %v1970_v50, %v1964_v43 }
 0x7e6   :  { %v1615_v61 = vsub.f32 1.0, %v5838_v59  ;;  %v1617_v1 = vmul.f32 %v5838_v59, %v1452_v34  ;;  %v1971_v34 = vld [vmem:[%s7517_s4 + $0x1f0] sm:$0xff]  ;;  %v6387_v59 = vld [vmem:[#allocation2 + $0x8] sm:$0xff] }
 0x7e7   :  { %v1613_v57 = vadd.f32 %v1612_v56, %v6183_v49  ;;  %v1953_v49 = vld [vmem:[%s7517_s4 + $0x40] sm:$0xff]  ;;  %v5621_v56 = vpack.c.bf16 %v1972_v2, %v1966_v52 }
 0x7e9   :  { %5839 = vtanh.f32 %v1613_v57  ;;  %v6379_v57 = vld [vmem:[#allocation2] sm:$0xff] }
 0x7f3   :  { %v5840_v62 = vpop.eup %5839 }
 0x7f4   :  { %v1616_v0 = vmul.f32 %v5840_v62, %v1615_v61  ;;  %v6395_v61 = vld [vmem:[#allocation2 + $0x10] sm:$0xff]  ;;  %v6403_v62 = vld [vmem:[#allocation2 + $0x18] sm:$0xff] }
 0x7f6   :  { %v1618_v5 = vadd.f32 %v1617_v1, %v1616_v0  ;;  %v6411_v0 = vld [vmem:[#allocation2 + $0x20] sm:$0xff] }
 0x7f8   :  { %1619 = vst.msk [vmem:[#allocation2 + $0x28] sm:$0xff] %vm51_vm0, %v1618_v5  ;;  %4939 = vmatmul.mubr.msk.f32.vlgmr.msra.gmra.mrb[28].mxu0 %vm51_vm0, %v1618_v5  ;;  %5315 = vmatmul.mubr.msk.f32.vlgmr.msra.gmra.mrb[20].mxu1 %vm51_vm0, %v1618_v5 }
 0x7f9   :  { %5596 = vmatpush1.bf16.msra.mxu0 %v6098_v14  ;;  %5603 = vmatpush3.bf16.msra.mxu1 %v6103_v16  ;;  %v1959_v14 = vld [vmem:[%s7517_s4 + $0xd0] sm:$0xff] }
 0x7fa   :  { %5598 = vmatprep.subr.bf16.mxu0 %v6105_v18  ;;  %5604 = vmatprep.subr.bf16.mxu1 %v7521_v3  ;;  %v1955_v16 = vld [vmem:[%s7517_s4 + $0x50] sm:$0xff]  ;;  %v5607_v18 = vpack.c.bf16 %v1959_v14, %v1953_v49  ;;  %v1957_v49 = vld [vmem:[%s7517_s4 + $0x60] sm:$0xff] }
 0x7fb   :  { %1853 = vmatprep.mubr.f32.mxu0 %v7523_v63  ;;  %5325 = vmatprep.mubr.msk.f32.mxu1 %vm5919_vm1, %v7523_v63  ;;  %v1963_v14 = vld [vmem:[%s7517_s4 + $0xf0] sm:$0xff] }
 0x7fd   :  { %5600 = vmatpush1.bf16.msra.mxu0 %v6121_v26  ;;  %5606 = vmatpush3.bf16.msra.mxu1 %v6124_v27  ;;  %v5615_v26 = vpack.c.bf16 %v1961_v7, %v1955_v16  ;;  %v1956_v16 = vld [vmem:[%s7517_s4 + $0x58] sm:$0xff]  ;;  %v1962_v7 = vld [vmem:[%s7517_s4 + $0xe8] sm:$0xff] }
 0x7fe   :  { %5608 = vmatprep.subr.bf16.mxu1 %v5607_v18  ;;  %v5623_v18 = vpack.c.bf16 %v1963_v14, %v1957_v49 }
 0x7ff   :  { %5616 = vmatprep.subr.bf16.mxu0 %v5615_v26  ;;  %v6419_v1 = vld [vmem:[#allocation2 + $0x28] sm:$0xff]  ;;  %v1969_v26 = vld [vmem:[%s7517_s4 + $0x180] sm:$0xff] }
 0x800   :  { %7537 = vst [vmem:[#allocation10_spill] sm:$0xff] %v6419_v1 }
 0x8cb   :  { %v1689_v27 = vpop.f32.mrb[28].mxu0  ;;  %v1760_v42 = vpop.f32.mrb[20].mxu1 }
 0x8cc   :  { %v5728_v45 = vadd.f32 %v6204_v4, %v1689_v27  ;;  %v1691_v8 = vpop.f32.mrb[29].mxu0  ;;  %v5316_v9 = vpop.f32.mrb[21].mxu1  ;;  %v1761_v21 = vadd.f32 %v1760_v42, %v6211_v15  ;;  %v1975_v27 = vld [vmem:[%s7517_s4 + $0x210] sm:$0xff]  ;;  %v5625_v42 = vpack.c.bf16 %v1962_v7, %v1956_v16 }
 0x8cd   :  { %v5730_v11 = vadd.f32 %v6206_v6, %v1691_v8  ;;  %v1968_v8 = vld [vmem:[%s7517_s4 + $0x178] sm:$0xff]  ;;  %v1974_v9 = vld [vmem:[%s7517_s4 + $0x208] sm:$0xff] }
 0x8ce   :  { %v4941_v10 = vmul.f32 -1.442695, %v5728_v45  ;;  %v5627_v45 = vpack.c.bf16 %v1975_v27, %v1969_v26 }
 0x8cf   :  { %v4942_v12 = vmul.f32 -1.442695, %v5730_v11  ;;  %v6461_v11 = vand.u32 127, %v351_v36  ;;  %v2000_v36 = vsub.s32 3, %v6168_v37 }
 0x8d0   :  { %5841 = vpow2.f32 %v4941_v10  ;;  %v5629_v10 = vpack.c.bf16 %v1974_v9, %v1968_v8 }
 0x8d1   :  { %5843 = vpow2.f32 %v4942_v12  ;;  %7539 = vst [vmem:[#allocation12_spill] sm:$0xff] %v6461_v11  ;;  %vm2389_vm2 = vcmp.ge.s32.totalorder %v6461_v11, 16  ;;  %vm2390_vm3 = vcmp.lt.s32.totalorder %v6461_v11, 32  ;;  %vm2386_vm4 = vcmp.lt.s32.totalorder %v6461_v11, 16 }
 0x8d2   :  { %vm2391_vm5 = vmand %vm2389_vm2, %vm2390_vm3  ;;  %v6490_v29 = vsel %vm2386_vm4, 1.0, %v7523_v63 }
 0x8da   :  { %v5842_v13 = vpop.eup %5841 }
 0x8db   :  { %v1768_v17 = vadd.f32 1.0, %v5842_v13  ;;  %v5844_v19 = vpop.eup %5843 }
 0x8dc   :  { %v1775_v20 = vadd.f32 1.0, %v5844_v19 }
 0x8dd   :  { %5845 = vrcp.f32 %v1768_v17 }
 0x8de   :  { %5847 = vrcp.f32 %v1775_v20 }
 0x8e7   :  { %v5846_v22 = vpop.eup %5845 }
 0x8e8   :  { %v1778_v23 = vmul.f32 %v5846_v22, %v1761_v21  ;;  %v5848_v25 = vpop.eup %5847  ;;  %v6470_v22 = vld [vmem:[%s7518_s5 + $0x7] sm:$0x3f] }
 0x8e9   :  { %v1781_v30 = vsub.f32 1.0, %v5848_v25  ;;  %v1783_v39 = vmul.f32 %v5848_v25, %v1618_v5  ;;  %7540 = vst [vmem:[#allocation13_spill] sm:$0xff] %v6470_v22  ;;  %v6484_v25 = vrot.slane %v6470_v22, %v6198_v60  ;;  %v6487_v28 = vrot.slane %v6470_v22, %v2000_v36 }
 0x8ea   :  { %v1779_v24 = vadd.f32 %v1778_v23, %v6189_v55  ;;  %v1965_v55 = vld [vmem:[%s7517_s4 + $0x160] sm:$0xff] }
 0x8eb   :  { %v5611_v46 = vpack.c.bf16 %v1971_v34, %v1965_v55 }
 0x8ec   :  { %5849 = vtanh.f32 %v1779_v24 }
 0x8f6   :  { %v5850_v33 = vpop.eup %5849 }
 0x8f7   :  { %v1782_v35 = vmul.f32 %v5850_v33, %v1781_v30  ;;  %v6493_v30 = vsel %vm2391_vm5, 1.0, %v7523_v63 }
 0x8f9   :  { %v6359_v44 = vadd.f32 %v1783_v39, %v1782_v35 }
 0x8fb   :  { %1785 = vst.msk [vmem:[#allocation2 + $0x30] sm:$0xff] %vm51_vm0, %v6359_v44  ;;  %4943 = vmatmul.mubr.msk.f32.vlgmr.msra.gmra.mrb[30].mxu0 %vm51_vm0, %v6359_v44  ;;  %5326 = vmatmul.mubr.msk.f32.vlgmr.msra.gmra.mrb[22].mxu1 %vm51_vm0, %v6359_v44 }
 0x8fc   :  { %5610 = vmatpush1.bf16.msra.mxu1 %v5609_v40  ;;  %5618 = vmatpush1.bf16.msra.mxu0 %v5617_v41 }
 0x8fd   :  { %5612 = vmatprep.subr.bf16.mxu1 %v5611_v46  ;;  %5620 = vmatprep.subr.bf16.mxu0 %v5619_v48 }
 0x8fe   :  { %2104 = vmatprep.mubr.f32.mxu1 %v7523_v63  ;;  %2217 = vmatprep.mubr.f32.mxu0 %v7523_v63 }
 0x900   :  { %5614 = vmatpush1.bf16.msra.mxu1 %v5613_v54  ;;  %5622 = vmatpush1.bf16.msra.mxu0 %v5621_v56 }
 0x901   :  { %5328 = vmatprep.subr.mxu0 %v7523_v63  ;;  %5624 = vmatprep.subr.bf16.mxu1 %v5623_v18 }
 0x902   :  { %v6427_v5 = vld [vmem:[#allocation2 + $0x30] sm:$0xff] }
 0x903   :  { %4947 = vmatmul.mubr.msk.f32.vlgmr.msra.gmra.mrb[24].mxu1 %vm51_vm0, %v6379_v57  ;;  %4955 = vmatmul.mubr.msk.f32.vlgmr.msra.gmra.mrb[32].mxu0 %vm51_vm0, %v6379_v57  ;;  %7538 = vst [vmem:[#allocation11_spill] sm:$0xff] %v6427_v5 }
 0x904   :  { %2110 = vmatprep.mubr.f32.mxu1 %v7523_v63  ;;  %2223 = vmatprep.mubr.f32.mxu0 %v7523_v63 }
 0x905   :  { %5626 = vmatpush1.bf16.msra.mxu1 %v5625_v42 }
 0x906   :  { %5628 = vmatprep.subr.bf16.mxu1 %v5627_v45 }
 0x907   :  { %4948 = vmatmul.mubr.msk.f32.gmra.mrb[26].mxu1 %vm51_vm0, %v6387_v59  ;;  %4956 = vmatmul.mubr.msk.f32.gmra.mrb[34].mxu0 %vm51_vm0, %v6387_v59 }
 0x908   :  { %2116 = vmatprep.mubr.f32.mxu1 %v7523_v63  ;;  %2229 = vmatprep.mubr.f32.mxu0 %v7523_v63 }
 0x909   :  { %5630 = vmatpush1.bf16.msra.mxu1 %v5629_v10 }
 0x90a   :  { %5353 = vmatprep.subr.mxu1 %v7523_v63 }
 0x90b   :  { %4949 = vmatmul.mubr.msk.f32.gmra.mrb[28].mxu1 %vm51_vm0, %v6395_v61  ;;  %4957 = vmatmul.mubr.msk.f32.gmra.mrb[36].mxu0 %vm51_vm0, %v6395_v61 }
 0x90c   :  { %2122 = vmatprep.mubr.f32.mxu1 %v7523_v63  ;;  %2235 = vmatprep.mubr.f32.mxu0 %v7523_v63 }
 0x90f   :  { %4950 = vmatmul.mubr.msk.f32.gmra.mrb[30].mxu1 %vm51_vm0, %v6403_v62  ;;  %4958 = vmatmul.mubr.msk.f32.gmra.mrb[38].mxu0 %vm51_vm0, %v6403_v62 }
 0x910   :  { %2128 = vmatprep.mubr.f32.mxu1 %v7523_v63  ;;  %2241 = vmatprep.mubr.f32.mxu0 %v7523_v63 }
 0x913   :  { %4951 = vmatmul.mubr.msk.f32.gmra.mrb[32].mxu1 %vm51_vm0, %v6411_v0  ;;  %4959 = vmatmul.mubr.msk.f32.gmra.mrb[40].mxu0 %vm51_vm0, %v6411_v0 }
 0x914   :  { %2134 = vmatprep.mubr.f32.mxu1 %v7523_v63  ;;  %2247 = vmatprep.mubr.f32.mxu0 %v7523_v63 }
 0x917   :  { %4952 = vmatmul.mubr.msk.f32.gmra.mrb[34].mxu1 %vm51_vm0, %v6419_v1  ;;  %4960 = vmatmul.mubr.msk.f32.gmra.mrb[42].mxu0 %vm51_vm0, %v6419_v1 }
 0x918   :  { %2140 = vmatprep.mubr.f32.mxu1 %v7523_v63  ;;  %2253 = vmatprep.mubr.f32.mxu0 %v7523_v63 }
 0x91b   :  { %4953 = vmatmul.mubr.msk.f32.gmra.mrb[36].mxu1 %vm51_vm0, %v6427_v5  ;;  %4961 = vmatmul.mubr.msk.f32.gmra.mrb[44].mxu0 %vm51_vm0, %v6427_v5 }
 0x91c   :  { %2146 = vmatprep.mubr.f32.mxu1 %v7523_v63  ;;  %2259 = vmatprep.mubr.f32.mxu0 %v7523_v63 }
 0x9ce   :  { %v1855_v12 = vpop.f32.mrb[30].mxu0  ;;  %v1926_v13 = vpop.f32.mrb[22].mxu1 }
 0x9cf   :  { %v5732_v17 = vadd.f32 %v6204_v4, %v1855_v12  ;;  %v1857_v19 = vpop.f32.mrb[31].mxu0  ;;  %v5327_v20 = vpop.f32.mrb[23].mxu1  ;;  %v6476_v4 = vrot.slane %v6470_v22, %v6192_v58  ;;  %v6502_v41 = vadd.f32 %v1926_v13, %v6211_v15 }
 0x9d0   :  { %v5734_v21 = vadd.f32 %v6206_v6, %v1857_v19  ;;  %v6480_v6 = vrot.slane %v6470_v22, %v6171_v38 }
 0x9d1   :  { %v4945_v23 = vmul.f32 -1.442695, %v5732_v17 }
 0x9d2   :  { %v4946_v24 = vmul.f32 -1.442695, %v5734_v21 }
 0x9d3   :  { %5851 = vpow2.f32 %v4945_v23 }
 0x9d4   :  { %5853 = vpow2.f32 %v4946_v24 }
 0x9d6   :  { %v2106_v31 = vpop.f32.mrb[24].mxu1  ;;  %v2219_v32 = vpop.f32.mrb[32].mxu0 }
 0x9d7   :  { %v2107_v55 = vadd.f32 %v2106_v31, %v6476_v4  ;;  %v2220_v38 = vadd.f32 %v2219_v32, %v6480_v6  ;;  %v2108_v33 = vpop.f32.mrb[25].mxu1  ;;  %v2221_v34 = vpop.f32.mrb[33].mxu0 }
 0x9d8   :  { %v2109_v51 = vadd.f32 %v2108_v33, %v6484_v25  ;;  %v2222_v47 = vadd.f32 %v2221_v34, %v6487_v28 }
 0x9d9   :  { %v2404_v35 = vmul.f32 0.25, %v2107_v55  ;;  %v2570_v39 = vmul.f32 %v6490_v29, %v2220_v38  ;;  %v2724_v40 = vmul.f32 %v6493_v30, %v2220_v38 }
 0x9da   :  { %v6505_v43 = vmul.f32 %v6490_v29, %v2109_v51  ;;  %v6508_v46 = vmul.f32 %v6493_v30, %v2109_v51  ;;  %v2924_v48 = vmul.f32 0.25, %v2222_v47  ;;  %v2112_v50 = vpop.f32.mrb[26].mxu1  ;;  %v2225_v52 = vpop.f32.mrb[34].mxu0 }
 0x9db   :  { %v2412_v2 = vmul.f32 %v2404_v35, %v6490_v29  ;;  %v2578_v54 = vmul.f32 %v2404_v35, %v6493_v30  ;;  %v3828_v56 = vrot.slane %v2724_v40, 1  ;;  %v3916_v49 = vrot.slane %v2570_v39, 1  ;;  %v2114_v14 = vpop.f32.mrb[27].mxu1  ;;  %v2227_v16 = vpop.f32.mrb[35].mxu0 }
 0x9dc   :  { %v3610_v15 = vrot.slane %v6505_v43, 1  ;;  %v3728_v18 = vrot.slane %v6508_v46, 1  ;;  %v6515_v7 = vmul.f32 %v2924_v48, %v6490_v29  ;;  %v6518_v26 = vmul.f32 %v2924_v48, %v6493_v30 }
 0x9dd   :  { %v5852_v27 = vpop.eup %5851  ;;  %v3596_v42 = vrot.slane %v2412_v2, 1  ;;  %v3714_v45 = vrot.slane %v2578_v54, 1  ;;  %v2113_v8 = vadd.f32 %v2112_v50, %v6476_v4  ;;  %v2226_v9 = vadd.f32 %v2225_v52, %v6480_v6 }
 0x9de   :  { %v5854_v10 = vpop.eup %5853  ;;  %v1934_v12 = vadd.f32 1.0, %v5852_v27  ;;  %v2956_v13 = vrot.slane %v6515_v7, 2  ;;  %v2118_v20 = vpop.f32.mrb[28].mxu1  ;;  %v2115_v33 = vadd.f32 %v2114_v14, %v6484_v25  ;;  %v2228_v34 = vadd.f32 %v2227_v16, %v6487_v28 }
 0x9df   :  { %v2231_v21 = vpop.f32.mrb[36].mxu0  ;;  %v1941_v36 = vadd.f32 1.0, %v5854_v10  ;;  %v2405_v24 = vmul.f32 0.25, %v2113_v8  ;;  %v2571_v31 = vmul.f32 %v6490_v29, %v2226_v9  ;;  %v2120_v32 = vpop.f32.mrb[29].mxu1  ;;  %v2725_v38 = vmul.f32 %v6493_v30, %v2226_v9 }
 0x9e0   :  { %v2233_v55 = vpop.f32.mrb[37].mxu0  ;;  %5855 = vrcp.f32 %v1934_v12  ;;  %v2421_v27 = vmul.f32 %v6490_v29, %v2115_v33 }
 0x9e1   :  { %5857 = vrcp.f32 %v1941_v36  ;;  %v2413_v51 = vmul.f32 %v2405_v24, %v6490_v29  ;;  %v2579_v47 = vmul.f32 %v2405_v24, %v6493_v30  ;;  %v2836_v35 = vrot.slane %v2571_v31, 7 }
 0x9e2   :  { %v2740_v48 = vrot.slane %v2725_v38, 7  ;;  %v6533_v50 = vsel %vm2437_vm6, %v2725_v38, %v3828_v56  ;;  %v6536_v52 = vsel %vm2437_vm6, %v2571_v31, %v3916_v49  ;;  %v2124_v8 = vpop.f32.mrb[30].mxu1  ;;  %v6539_v9 = vpop.f32.mrb[38].mxu0  ;;  %v2465_v31 = vrot.slane %v2421_v27, 7 }
 0x9e3   :  { %v2436_v14 = vrot.slane %v2413_v51, 7  ;;  %v2602_v16 = vrot.slane %v2579_v47, 7  ;;  %v6542_v10 = vsel %vm2437_vm6, %v2413_v51, %v3596_v42  ;;  %v6545_v12 = vsel %vm2437_vm6, %v2579_v47, %v3714_v45  ;;  %v6547_v36 = vpop.f32.mrb[31].mxu1  ;;  %v6549_v56 = vpop.f32.mrb[39].mxu0 }
 0x9e4   :  { %v6552_v49 = vsel %vm2437_vm6, %v2740_v48, %v2724_v40  ;;  %v6555_v24 = vsel %vm2437_vm6, %v2836_v35, %v2570_v39  ;;  %v2587_v38 = vmul.f32 %v6493_v30, %v2115_v33  ;;  %v6561_v45 = vsel %vm2437_vm6, %v2421_v27, %v3610_v15 }
 0x9e5   :  { %v2438_v3 = vsel %vm2437_vm6, %v2436_v14, %v2412_v2  ;;  %v2603_v42 = vsel %vm2437_vm6, %v2602_v16, %v2578_v54  ;;  %v2925_v51 = vmul.f32 0.25, %v2228_v34  ;;  %v6565_v47 = vsel %vm2437_vm6, %v2465_v31, %v6505_v43 }
 0x9e6   :  { %v2624_v40 = vrot.slane %v2587_v38, 7  ;;  %v6568_v39 = vsel %vm2437_vm6, %v2587_v38, %v3728_v18  ;;  %v2119_v35 = vadd.f32 %v2118_v20, %v6476_v4  ;;  %v6571_v33 = vpop.f32.mrb[32].mxu1  ;;  %v6573_v2 = vpop.f32.mrb[40].mxu0  ;;  %v2232_v34 = vadd.f32 %v2231_v21, %v6480_v6 }
 0x9e7   :  { %v2933_v54 = vmul.f32 %v2925_v51, %v6490_v29  ;;  %v3088_v15 = vmul.f32 %v2925_v51, %v6493_v30  ;;  %v2121_v48 = vadd.f32 %v2120_v32, %v6484_v25  ;;  %v6579_v43 = vpop.f32.mrb[33].mxu1  ;;  %v6581_v27 = vpop.f32.mrb[41].mxu0  ;;  %v2234_v14 = vadd.f32 %v2233_v55, %v6487_v28 }
 0x9e8   :  { %v6585_v18 = vsel %vm2437_vm6, %v2624_v40, %v6508_v46  ;;  %v2406_v20 = vmul.f32 0.25, %v2119_v35  ;;  %v2125_v16 = vadd.f32 %v2124_v8, %v6476_v4  ;;  %v2572_v19 = vmul.f32 %v6490_v29, %v2232_v34 }
 0x9e9   :  { %v2957_v31 = vrot.slane %v2933_v54, 1  ;;  %v3112_v38 = vrot.slane %v3088_v15, 1  ;;  %v4005_v51 = vrot.slane %v2933_v54, 2  ;;  %v4120_v63 = vrot.slane %v3088_v15, 2 }
 0x9ea   :  { %v5856_v21 = vpop.eup %5855  ;;  %v2414_v32 = vmul.f32 %v2406_v20, %v6490_v29  ;;  %v2580_v23 = vmul.f32 %v2406_v20, %v6493_v30  ;;  %v2726_v17 = vmul.f32 %v6493_v30, %v2232_v34  ;;  %v6593_v46 = vpop.f32.mrb[34].mxu1  ;;  %v7541_v54 = vrot.slane %v6518_v26, 2 }
 0x9eb   :  { %v6595_v40 = vpop.f32.mrb[42].mxu0  ;;  %v6597_v55 = vpop.eup %5857  ;;  %v1944_v8 = vmul.f32 %v5856_v21, %v6502_v41  ;;  %v2958_v35 = vsel %vm2437_vm6, %v2957_v31, %v2956_v13  ;;  %v7542_v20 = vrot.slane %v6515_v7, 3  ;;  %v7543_v13 = vrot.slane %v6518_v26, 3 }
 0x9ec   :  { %v3113_v15 = vsel %vm2437_vm6, %v3112_v38, %v7541_v54  ;;  %v6609_v58 = vpop.f32.mrb[35].mxu1  ;;  %v6611_v60 = vpop.f32.mrb[43].mxu0  ;;  %v6616_v41 = vmul.f32 %v6597_v55, %v6359_v44  ;;  %v2439_v21 = vrot.slane %v2414_v32, 6  ;;  %v2604_v7 = vrot.slane %v2580_v23, 6 }
 0x9ed   :  { %v4006_v34 = vsel %vm2437_vm6, %v4005_v51, %v7542_v20  ;;  %v4121_v31 = vsel %vm2437_vm6, %v4120_v63, %v7543_v13  ;;  %v1945_v38 = vadd.f32 %v1944_v8, %v6187_v53  ;;  %v3598_v54 = vrot.slane %v2414_v32, 7 }
 0x9ee   :  { %v3716_v51 = vrot.slane %v2580_v23, 7  ;;  %v2441_v20 = vsel %vm2440_vm7, %v2439_v21, %v2438_v3  ;;  %v2742_v22 = vrot.slane %v2726_v17, 6  ;;  %v2838_v37 = vrot.slane %v2572_v19, 6  ;;  %v6623_v11 = vpop.f32.mrb[36].mxu1  ;;  %v6625_v1 = vpop.f32.mrb[44].mxu0 }
 0x9ef   :  { %v3830_v5 = vrot.slane %v2726_v17, 7  ;;  %5859 = vtanh.f32 %v1945_v38  ;;  %v2605_v44 = vsel %vm2440_vm7, %v2604_v7, %v2603_v42  ;;  %v3599_v63 = vsel %vm2440_vm7, %v3598_v54, %v6542_v10  ;;  %v6632_v26 = vpop.f32.mrb[37].mxu1  ;;  %v6634_v23 = vpop.f32.mrb[45].mxu0 }
 0x9f0   :  { %v3717_v53 = vsel %vm2440_vm7, %v3716_v51, %v6545_v12  ;;  %v2743_v3 = vsel %vm2440_vm7, %v2742_v22, %v6552_v49  ;;  %v2839_v17 = vsel %vm2440_vm7, %v2838_v37, %v6555_v24  ;;  %v3918_v42 = vrot.slane %v2572_v19, 7 }
 0x9f1   :  { %v3831_v32 = vsel %vm2440_vm7, %v3830_v5, %v6533_v50  ;;  %v2422_v10 = vmul.f32 %v6490_v29, %v2121_v48  ;;  %v2588_v8 = vmul.f32 %v6493_v30, %v2121_v48  ;;  %v2926_v12 = vmul.f32 0.25, %v2234_v14 }
 0x9f2   :  { %v2407_v13 = vmul.f32 0.25, %v2125_v16  ;;  %v3919_v21 = vsel %vm2440_vm7, %v3918_v42, %v6536_v52  ;;  %v2238_v22 = vadd.f32 %v6539_v9, %v6480_v6  ;;  %v2127_v37 = vadd.f32 %v6547_v36, %v6484_v25 }
 0x9f3   :  { %v2240_v5 = vadd.f32 %v6549_v56, %v6487_v28  ;;  %v2467_v19 = vrot.slane %v2422_v10, 6  ;;  %v2626_v50 = vrot.slane %v2588_v8, 6  ;;  %v3612_v49 = vrot.slane %v2422_v10, 7 }
 0x9f4   :  { %v3730_v24 = vrot.slane %v2588_v8, 7  ;;  %v2934_v48 = vmul.f32 %v2926_v12, %v6490_v29  ;;  %v3089_v14 = vmul.f32 %v2926_v12, %v6493_v30  ;;  %v2415_v16 = vmul.f32 %v2407_v13, %v6490_v29 }
 0x9f5   :  { %v2581_v52 = vmul.f32 %v2407_v13, %v6493_v30  ;;  %v2468_v9 = vsel %vm2440_vm7, %v2467_v19, %v6565_v47  ;;  %v2627_v36 = vsel %vm2440_vm7, %v2626_v50, %v6585_v18  ;;  %v3613_v56 = vsel %vm2440_vm7, %v3612_v49, %v6561_v45 }
 0x9f6   :  { %v3731_v38 = vsel %vm2440_vm7, %v3730_v24, %v6568_v39  ;;  %v2959_v7 = vsel %vm2440_vm7, %v2934_v48, %v2958_v35  ;;  %v3114_v54 = vsel %vm2440_vm7, %v3089_v14, %v3113_v15  ;;  %v4007_v51 = vrot.slane %v2934_v48, 1 }
 0x9f7   :  { %v4122_v42 = vrot.slane %v3089_v14, 1  ;;  %v2442_v10 = vrot.slane %v2415_v16, 5  ;;  %v2606_v8 = vrot.slane %v2581_v52, 5  ;;  %v3600_v12 = vrot.slane %v2415_v16, 6 }
 0x9f8   :  { %v3718_v13 = vrot.slane %v2581_v52, 6  ;;  %v4008_v47 = vsel %vm2440_vm7, %v4007_v51, %v4006_v34  ;;  %v2573_v19 = vmul.f32 %v6490_v29, %v2238_v22  ;;  %v2727_v45 = vmul.f32 %v6493_v30, %v2238_v22 }
 0x9f9   :  { %v4123_v18 = vsel %vm2440_vm7, %v4122_v42, %v4121_v31  ;;  %v5860_v50 = vpop.eup %5859  ;;  %v2444_v39 = vsel %vm2443_vm8, %v2442_v10, %v2441_v20  ;;  %v2607_v35 = vsel %vm2443_vm8, %v2606_v8, %v2605_v44  ;;  %v3601_v15 = vsel %vm2443_vm8, %v3600_v12, %v3599_v63 }
 0x9fa   :  { %v3719_v49 = vsel %vm2443_vm8, %v3718_v13, %v3717_v53  ;;  %v7544_v24 = vsub.f32 1.0, %v6597_v55  ;;  %v2744_v14 = vrot.slane %v2727_v45, 5  ;;  %v2840_v34 = vrot.slane %v2573_v19, 5 }
 0x9fb   :  { %v3832_v16 = vrot.slane %v2727_v45, 6  ;;  %v3920_v31 = vrot.slane %v2573_v19, 6  ;;  %v2423_v52 = vmul.f32 %v6490_v29, %v2127_v37  ;;  %v2589_v22 = vmul.f32 %v6493_v30, %v2127_v37 }
 0x9fc   :  { %v1948_v48 = vmul.f32 %v5860_v50, %v7544_v24  ;;  %v2927_v51 = vmul.f32 0.25, %v2240_v5  ;;  %v2745_v44 = vsel %vm2443_vm8, %v2744_v14, %v2743_v3  ;;  %v2841_v63 = vsel %vm2443_vm8, %v2840_v34, %v2839_v17 }
 0x9fd   :  { %v3833_v53 = vsel %vm2443_vm8, %v3832_v16, %v3831_v32  ;;  %v3921_v55 = vsel %vm2443_vm8, %v3920_v31, %v3919_v21  ;;  %v2469_v42 = vrot.slane %v2423_v52, 5  ;;  %v2628_v10 = vrot.slane %v2589_v22, 5 }
 0x9fe   :  { %v1950_v20 = vadd.f32 %v6616_v41, %v1948_v48  ;;  %v3614_v8 = vrot.slane %v2423_v52, 6  ;;  %v3732_v12 = vrot.slane %v2589_v22, 6  ;;  %v2935_v37 = vmul.f32 %v2927_v51, %v6490_v29 }
 0x9ff   :  { %v3090_v5 = vmul.f32 %v2927_v51, %v6493_v30  ;;  %v2131_v41 = vadd.f32 %v6571_v33, %v6476_v4  ;;  %v2470_v3 = vsel %vm2443_vm8, %v2469_v42, %v2468_v9  ;;  %v2629_v17 = vsel %vm2443_vm8, %v2628_v10, %v2627_v36 }
 0xa00   :  { %1951 = vst.msk [vmem:[#allocation2 + $0x38] sm:$0xff] %vm51_vm0, %v1950_v20  ;;  %v3615_v32 = vsel %vm2443_vm8, %v3614_v8, %v3613_v56  ;;  %v2244_v21 = vadd.f32 %v6573_v2, %v6480_v6  ;;  %v3733_v13 = vsel %vm2443_vm8, %v3732_v12, %v3731_v38  ;;  %v2960_v19 = vrot.slane %v2935_v37, 7 }
 0xa01   :  { %v3115_v45 = vrot.slane %v3090_v5, 7  ;;  %v6695_v50 = vsel %vm2443_vm8, %v2935_v37, %v4008_v47  ;;  %v6698_v24 = vsel %vm2443_vm8, %v3090_v5, %v4123_v18  ;;  %v2408_v33 = vmul.f32 0.25, %v2131_v41 }
 0xa02   :  { %v2574_v9 = vmul.f32 %v6490_v29, %v2244_v21  ;;  %v2728_v36 = vmul.f32 %v6493_v30, %v2244_v21  ;;  %v2961_v56 = vsel %vm2443_vm8, %v2960_v19, %v2959_v7  ;;  %v2133_v2 = vadd.f32 %v6579_v43, %v6484_v25 }
 0xa03   :  { %v3116_v48 = vsel %vm2443_vm8, %v3115_v45, %v3114_v54  ;;  %v2246_v38 = vadd.f32 %v6581_v27, %v6487_v28  ;;  %v2416_v47 = vmul.f32 %v2408_v33, %v6490_v29  ;;  %v2582_v18 = vmul.f32 %v2408_v33, %v6493_v30 }
 0xa04   :  { %v2746_v14 = vrot.slane %v2728_v36, 4  ;;  %v2842_v34 = vrot.slane %v2574_v9, 4  ;;  %v3834_v16 = vrot.slane %v2728_v36, 5  ;;  %v3922_v31 = vrot.slane %v2574_v9, 5 }
 0xa05   :  { %v2424_v52 = vmul.f32 %v6490_v29, %v2133_v2  ;;  %v2590_v7 = vmul.f32 %v6493_v30, %v2133_v2  ;;  %v2445_v22 = vrot.slane %v2416_v47, 4  ;;  %v2608_v54 = vrot.slane %v2582_v18, 4 }
 0xa06   :  { %v3602_v51 = vrot.slane %v2416_v47, 5  ;;  %v3720_v20 = vrot.slane %v2582_v18, 5  ;;  %v6715_v27 = vsel %vm2446_vm9, %v2746_v14, %v2745_v44  ;;  %v6718_v42 = vsel %vm2446_vm9, %v2842_v34, %v2841_v63 }
 0xa07   :  { %v6712_v43 = vld [vmem:[#allocation2 + $0x38] sm:$0xff]  ;;  %v6721_v10 = vsel %vm2446_vm9, %v3834_v16, %v3833_v53  ;;  %v6724_v8 = vsel %vm2446_vm9, %v3922_v31, %v3921_v55  ;;  %v2447_v12 = vsel %vm2446_vm9, %v2445_v22, %v2444_v39  ;;  %v2609_v37 = vsel %vm2446_vm9, %v2608_v54, %v2607_v35 }
 0xa08   :  { %4954 = vmatmul.mubr.msk.f32.gmra.mrb[38].mxu1 %vm51_vm0, %v6712_v43  ;;  %v3603_v5 = vsel %vm2446_vm9, %v3602_v51, %v3601_v15  ;;  %v3721_v44 = vsel %vm2446_vm9, %v3720_v20, %v3719_v49  ;;  %4962 = vmatmul.mubr.msk.f32.gmra.mrb[46].mxu0 %vm51_vm0, %v6712_v43  ;;  %v2471_v63 = vrot.slane %v2424_v52, 4  ;;  %v2630_v53 = vrot.slane %v2590_v7, 4 }
 0xa09   :  { %v3616_v41 = vrot.slane %v2424_v52, 5  ;;  %v3734_v21 = vrot.slane %v2590_v7, 5  ;;  %v7545_v55 = vmov 0.0   ;;  %v2928_v39 = vmul.f32 0.25, %v2246_v38 }
 0xa0a   :  { %2330 = vmatprep.mubr.f32.mxu1 %v7545_v55  ;;  %5330 = vmatprep.mubr.msk.f32.mxu0 %vm5919_vm1, %v7545_v55  ;;  %v2137_v35 = vadd.f32 %v6593_v46, %v6476_v4  ;;  %v2250_v15 = vadd.f32 %v6595_v40, %v6480_v6  ;;  %v2139_v49 = vadd.f32 %v6609_v58, %v6484_v25 }
 0xa0b   :  { %v2472_v19 = vsel %vm2446_vm9, %v2471_v63, %v2470_v3  ;;  %v2631_v45 = vsel %vm2446_vm9, %v2630_v53, %v2629_v17  ;;  %v3617_v33 = vsel %vm2446_vm9, %v3616_v41, %v3615_v32  ;;  %v3735_v9 = vsel %vm2446_vm9, %v3734_v21, %v3733_v13 }
 0xa0c   :  { %4963 = vmatmul.mubr.msk.f32.vlgmr.msra.gmra.mrb[40].mxu1 %vm51_vm0, %v6379_v57  ;;  %v2936_v36 = vmul.f32 %v2928_v39, %v6490_v29  ;;  %v3091_v46 = vmul.f32 %v2928_v39, %v6493_v30  ;;  %v2409_v2 = vmul.f32 0.25, %v2137_v35  ;;  %v6752_v40 = vmul.f32 %v6490_v29, %v2250_v15 }
 0xa0d   :  { %2336 = vmatprep.mubr.f32.mxu1 %v7545_v55  ;;  %v6756_v58 = vmul.f32 %v6493_v30, %v2250_v15  ;;  %v2425_v3 = vmul.f32 %v6490_v29, %v2139_v49  ;;  %v2591_v17 = vmul.f32 %v6493_v30, %v2139_v49  ;;  %v2252_v57 = vadd.f32 %v6611_v60, %v6487_v28 }
 0xa0e   :  { %v2962_v32 = vrot.slane %v2936_v36, 6  ;;  %v3117_v13 = vrot.slane %v3091_v46, 6  ;;  %v4010_v38 = vrot.slane %v2936_v36, 7  ;;  %v4125_v47 = vrot.slane %v3091_v46, 7 }
 0xa0f   :  { %v2417_v18 = vmul.f32 %v2409_v2, %v6490_v29  ;;  %v2583_v14 = vmul.f32 %v2409_v2, %v6493_v30  ;;  %v2748_v34 = vrot.slane %v6756_v58, 3  ;;  %v2844_v16 = vrot.slane %v6752_v40, 3 }
 0xa10   :  { %4964 = vmatmul.mubr.msk.f32.gmra.mrb[42].mxu1 %vm51_vm0, %v6387_v59  ;;  %v2963_v31 = vsel %vm2446_vm9, %v2962_v32, %v2961_v56  ;;  %v3118_v52 = vsel %vm2446_vm9, %v3117_v13, %v3116_v48  ;;  %v4011_v60 = vsel %vm2446_vm9, %v4010_v38, %v6695_v50  ;;  %v4126_v7 = vsel %vm2446_vm9, %v4125_v47, %v6698_v24 }
 0xa11   :  { %2342 = vmatprep.mubr.f32.mxu1 %v7545_v55  ;;  %v2448_v22 = vrot.slane %v2417_v18, 3  ;;  %v2610_v54 = vrot.slane %v2583_v14, 3  ;;  %v3604_v51 = vrot.slane %v2417_v18, 4  ;;  %v3722_v20 = vrot.slane %v2583_v14, 4 }
 0xa12   :  { %v3836_v63 = vrot.slane %v6756_v58, 4  ;;  %v3924_v59 = vrot.slane %v6752_v40, 4  ;;  %v2473_v53 = vrot.slane %v2425_v3, 3  ;;  %v2632_v56 = vrot.slane %v2591_v17, 3 }
 0xa13   :  { %v2450_v48 = vsel %vm2449_vm10, %v2448_v22, %v2447_v12  ;;  %v2611_v41 = vsel %vm2449_vm10, %v2610_v54, %v2609_v37  ;;  %v6780_v50 = vsel %vm2449_vm10, %v3604_v51, %v3603_v5  ;;  %v6783_v24 = vsel %vm2449_vm10, %v3722_v20, %v3721_v44 }
 0xa14   :  { %4965 = vmatmul.mubr.msk.f32.gmra.mrb[44].mxu1 %vm51_vm0, %v6395_v61  ;;  %v2474_v21 = vsel %vm2449_vm10, %v2473_v53, %v2472_v19  ;;  %v2633_v39 = vsel %vm2449_vm10, %v2632_v56, %v2631_v45  ;;  %v3618_v35 = vrot.slane %v2425_v3, 4  ;;  %v3736_v15 = vrot.slane %v2591_v17, 4 }
 0xa15   :  { %2348 = vmatprep.mubr.f32.mxu1 %v7545_v55  ;;  %v2929_v12 = vmul.f32 0.25, %v2252_v57  ;;  %v2143_v37 = vadd.f32 %v6623_v11, %v6476_v4  ;;  %v2256_v5 = vadd.f32 %v6625_v1, %v6480_v6  ;;  %v2145_v44 = vadd.f32 %v6632_v26, %v6484_v25 }
 0xa16   :  { %v3619_v61 = vsel %vm2449_vm10, %v3618_v35, %v3617_v33  ;;  %v3737_v49 = vsel %vm2449_vm10, %v3736_v15, %v3735_v9  ;;  %v2258_v19 = vadd.f32 %v6634_v23, %v6487_v28  ;;  %v2749_v45 = vsel %vm2449_vm10, %v2748_v34, %v6715_v27 }
 0xa17   :  { %v2937_v36 = vmul.f32 %v2929_v12, %v6490_v29  ;;  %v3092_v11 = vmul.f32 %v2929_v12, %v6493_v30  ;;  %v2410_v46 = vmul.f32 0.25, %v2143_v37  ;;  %v2576_v1 = vmul.f32 %v6490_v29, %v2256_v5 }
 0xa18   :  { %4966 = vmatmul.mubr.msk.f32.gmra.mrb[46].mxu1 %vm51_vm0, %v6403_v62  ;;  %v2730_v26 = vmul.f32 %v6493_v30, %v2256_v5  ;;  %v2426_v33 = vmul.f32 %v6490_v29, %v2145_v44  ;;  %v2592_v9 = vmul.f32 %v6493_v30, %v2145_v44  ;;  %v2930_v23 = vmul.f32 0.25, %v2258_v19 }
 0xa19   :  { %2354 = vmatprep.mubr.f32.mxu1 %v7545_v55  ;;  %v2964_v27 = vrot.slane %v2937_v36, 5  ;;  %v3119_v2 = vrot.slane %v3092_v11, 5  ;;  %v4012_v3 = vrot.slane %v2937_v36, 6  ;;  %v4127_v17 = vrot.slane %v3092_v11, 6 }
 0xa1a   :  { %v2418_v57 = vmul.f32 %v2410_v46, %v6490_v29  ;;  %v2584_v32 = vmul.f32 %v2410_v46, %v6493_v30  ;;  %v2750_v13 = vrot.slane %v2730_v26, 2  ;;  %v2846_v38 = vrot.slane %v2576_v1, 2 }
 0xa1b   :  { %v2965_v62 = vsel %vm2449_vm10, %v2964_v27, %v2963_v31  ;;  %v3120_v47 = vsel %vm2449_vm10, %v3119_v2, %v3118_v52  ;;  %v4013_v18 = vsel %vm2449_vm10, %v4012_v3, %v4011_v60  ;;  %v4128_v14 = vsel %vm2449_vm10, %v4127_v17, %v4126_v7  ;;  %v7549_v3 = vld [vmem:[#allocation13_spill] sm:$0xff] }
 0xa1c   :  { %4967 = vmatmul.mubr.msk.f32.gmra.mrb[48].mxu1 %vm51_vm0, %v6411_v0  ;;  %v2451_v34 = vrot.slane %v2418_v57, 2  ;;  %v2612_v22 = vrot.slane %v2584_v32, 2  ;;  %v3606_v54 = vrot.slane %v2418_v57, 3  ;;  %v3724_v51 = vrot.slane %v2584_v32, 3  ;;  %v7546_v0 = vld [vmem:[#allocation10_spill] sm:$0xff] }
 0xa1d   :  { %2360 = vmatprep.mubr.f32.mxu1 %v7545_v55  ;;  %v3838_v20 = vrot.slane %v2730_v26, 3  ;;  %v3926_v53 = vrot.slane %v2576_v1, 3  ;;  %v2475_v56 = vrot.slane %v2426_v33, 2  ;;  %v2634_v35 = vrot.slane %v2592_v9, 2  ;;  %v7547_v26 = vld [vmem:[#allocation11_spill] sm:$0xff] }
 0xa1e   :  { %v6821_v31 = vsel %vm2452_vm11, %v2451_v34, %v2450_v48  ;;  %v3620_v52 = vrot.slane %v2426_v33, 3  ;;  %v3738_v60 = vrot.slane %v2592_v9, 3  ;;  %v2938_v7 = vmul.f32 %v2930_v23, %v6490_v29 }
 0xa1f   :  { %v3093_v15 = vmul.f32 %v2930_v23, %v6493_v30  ;;  %v6828_v12 = vsel %vm2452_vm11, %v2475_v56, %v2474_v21  ;;  %v6831_v37 = vsel %vm2452_vm11, %v2634_v35, %v2633_v39  ;;  %v6834_v5 = vsel %vm2452_vm11, %v2612_v22, %v2611_v41 }
 0xa20   :  { %4968 = vmatmul.mubr.msk.f32.gmra.mrb[50].mxu1 %vm51_vm0, %v7546_v0  ;;  %v2966_v48 = vrot.slane %v2938_v7, 4  ;;  %v4014_v44 = vrot.slane %v2938_v7, 5  ;;  %v6838_v19 = vsel %vm2452_vm11, %v2750_v13, %v2749_v45  ;;  %v2845_v36 = vsel %vm2449_vm10, %v2844_v16, %v6718_v42 }
 0xa21   :  { %2366 = vmatprep.mubr.f32.mxu1 %v7545_v55  ;;  %v3121_v21 = vrot.slane %v3093_v15, 4  ;;  %v4129_v11 = vrot.slane %v3093_v15, 5  ;;  %v6845_v39 = vsel %vm2452_vm11, %v2846_v38, %v2845_v36  ;;  %v6848_v41 = vsel %vm2452_vm11, %v3620_v52, %v3619_v61 }
 0xa22   :  { %v6851_v46 = vsel %vm2452_vm11, %v2966_v48, %v2965_v62  ;;  %v6855_v45 = vsel %vm2452_vm11, %v3606_v54, %v6780_v50  ;;  %v6858_v1 = vsel %vm2452_vm11, %v3738_v60, %v3737_v49  ;;  %v6862_v42 = vsel %vm2452_vm11, %v3724_v51, %v6783_v24 }
 0xa23   :  { %v6865_v16 = vsel %vm2452_vm11, %v3121_v21, %v3120_v47  ;;  %v6870_v61 = vsel %vm2452_vm11, %v4014_v44, %v4013_v18  ;;  %v6873_v33 = vsel %vm2452_vm11, %v4129_v11, %v4128_v14  ;;  %v3837_v50 = vsel %vm2449_vm10, %v3836_v63, %v6721_v10  ;;  %v7548_v10 = vld [vmem:[#allocation7_spill] sm:$0xff] }
 0xa24   :  { %4969 = vmatmul.mubr.msk.f32.gmra.mrb[52].mxu1 %vm51_vm0, %v7547_v26  ;;  %v6881_v24 = vsel %vm2452_vm11, %v3838_v20, %v3837_v50  ;;  %v3925_v49 = vsel %vm2449_vm10, %v3924_v59, %v6724_v8  ;;  %v2004_v58 = vsub.s32 4, %v7548_v10  ;;  %v2008_v63 = vsub.s32 5, %v7548_v10 }
 0xa25   :  { %2372 = vmatprep.mubr.f32.mxu1 %v7545_v55  ;;  %v6888_v9 = vsel %vm2452_vm11, %v3926_v53, %v3925_v49 }
 0xa26   :  { %v6898_v8 = vrot.slane %v7549_v3, %v2004_v58  ;;  %v6904_v13 = vrot.slane %v7549_v3, %v2008_v63 }
 0xa28   :  { %4970 = vmatmul.mubr.msk.f32.gmra.mrb[54].mxu1 %vm51_vm0, %v6712_v43 }
 0xa29   :  { %5355 = vmatprep.mubr.msk.f32.mxu1 %vm5919_vm1, %v7545_v55 }
 0xadb   :  { %v2148_v23 = vpop.f32.mrb[38].mxu1  ;;  %v2261_v2 = vpop.f32.mrb[46].mxu0 }
 0xadc   :  { %v2149_v27 = vadd.f32 %v2148_v23, %v6476_v4  ;;  %v2150_v40 = vpop.f32.mrb[39].mxu1  ;;  %v2262_v59 = vadd.f32 %v2261_v2, %v6480_v6  ;;  %v2263_v43 = vpop.f32.mrb[47].mxu0 }
 0xadd   :  { %v2151_v17 = vadd.f32 %v2150_v40, %v6484_v25  ;;  %v2264_v32 = vadd.f32 %v2263_v43, %v6487_v28 }
 0xade   :  { %v2411_v57 = vmul.f32 0.25, %v2149_v27  ;;  %v6907_v38 = vmul.f32 %v6490_v29, %v2262_v59  ;;  %v6910_v4 = vmul.f32 %v6493_v30, %v2262_v59 }
 0xadf   :  { %v6913_v62 = vmul.f32 %v6490_v29, %v2151_v17  ;;  %v6916_v6 = vmul.f32 %v6493_v30, %v2151_v17  ;;  %v2332_v25 = vpop.f32.mrb[40].mxu1  ;;  %v2931_v18 = vmul.f32 0.25, %v2264_v32 }
 0xae0   :  { %v6919_v47 = vmul.f32 %v2411_v57, %v6490_v29  ;;  %v6922_v28 = vmul.f32 %v2411_v57, %v6493_v30  ;;  %v2333_v14 = vadd.f32 %v2332_v25, %v6898_v8  ;;  %v2334_v34 = vpop.f32.mrb[41].mxu1  ;;  %v2752_v22 = vrot.slane %v6910_v4, 1 }
 0xae1   :  { %v2848_v54 = vrot.slane %v6907_v38, 1  ;;  %v2477_v60 = vrot.slane %v6913_v62, 1  ;;  %v2636_v7 = vrot.slane %v6916_v6, 1  ;;  %v6938_v44 = vmul.f32 %v2931_v18, %v6490_v29 }
 0xae2   :  { %v2454_v53 = vrot.slane %v6919_v47, 1  ;;  %v2614_v56 = vrot.slane %v6922_v28, 1  ;;  %v6941_v36 = vmul.f32 %v2931_v18, %v6493_v30  ;;  %v2940_v21 = vmul.f32 %v6490_v29, %v2333_v14 }
 0xae3   :  { %v2338_v48 = vpop.f32.mrb[42].mxu1  ;;  %v3095_v11 = vmul.f32 %v6493_v30, %v2333_v14  ;;  %v2335_v50 = vadd.f32 %v2334_v34, %v6904_v13  ;;  %v2478_v63 = vsel %vm2455_vm12, %v2477_v60, %v6828_v12  ;;  %v2968_v23 = vrot.slane %v6938_v44, 3 }
 0xae4   :  { %v2340_v26 = vpop.f32.mrb[43].mxu1  ;;  %v2339_v49 = vadd.f32 %v2338_v48, %v6898_v8  ;;  %v3123_v27 = vrot.slane %v6941_v36, 3  ;;  %5329 = vmatpush3.xpose.msk.msra.mxu0 %vm51_vm0, %v2478_v63  ;;  %v2978_v3 = vrot.slane %v2940_v21, 2  ;;  %v4018_v17 = vrot.slane %v2940_v21, 3 }
 0xae5   :  { %v2341_v58 = vadd.f32 %v2340_v26, %v6904_v13  ;;  %v3133_v59 = vrot.slane %v3095_v11, 2  ;;  %v4133_v43 = vrot.slane %v3095_v11, 3  ;;  %5333 = vmatprep.subr.mxu0 %v7545_v55  ;;  %v3079_v32 = vmul.f32 %v6490_v29, %v2335_v50 }
 0xae6   :  { %v3234_v12 = vmul.f32 %v6493_v30, %v2335_v50  ;;  %v2941_v25 = vmul.f32 %v6490_v29, %v2339_v49  ;;  %v3096_v18 = vmul.f32 %v6493_v30, %v2339_v49  ;;  %v2456_v21 = vsel %vm2455_vm12, %v2454_v53, %v6821_v31 }
 0xae7   :  { %v2344_v57 = vpop.f32.mrb[44].mxu1  ;;  %v3080_v34 = vmul.f32 %v6490_v29, %v2341_v58  ;;  %v3235_v60 = vmul.f32 %v6493_v30, %v2341_v58  ;;  %v3346_v26 = vrot.slane %v3079_v32, 2  ;;  %v4322_v20 = vrot.slane %v3079_v32, 3  ;;  %5331 = vmatmul.mubr.msk.f32.vlgmr.msra.gmra.mrb[48].mxu0 %vm51_vm0, %v2456_v21 }
 0xae8   :  { %v2346_v14 = vpop.f32.mrb[45].mxu1  ;;  %v2345_v48 = vadd.f32 %v2344_v57, %v6898_v8  ;;  %v3250_v11 = vrot.slane %v3234_v12, 2  ;;  %v4234_v63 = vrot.slane %v3234_v12, 3  ;;  %v2979_v50 = vrot.slane %v2941_v25, 1  ;;  %5335 = vmatprep.mubr.msk.f32.mxu0 %vm5919_vm1, %v7545_v55 }
 0xae9   :  { %v3134_v51 = vrot.slane %v3096_v18, 1  ;;  %v4019_v40 = vrot.slane %v2941_v25, 2  ;;  %v4134_v49 = vrot.slane %v3096_v18, 2  ;;  %v3251_v58 = vrot.slane %v3235_v60, 1 }
 0xaea   :  { %v3347_v52 = vrot.slane %v3080_v34, 1  ;;  %v4235_v57 = vrot.slane %v3235_v60, 2  ;;  %v4323_v0 = vrot.slane %v3080_v34, 2  ;;  %v2980_v31 = vsel %vm2437_vm6, %v2979_v50, %v2978_v3 }
 0xaeb   :  { %v2350_v2 = vpop.f32.mrb[46].mxu1  ;;  %v3135_v53 = vsel %vm2437_vm6, %v3134_v51, %v3133_v59  ;;  %v4020_v32 = vsel %vm2437_vm6, %v4019_v40, %v4018_v17  ;;  %v4135_v12 = vsel %vm2437_vm6, %v4134_v49, %v4133_v43  ;;  %v3252_v25 = vsel %vm2437_vm6, %v3251_v58, %v3250_v11 }
 0xaec   :  { %v2352_v35 = vpop.f32.mrb[47].mxu1  ;;  %v3348_v18 = vsel %vm2437_vm6, %v3347_v52, %v3346_v26  ;;  %v4236_v21 = vsel %vm2437_vm6, %v4235_v57, %v4234_v63  ;;  %v4324_v15 = vsel %vm2437_vm6, %v4323_v0, %v4322_v20  ;;  %v2942_v60 = vmul.f32 %v6490_v29, %v2345_v48 }
 0xaed   :  { %v3097_v34 = vmul.f32 %v6493_v30, %v2345_v48  ;;  %v2347_v3 = vadd.f32 %v2346_v14, %v6904_v13  ;;  %v2637_v51 = vsel %vm2455_vm12, %v2636_v7, %v6831_v37  ;;  %v2351_v59 = vadd.f32 %v2350_v2, %v6898_v8 }
 0xaee   :  { %5334 = vmatpush3.xpose.msk.msra.mxu0 %vm51_vm0, %v2637_v51  ;;  %v2615_v52 = vsel %vm2455_vm12, %v2614_v56, %v6834_v5  ;;  %v2353_v20 = vadd.f32 %v2352_v35, %v6904_v13  ;;  %v2753_v0 = vsel %vm2455_vm12, %v2752_v22, %v6838_v19  ;;  %v2981_v37 = vsel %vm2440_vm7, %v2942_v60, %v2980_v31 }
 0xaef   :  { %v2356_v40 = vpop.f32.mrb[48].mxu1  ;;  %v3136_v7 = vsel %vm2440_vm7, %v3097_v34, %v3135_v53  ;;  %v4021_v43 = vrot.slane %v2942_v60, 1  ;;  %v4136_v14 = vrot.slane %v3097_v34, 1  ;;  %5338 = vmatprep.subr.mxu0 %v7545_v55  ;;  %v3081_v2 = vmul.f32 %v6490_v29, %v2347_v3 }
 0xaf0   :  { %v2358_v17 = vpop.f32.mrb[49].mxu1  ;;  %v3236_v5 = vmul.f32 %v6493_v30, %v2347_v3  ;;  %v2943_v56 = vmul.f32 %v6490_v29, %v2351_v59  ;;  %v3098_v35 = vmul.f32 %v6493_v30, %v2351_v59  ;;  %v3082_v22 = vmul.f32 %v6490_v29, %v2353_v20 }
 0xaf1   :  { %v4022_v48 = vsel %vm2440_vm7, %v4021_v43, %v4020_v32  ;;  %v4137_v19 = vsel %vm2440_vm7, %v4136_v14, %v4135_v12  ;;  %5336 = vmatmul.mubr.msk.f32.vlgmr.msra.gmra.mrb[50].mxu0 %vm51_vm0, %v2615_v52  ;;  %v3237_v11 = vmul.f32 %v6493_v30, %v2353_v20  ;;  %v3349_v50 = vsel %vm2440_vm7, %v3081_v2, %v3348_v18 }
 0xaf2   :  { %v3253_v63 = vsel %vm2440_vm7, %v3236_v5, %v3252_v25  ;;  %v4237_v49 = vrot.slane %v3236_v5, 1  ;;  %v4325_v58 = vrot.slane %v3081_v2, 1  ;;  %5339 = vmatpush3.msra.mxu0 %v2753_v0  ;;  %5340 = vmatprep.mubr.msk.f32.mxu0 %vm5919_vm1, %v7545_v55  ;;  %v2982_v31 = vrot.slane %v2943_v56, 7 }
 0xaf3   :  { %v2362_v26 = vpop.f32.mrb[50].mxu1  ;;  %v3137_v53 = vrot.slane %v3098_v35, 7  ;;  %v4023_v32 = vsel %vm2443_vm8, %v2943_v56, %v4022_v48  ;;  %v4138_v12 = vsel %vm2443_vm8, %v3098_v35, %v4137_v19  ;;  %5343 = vmatprep.subr.mxu0 %v7545_v55  ;;  %v3254_v18 = vrot.slane %v3237_v11, 7 }
 0xaf4   :  { %v2364_v57 = vpop.f32.mrb[51].mxu1  ;;  %v4238_v60 = vsel %vm2440_vm7, %v4237_v49, %v4236_v21  ;;  %v4326_v25 = vsel %vm2440_vm7, %v4325_v58, %v4324_v15  ;;  %v3350_v34 = vrot.slane %v3082_v22, 7  ;;  %v2983_v3 = vsel %vm2443_vm8, %v2982_v31, %v2981_v37 }
 0xaf5   :  { %v3138_v51 = vsel %vm2443_vm8, %v3137_v53, %v3136_v7  ;;  %v4239_v59 = vsel %vm2443_vm8, %v3237_v11, %v4238_v60  ;;  %v4327_v52 = vsel %vm2443_vm8, %v3082_v22, %v4326_v25  ;;  %v3255_v0 = vsel %vm2443_vm8, %v3254_v18, %v3253_v63 }
 0xaf6   :  { %v3351_v43 = vsel %vm2443_vm8, %v3350_v34, %v3349_v50  ;;  %v2357_v14 = vadd.f32 %v2356_v40, %v6898_v8  ;;  %v2359_v21 = vadd.f32 %v2358_v17, %v6904_v13  ;;  %v2363_v2 = vadd.f32 %v2362_v26, %v6898_v8 }
 0xaf7   :  { %v2368_v20 = vpop.f32.mrb[52].mxu1  ;;  %v2365_v37 = vadd.f32 %v2364_v57, %v6904_v13 }
 0xaf8   :  { %v2370_v15 = vpop.f32.mrb[53].mxu1  ;;  %v2369_v7 = vadd.f32 %v2368_v20, %v6898_v8  ;;  %v2944_v56 = vmul.f32 %v6490_v29, %v2357_v14  ;;  %v3099_v35 = vmul.f32 %v6493_v30, %v2357_v14  ;;  %v3083_v48 = vmul.f32 %v6490_v29, %v2359_v21 }
 0xaf9   :  { %v2371_v5 = vadd.f32 %v2370_v15, %v6904_v13  ;;  %v3238_v19 = vmul.f32 %v6493_v30, %v2359_v21  ;;  %v2945_v40 = vmul.f32 %v6490_v29, %v2363_v2  ;;  %v3100_v17 = vmul.f32 %v6493_v30, %v2363_v2 }
 0xafa   :  { %v7032_v22 = vmul.f32 %v6490_v29, %v2365_v37  ;;  %v7035_v11 = vmul.f32 %v6493_v30, %v2365_v37  ;;  %v2984_v63 = vrot.slane %v2944_v56, 6  ;;  %v3139_v50 = vrot.slane %v3099_v35, 6 }
 0xafb   :  { %v2374_v26 = vpop.f32.mrb[54].mxu1  ;;  %v4024_v49 = vrot.slane %v2944_v56, 7  ;;  %v4139_v58 = vrot.slane %v3099_v35, 7  ;;  %v3256_v31 = vrot.slane %v3238_v19, 6  ;;  %v3352_v53 = vrot.slane %v3083_v48, 6 }
 0xafc   :  { %v2376_v57 = vpop.f32.mrb[55].mxu1  ;;  %v4240_v60 = vrot.slane %v3238_v19, 7  ;;  %v4328_v25 = vrot.slane %v3083_v48, 7  ;;  %v2985_v18 = vsel %vm2446_vm9, %v2984_v63, %v2983_v3  ;;  %v3140_v34 = vsel %vm2446_vm9, %v3139_v50, %v3138_v51 }
 0xafd   :  { %v4025_v20 = vsel %vm2446_vm9, %v4024_v49, %v4023_v32  ;;  %v4140_v14 = vsel %vm2446_vm9, %v4139_v58, %v4138_v12  ;;  %v3257_v21 = vsel %vm2446_vm9, %v3256_v31, %v3255_v0  ;;  %v3353_v15 = vsel %vm2446_vm9, %v3352_v53, %v3351_v43 }
 0xafe   :  { %v7044_v2 = vsel %vm2446_vm9, %v4240_v60, %v4239_v59  ;;  %v7047_v37 = vsel %vm2446_vm9, %v4328_v25, %v4327_v52  ;;  %v2986_v56 = vrot.slane %v2945_v40, 5  ;;  %v3141_v35 = vrot.slane %v3100_v17, 5 }
 0xaff   :  { %v4026_v48 = vrot.slane %v2945_v40, 6  ;;  %v4141_v3 = vrot.slane %v3100_v17, 6  ;;  %v3258_v51 = vrot.slane %v7035_v11, 5  ;;  %v3354_v32 = vrot.slane %v7032_v22, 5 }
 0xb00   :  { %v4242_v12 = vrot.slane %v7035_v11, 6  ;;  %v4330_v0 = vrot.slane %v7032_v22, 6  ;;  %v2987_v43 = vsel %vm2449_vm10, %v2986_v56, %v2985_v18  ;;  %v3142_v59 = vsel %vm2449_vm10, %v3141_v35, %v3140_v34 }
 0xb01   :  { %v4027_v19 = vsel %vm2449_vm10, %v4026_v48, %v4025_v20  ;;  %v4142_v52 = vsel %vm2449_vm10, %v4141_v3, %v4140_v14  ;;  %v2946_v63 = vmul.f32 %v6490_v29, %v2369_v7  ;;  %v3101_v40 = vmul.f32 %v6493_v30, %v2369_v7 }
 0xb02   :  { %v3085_v17 = vmul.f32 %v6490_v29, %v2371_v5  ;;  %v3240_v50 = vmul.f32 %v6493_v30, %v2371_v5  ;;  %v2375_v11 = vadd.f32 %v2374_v26, %v6898_v8  ;;  %v2377_v49 = vadd.f32 %v2376_v57, %v6904_v13 }
 0xb03   :  { %v3124_v58 = vsel %vm2455_vm12, %v3123_v27, %v6865_v16  ;;  %v7071_v31 = vsel %vm2455_vm12, %v2848_v54, %v6845_v39  ;;  %v2988_v7 = vrot.slane %v2946_v63, 4  ;;  %v3143_v53 = vrot.slane %v3101_v40, 4 }
 0xb04   :  { %v4028_v60 = vrot.slane %v2946_v63, 5  ;;  %v4143_v25 = vrot.slane %v3101_v40, 5  ;;  %v3260_v5 = vrot.slane %v3240_v50, 4  ;;  %v3356_v18 = vrot.slane %v3085_v17, 4 }
 0xb05   :  { %v4244_v8 = vrot.slane %v3240_v50, 5  ;;  %v4332_v26 = vrot.slane %v3085_v17, 5  ;;  %v2947_v13 = vmul.f32 %v6490_v29, %v2375_v11  ;;  %v3102_v57 = vmul.f32 %v6493_v30, %v2375_v11 }
 0xb06   :  { %v3086_v16 = vmul.f32 %v6490_v29, %v2377_v49  ;;  %v3241_v27 = vmul.f32 %v6493_v30, %v2377_v49  ;;  %v3144_v34 = vsel %vm2452_vm11, %v3143_v53, %v3142_v59  ;;  %v2989_v39 = vsel %vm2452_vm11, %v2988_v7, %v2987_v43 }
 0xb07   :  { %v7083_v54 = vsel %vm2455_vm12, %v2968_v23, %v6851_v46  ;;  %v3259_v20 = vsel %vm2449_vm10, %v3258_v51, %v3257_v21  ;;  %v2990_v14 = vrot.slane %v2947_v13, 3  ;;  %v3145_v56 = vrot.slane %v3102_v57, 3 }
 0xb08   :  { %v4030_v35 = vrot.slane %v2947_v13, 4  ;;  %v4145_v48 = vrot.slane %v3102_v57, 4  ;;  %v3262_v3 = vrot.slane %v3241_v27, 3  ;;  %v3358_v29 = vrot.slane %v3086_v16, 3 }
 0xb09   :  { %v4246_v63 = vrot.slane %v3241_v27, 4  ;;  %v4334_v30 = vrot.slane %v3086_v16, 4  ;;  %v3146_v59 = vsel %vm2455_vm12, %v3145_v56, %v3144_v34  ;;  %v7088_v43 = vsel %vm2455_vm12, %v2990_v14, %v2989_v39 }
 0xb0a   :  { %v3261_v40 = vsel %vm2452_vm11, %v3260_v5, %v3259_v20  ;;  %v3355_v46 = vsel %vm2449_vm10, %v3354_v32, %v3353_v15  ;;  %5354 = vmatpush3.xpose.msk.msra.mxu1 %vm51_vm0, %v3146_v59  ;;  %v7550_v51 = vrot.slane %v6913_v62, 2  ;;  %v7551_v50 = vrot.slane %v6919_v47, 2 }
 0xb0b   :  { %v7094_v23 = vsel %vm2455_vm12, %v3262_v3, %v3261_v40  ;;  %v3357_v21 = vsel %vm2452_vm11, %v3356_v18, %v3355_v46  ;;  %v7552_v32 = vmov 0.0|0.0   ;;  %v7553_v49 = vrot.slane %v6916_v6, 2 }
 0xb0c   :  { %v7101_v17 = vsel %vm2455_vm12, %v7550_v51, %v6848_v41  ;;  %v7107_v11 = vsel %vm2455_vm12, %v7551_v50, %v6855_v45  ;;  %v7110_v15 = vsel %vm2455_vm12, %v3358_v29, %v3357_v21  ;;  %5631 = vmatprep.subr.bf16.mxu1 %v7552_v32  ;;  %v7554_v41 = vrot.slane %v6922_v28, 2  ;;  %v2393_v51 = vld [vmem:[%s7517_s4 + $0x68] sm:$0xff]  ;;  %v2394_v50 = vld [vmem:[%s7517_s4 + $0xf8] sm:$0xff] }
 0xb0d   :  { %v7117_v7 = vsel %vm2455_vm12, %v7553_v49, %v6858_v1  ;;  %v4029_v45 = vsel %vm2452_vm11, %v4028_v60, %v4027_v19  ;;  %v7555_v53 = vrot.slane %v6938_v44, 4  ;;  %v4144_v1 = vsel %vm2452_vm11, %v4143_v25, %v4142_v52  ;;  %5356 = vmatmul.mubr.msk.f32.vlgmr.msra.gmra.mrb[56].mxu1 %vm51_vm0, %v3124_v58  ;;  %v2395_v49 = vld [vmem:[%s7517_s4 + $0x188] sm:$0xff] }
 0xb0e   :  { %v7123_v62 = vsel %vm2455_vm12, %v7554_v41, %v6862_v42  ;;  %v7127_v47 = vsel %vm2455_vm12, %v4030_v35, %v4029_v45  ;;  %v7556_v6 = vrot.slane %v6941_v36, 4  ;;  %v7144_v42 = vsel %vm2455_vm12, %v4145_v48, %v4144_v1  ;;  %5376 = vmatprep.mubr.msk.f32.mxu1 %vm5919_vm1, %v7545_v55  ;;  %v2396_v45 = vld [vmem:[%s7517_s4 + $0x218] sm:$0xff] }
 0xb0f   :  { %v7133_v5 = vsel %vm2455_vm12, %v7555_v53, %v6870_v61  ;;  %v7557_v19 = vrot.slane %v6910_v4, 2  ;;  %v7558_v61 = vrot.slane %v6907_v38, 2  ;;  %v5632_v41 = vpack.c.bf16 %v2394_v50, %v2393_v51 }
 0xb10   :  { %v7140_v28 = vsel %vm2455_vm12, %v7556_v6, %v6873_v33  ;;  %v4243_v33 = vsel %vm2449_vm10, %v4242_v12, %v7044_v2  ;;  %v7177_v12 = vld [vmem:[%s7514_s1] ss:$0 sm:$0xff]  ;;  %v5635_v53 = vpack.c.bf16 %v2396_v45, %v2395_v49 }
 0xb11   :  { %v7150_v44 = vsel %vm2455_vm12, %v7557_v19, %v6881_v24  ;;  %v7156_v52 = vsel %vm2455_vm12, %v7558_v61, %v6888_v9  ;;  %v4245_v36 = vsel %vm2452_vm11, %v4244_v8, %v4243_v33  ;;  %v4331_v24 = vsel %vm2449_vm10, %v4330_v0, %v7047_v37  ;;  %v7559_v8 = vld [vmem:[#allocation12_spill] sm:$0xff]  ;;  %5633 = vmatpush3.bf16.msra.mxu1 %v5632_v41 }
 0xb12   :  { %v7168_v4 = vsel %vm2455_vm12, %v4246_v63, %v4245_v36  ;;  %v4333_v38 = vsel %vm2452_vm11, %v4332_v26, %v4331_v24  ;;  %vm2383_vm14 = vcmp.gt.s32.totalorder %v7559_v8, %v7548_v10  ;;  %5634 = vmatprep.subr.bf16.mxu1 %v7552_v32 }
 0xb13   :  { %v7172_v9 = vsel %vm2455_vm12, %v4334_v30, %v4333_v38  ;;  %v7186_v26 = vsel %vm2383_vm14, 2.5e+08, %v7545_v55 }
 0xb15   :  { %5636 = vmatpush3.bf16.msra.mxu1 %v5635_v53 }
 0xb16   :  { %5390 = vmatprep.subr.mxu1 %v7545_v55 }
 0xbba   :  { %v2549_v58 = vpop.f32.mrb[48].mxu0 }
 0xbbb   :  { %v5332_v2 = vpop.f32.mrb[49].mxu0  ;;  %v2557_v37 = vmul.f32 %v7177_v12, %v2549_v58 }
 0xbbd   :  { %v2559_v18 = vsel %vm2558_vm13, %v2557_v37, -inf }
 0xbc4   :  { %v2708_v60 = vpop.f32.mrb[50].mxu0 }
 0xbc5   :  { %v2712_v22 = vmul.f32 %v7177_v12, %v2708_v60  ;;  %v5337_v25 = vpop.f32.mrb[51].mxu0 }
 0xbc7   :  { %v2713_v0 = vsel %vm2558_vm13, %v2712_v22, -inf }
 0xbc8   :  { %2714 = vmax.xlane.f32.xlu0 %v2713_v0 }
 0xbcc   :  { %2560 = vmax.xlane.f32.xlu0 %v2559_v18 }
 0xbe0   :  { %v3217_v13 = vpop.f32.mrb[56].mxu1 }
 0xbe1   :  { %v3221_v57 = vsub.f32 %v3217_v13, %v7186_v26  ;;  %v5357_v16 = vpop.f32.mrb[57].mxu1 }
 0xbe3   :  { %v3222_v27 = vmul.f32 %v7177_v12, %v3221_v57 }
 0xbe5   :  { %v3223_v34 = vsel %vm2558_vm13, %v3222_v27, -inf }
 0xbe6   :  { %3224 = vmax.xlane.f32.xlu0 %v3223_v34 }
 0xc55   :  { %v2715_v39 = vpop.xlane.xlu0 %2714 }
 0xc56   :  { %v2716_v20 = vsub.f32 %v2712_v22, %v2715_v39 }
 0xc58   :  { %v2717_v14 = vmul.f32 1.442695, %v2716_v20 }
 0xc59   :  { %v2561_v56 = vpop.xlane.xlu0 %2560 }
 0xc5a   :  { %5861 = vpow2.f32 %v2717_v14  ;;  %v2562_v35 = vsub.f32 %v2557_v37, %v2561_v56 }
 0xc5c   :  { %v2563_v48 = vmul.f32 1.442695, %v2562_v35 }
 0xc5e   :  { %5863 = vpow2.f32 %v2563_v48 }
 0xc64   :  { %v5862_v10 = vpop.eup %5861 }
 0xc65   :  { %v2719_v3 = vsel %vm2558_vm13, %v5862_v10, 0.0 }
 0xc66   :  { %2720 = vadd.xlane.f32.xlu1 %v2719_v3 }
 0xc68   :  { %v5864_v29 = vpop.eup %5863 }
 0xc69   :  { %v2565_v63 = vsel %vm2558_vm13, %v5864_v29, 0.0 }
 0xc6a   :  { %2566 = vadd.xlane.f32.xlu1 %v2565_v63 }
 0xc73   :  { %v3225_v30 = vpop.xlane.xlu0 %3224 }
 0xc74   :  { %v3226_v59 = vsub.f32 %v3222_v27, %v3225_v30 }
 0xc76   :  { %v3227_v40 = vmul.f32 1.442695, %v3226_v59 }
 0xc78   :  { %5865 = vpow2.f32 %v3227_v40 }
 0xc82   :  { %v5866_v46 = vpop.eup %5865 }
 0xc83   :  { %v3229_v21 = vsel %vm2558_vm13, %v5866_v46, 0.0 }
 0xc84   :  { %3230 = vadd.xlane.f32.xlu0 %v3229_v21 }
 0xcf3   :  { %v2721_v1 = vpop.xlane.xlu1 %2720 }
 0xcf4   :  { %5867 = vrcp.f32 %v2721_v1 }
 0xcf7   :  { %v2567_v6 = vpop.xlane.xlu1 %2566 }
 0xcf8   :  { %5869 = vrcp.f32 %v2567_v6 }
 0xcfe   :  { %v5868_v19 = vpop.eup %5867 }
 0xcff   :  { %v2723_v61 = vmul.f32 %v5868_v19, %v5862_v10 }
 0xd01   :  { %5341 = vmatmul.mubr.msk.f32.vlgmr.msra.gmra.mrb[52].mxu0 %vm2558_vm13, %v2723_v61 }
 0xd02   :  { %5344 = vmatpush3.msra.mxu0 %v7071_v31  ;;  %5345 = vmatprep.mubr.msk.f32.mxu0 %vm5919_vm1, %v7545_v55  ;;  %v5870_v33 = vpop.eup %5869 }
 0xd03   :  { %5348 = vmatprep.subr.mxu0 %v7545_v55  ;;  %v2569_v36 = vmul.f32 %v5870_v33, %v5864_v29 }
 0xd09   :  { %5346 = vmatmul.mubr.msk.f32.vlgmr.msra.gmra.mrb[52].mxu0 %vm2558_vm13, %v2569_v36 }
 0xd0a   :  { %5349 = vmatpush3.xpose.msk.msra.mxu0 %vm51_vm0, %v7088_v43  ;;  %5350 = vmatprep.mubr.msk.f32.mxu0 %vm5919_vm1, %v7545_v55 }
 0xd0b   :  { %5358 = vmatprep.subr.mxu0 %v7545_v55 }
 0xd0d   :  { %5351 = vmatmul.mubr.msk.f32.vlgmr.msra.gmra.mrb[54].mxu0 %vm51_vm0, %v7083_v54 }
 0xd0e   :  { %5359 = vmatpush3.msra.mxu0 %v7094_v23  ;;  %5360 = vmatprep.mubr.msk.f32.mxu0 %vm5919_vm1, %v7545_v55 }
 0xd0f   :  { %5363 = vmatprep.subr.mxu0 %v7545_v55 }
 0xd11   :  { %v3231_v31 = vpop.xlane.xlu0 %3230 }
 0xd12   :  { %5871 = vrcp.f32 %v3231_v31 }
 0xd1c   :  { %v5872_v24 = vpop.eup %5871 }
 0xd1d   :  { %v3233_v38 = vmul.f32 %v5872_v24, %v5866_v46  ;;  %v2398_v24 = vld [vmem:[%s7517_s4 + $0x70] sm:$0xff] }
 0xd1f   :  { %5361 = vmatmul.mubr.msk.f32.vlgmr.msra.gmra.mrb[56].mxu0 %vm2558_vm13, %v3233_v38  ;;  %v2399_v38 = vld [vmem:[%s7517_s4 + $0x100] sm:$0xff] }
 0xd20   :  { %5364 = vmatpush3.msra.mxu0 %v7110_v15  ;;  %5365 = vmatprep.mubr.msk.f32.mxu0 %vm5919_vm1, %v7545_v55 }
 0xd21   :  { %5637 = vmatprep.subr.bf16.mxu0 %v7552_v32 }
 0xddc   :  { %v2920_v54 = vpop.f32.mrb[52].mxu0 }
 0xddd   :  { %v5347_v43 = vpop.f32.mrb[53].mxu0  ;;  %5377 = vmatmul.mubr.msk.f32.vlgmr.msra.gmra.mrb[58].mxu1 %vm51_vm0, %v2920_v54  ;;  %v5638_v54 = vpack.c.bf16 %v2399_v38, %v2398_v24  ;;  %v4764_v24 = vld [vmem:[%s7519_s6 + $0x30] sm:$0xff] }
 0xdde   :  { %5391 = vmatpush3.xpose.msk.msra.mxu1 %vm51_vm0, %v7101_v17  ;;  %5392 = vmatprep.mubr.msk.f32.mxu1 %vm5919_vm1, %v7545_v55  ;;  %v2400_v43 = vld [vmem:[%s7517_s4 + $0x190] sm:$0xff] }
 0xddf   :  { %5395 = vmatprep.subr.mxu1 %v7545_v55 }
 0xde0   :  { %v3062_v23 = vpop.f32.mrb[54].mxu0 }
 0xde1   :  { %v3066_v15 = vsub.f32 %v3062_v23, %v7186_v26  ;;  %v5352_v58 = vpop.f32.mrb[55].mxu0  ;;  %5393 = vmatmul.mubr.msk.f32.vlgmr.msra.gmra.mrb[60].mxu1 %vm51_vm0, %v7107_v11  ;;  %v2401_v23 = vld [vmem:[%s7517_s4 + $0x220] sm:$0xff] }
 0xde2   :  { %5396 = vmatpush3.xpose.msk.msra.mxu1 %vm51_vm0, %v7117_v7  ;;  %5397 = vmatprep.mubr.msk.f32.mxu1 %vm5919_vm1, %v7545_v55 }
 0xde3   :  { %5410 = vmatprep.subr.mxu1 %v7545_v55  ;;  %v3067_v17 = vmul.f32 %v7177_v12, %v3066_v15  ;;  %v5641_v15 = vpack.c.bf16 %v2401_v23, %v2400_v43  ;;  %v4782_v23 = vld [vmem:[%s7519_s6 + $0xc0] sm:$0xff] }
 0xde5   :  { %5398 = vmatmul.mubr.msk.f32.vlgmr.msra.gmra.mrb[62].mxu1 %vm51_vm0, %v7123_v62  ;;  %v3068_v2 = vsel %vm2558_vm13, %v3067_v17, -inf }
 0xde6   :  { %5411 = vmatpush3.xpose.msk.msra.mxu1 %vm51_vm0, %v7127_v47  ;;  %3069 = vmax.xlane.f32.xlu1 %v3068_v2 }
 0xde7   :  { %5412 = vmatprep.mubr.msk.f32.mxu1 %vm5919_vm1, %v7545_v55  ;;  %5415 = vmatprep.subr.mxu1 %v7545_v55 }
 0xde9   :  { %5413 = vmatmul.mubr.msk.f32.vlgmr.msra.gmra.mrb[64].mxu1 %vm51_vm0, %v7133_v5 }
 0xdea   :  { %5416 = vmatpush3.xpose.msk.msra.mxu1 %vm51_vm0, %v7144_v42  ;;  %5417 = vmatprep.mubr.msk.f32.mxu1 %vm5919_vm1, %v7545_v55 }
 0xdeb   :  { %5643 = vmatprep.subr.bf16.mxu1 %v7552_v32 }
 0xded   :  { %5418 = vmatmul.mubr.msk.f32.vlgmr.msra.gmra.mrb[66].mxu1 %vm51_vm0, %v7140_v28  ;;  %v4990_v28 = vld [vmem:[%s7514_s1 + $0x1] ss:$0 sm:$0xff] }
 0xdee   :  { %5645 = vmatpush3.bf16.msra.mxu1 %v5632_v41  ;;  %5438 = vmatprep.mubr.msk.f32.mxu1 %vm5919_vm1, %v7545_v55 }
 0xdef   :  { %5646 = vmatprep.subr.bf16.mxu1 %v7552_v32 }
 0xdf2   :  { %5648 = vmatpush3.bf16.msra.mxu1 %v5635_v53 }
 0xe73   :  { %v3070_v11 = vpop.xlane.xlu1 %3069 }
 0xe74   :  { %v3071_v7 = vsub.f32 %v3067_v17, %v3070_v11 }
 0xe76   :  { %v3072_v62 = vmul.f32 1.442695, %v3071_v7 }
 0xe78   :  { %5873 = vpow2.f32 %v3072_v62 }
 0xe82   :  { %v5874_v47 = vpop.eup %5873 }
 0xe83   :  { %v3074_v5 = vsel %vm2558_vm13, %v5874_v47, 0.0 }
 0xe84   :  { %3075 = vadd.xlane.f32.xlu1 %v3074_v5 }
 0xeb0   :  { %v7266_v42 = vpop.f32.mrb[58].mxu1 }
 0xeb1   :  { %v5378_v12 = vpop.f32.mrb[59].mxu1 }
 0xeb4   :  { %v3694_v60 = vpop.f32.mrb[60].mxu1 }
 0xeb5   :  { %v3702_v22 = vmul.f32 %v4990_v28, %v3694_v60  ;;  %v5394_v25 = vpop.f32.mrb[61].mxu1 }
 0xeb7   :  { %v3703_v37 = vsel %vm2558_vm13, %v3702_v22, -inf }
 0xeb8   :  { %v3812_v0 = vpop.f32.mrb[62].mxu1  ;;  %3704 = vmax.xlane.f32.xlu1 %v3703_v37  ;;  %v7331_v37 = vld [vmem:[%s7518_s5 + $0xd] ss:$0 sm:$0xff] }
 0xeb9   :  { %v3816_v18 = vmul.f32 %v4990_v28, %v3812_v0  ;;  %v5399_v8 = vpop.f32.mrb[63].mxu1  ;;  %v3510_v0 = vadd.f32 %v7331_v37, %v7266_v42  ;;  %v4563_v42 = vld [vmem:[%s7517_s4 + $0x108] sm:$0xff] }
 0xebb   :  { %v3817_v13 = vsel %vm2558_vm13, %v3816_v18, -inf }
 0xebc   :  { %3818 = vmax.xlane.f32.xlu0 %v3817_v13  ;;  %v4102_v57 = vpop.f32.mrb[64].mxu1 }
 0xebd   :  { %v4106_v16 = vsub.f32 %v4102_v57, %v7186_v26  ;;  %v5414_v27 = vpop.f32.mrb[65].mxu1 }
 0xebe   :  { %v4566_v27 = vld [vmem:[%s7517_s4 + $0x1a0] sm:$0xff] }
 0xebf   :  { %v4107_v34 = vmul.f32 %v4990_v28, %v4106_v16  ;;  %v4561_v16 = vld [vmem:[%s7517_s4 + $0x78] sm:$0xff] }
 0xec0   :  { %v4217_v39 = vpop.f32.mrb[66].mxu1 }
 0xec1   :  { %v4221_v20 = vsub.f32 %v4217_v39, %v7186_v26  ;;  %v5419_v14 = vpop.f32.mrb[67].mxu1  ;;  %v4108_v56 = vsel %vm2558_vm13, %v4107_v34, -inf  ;;  %v5657_v39 = vpack.c.bf16 %v4563_v42, %v4561_v16  ;;  %v4788_v16 = vld [vmem:[%s7519_s6 + $0xf0] sm:$0xff]  ;;  %v4789_v42 = vld [vmem:[%s7519_s6 + $0xf8] sm:$0xff] }
 0xec2   :  { %4109 = vmax.xlane.f32.xlu1 %v4108_v56  ;;  %v4565_v14 = vld [vmem:[%s7517_s4 + $0x198] sm:$0xff]  ;;  %v4567_v56 = vld [vmem:[%s7517_s4 + $0x228] sm:$0xff] }
 0xec3   :  { %v4222_v35 = vmul.f32 %v4990_v28, %v4221_v20 }
 0xec5   :  { %v4223_v48 = vsel %vm2558_vm13, %v4222_v35, -inf }
 0xec6   :  { %4224 = vmax.xlane.f32.xlu0 %v4223_v48  ;;  %v4774_v48 = vld [vmem:[%s7519_s6 + $0x80] sm:$0xff] }
 0xf11   :  { %v3076_v10 = vpop.xlane.xlu1 %3075 }
 0xf12   :  { %5875 = vrcp.f32 %v3076_v10  ;;  %v4775_v10 = vld [vmem:[%s7519_s6 + $0x88] sm:$0xff] }
 0xf1c   :  { %v5876_v3 = vpop.eup %5875 }
 0xf1d   :  { %v3078_v29 = vmul.f32 %v5876_v3, %v5874_v47 }
 0xf1f   :  { %5366 = vmatmul.mubr.msk.f32.vlgmr.msra.gmra.mrb[56].mxu0 %vm2558_vm13, %v3078_v29  ;;  %v5661_v29 = vpack.c.bf16 %v4567_v56, %v4565_v14 }
 0xf20   :  { %5387 = vmatprep.mubr.msk.f32.mxu0 %vm5919_vm1, %v7545_v55  ;;  %5639 = vmatpush3.bf16.msra.mxu0 %v5638_v54 }
 0xf21   :  { %5640 = vmatprep.subr.bf16.mxu0 %v7552_v32 }
 0xf24   :  { %5642 = vmatpush3.bf16.msra.mxu0 %v5641_v15 }
 0xf25   :  { %5400 = vmatprep.subr.mxu0 %v7545_v55 }
 0xf45   :  { %v3705_v63 = vpop.xlane.xlu1 %3704 }
 0xf46   :  { %v3706_v30 = vsub.f32 %v3702_v22, %v3705_v63  ;;  %v5671_v63 = vpack.c.bf16 %v4775_v10, %v4774_v48 }
 0xf48   :  { %v3707_v26 = vmul.f32 1.442695, %v3706_v30  ;;  %v4758_v30 = vld [vmem:[%s7519_s6] sm:$0xff] }
 0xf49   :  { %v3819_v59 = vpop.xlane.xlu0 %3818 }
 0xf4a   :  { %5877 = vpow2.f32 %v3707_v26  ;;  %v3820_v40 = vsub.f32 %v3816_v18, %v3819_v59  ;;  %v4759_v26 = vld [vmem:[%s7519_s6 + $0x8] sm:$0xff] }
 0xf4b   :  { %v5673_v59 = vpack.c.bf16 %v4759_v26, %v4758_v30 }
 0xf4c   :  { %v3821_v46 = vmul.f32 1.442695, %v3820_v40 }
 0xf4e   :  { %5879 = vpow2.f32 %v3821_v46 }
 0xf4f   :  { %v4110_v21 = vpop.xlane.xlu1 %4109 }
 0xf50   :  { %v4111_v51 = vsub.f32 %v4107_v34, %v4110_v21  ;;  %v4568_v34 = vld [vmem:[%s7517_s4 + $0x230] sm:$0xff] }
 0xf51   :  { %v5659_v20 = vpack.c.bf16 %v4568_v34, %v4566_v27  ;;  %v5699_v27 = vpack.c.bf16 %v4789_v42, %v4788_v16  ;;  %v4772_v34 = vld [vmem:[%s7519_s6 + $0x70] sm:$0xff] }
 0xf52   :  { %v4112_v50 = vmul.f32 1.442695, %v4111_v51  ;;  %v4776_v51 = vld [vmem:[%s7519_s6 + $0x90] sm:$0xff] }
 0xf53   :  { %v4225_v49 = vpop.xlane.xlu0 %4224 }
 0xf54   :  { %v5878_v41 = vpop.eup %5877  ;;  %5881 = vpow2.f32 %v4112_v50  ;;  %v4226_v45 = vsub.f32 %v4222_v35, %v4225_v49  ;;  %v4777_v50 = vld [vmem:[%s7519_s6 + $0x98] sm:$0xff]  ;;  %v4760_v49 = vld [vmem:[%s7519_s6 + $0x10] sm:$0xff] }
 0xf55   :  { %v3709_v53 = vsel %vm2558_vm13, %v5878_v41, 0.0 }
 0xf56   :  { %v4227_v1 = vmul.f32 1.442695, %v4226_v45  ;;  %3710 = vadd.xlane.f32.xlu1 %v3709_v53  ;;  %v4778_v45 = vld [vmem:[%s7519_s6 + $0xa0] sm:$0xff]  ;;  %v4779_v53 = vld [vmem:[%s7519_s6 + $0xa8] sm:$0xff] }
 0xf58   :  { %v5880_v6 = vpop.eup %5879  ;;  %5883 = vpow2.f32 %v4227_v1 }
 0xf59   :  { %v3823_v19 = vsel %vm2558_vm13, %v5880_v6, 0.0 }
 0xf5a   :  { %3824 = vadd.xlane.f32.xlu0 %v3823_v19  ;;  %v4762_v19 = vld [vmem:[%s7519_s6 + $0x20] sm:$0xff] }
 0xf5e   :  { %v5882_v61 = vpop.eup %5881 }
 0xf5f   :  { %v4114_v33 = vsel %vm2558_vm13, %v5882_v61, 0.0 }
 0xf60   :  { %4115 = vadd.xlane.f32.xlu1 %v4114_v33 }
 0xf62   :  { %v5884_v36 = vpop.eup %5883 }
 0xf63   :  { %v4229_v31 = vsel %vm2558_vm13, %v5884_v36, 0.0 }
 0xf64   :  { %4230 = vadd.xlane.f32.xlu0 %v4229_v31  ;;  %v4781_v31 = vld [vmem:[%s7519_s6 + $0xb8] sm:$0xff] }
 0xfe3   :  { %v3711_v17 = vpop.xlane.xlu1 %3710 }
 0xfe7   :  { %v3825_v58 = vpop.xlane.xlu0 %3824 }
 0xfe8   :  { %5885 = vrcp.f32 %v3825_v58  ;;  %v4766_v58 = vld [vmem:[%s7519_s6 + $0x40] sm:$0xff] }
 0xfe9   :  { %5887 = vrcp.f32 %v3711_v17 }
 0xfed   :  { %v4116_v5 = vpop.xlane.xlu1 %4115 }
 0xff1   :  { %v4231_v2 = vpop.xlane.xlu0 %4230 }
 0xff2   :  { %v5886_v11 = vpop.eup %5885  ;;  %v3430_v7 = vpop.f32.mrb[56].mxu0  ;;  %5889 = vrcp.f32 %v4231_v2  ;;  %v4767_v2 = vld [vmem:[%s7519_s6 + $0x48] sm:$0xff] }
 0xff3   :  { %v5367_v62 = vpop.f32.mrb[57].mxu0  ;;  %5388 = vmatmul.mubr.msk.f32.vlgmr.msra.gmra.mrb[58].mxu0 %vm51_vm0, %v3430_v7  ;;  %v3827_v47 = vmul.f32 %v5886_v11, %v5880_v6  ;;  %v5888_v12 = vpop.eup %5887  ;;  %5891 = vrcp.f32 %v4116_v5  ;;  %v5679_v6 = vpack.c.bf16 %v4779_v53, %v4778_v45  ;;  %v4570_v11 = vld [vmem:[%s7517_s4 + $0x88] sm:$0xff]  ;;  %v4571_v7 = vld [vmem:[%s7517_s4 + $0x118] sm:$0xff]  ;;  %v4784_v5 = vld [vmem:[%s7519_s6 + $0xd0] sm:$0xff] }
 0xff4   :  { %5401 = vmatpush3.msra.mxu0 %v7150_v44  ;;  %5402 = vmatprep.mubr.msk.f32.mxu0 %vm5919_vm1, %v7545_v55  ;;  %v3713_v28 = vmul.f32 %v5888_v12, %v5878_v41  ;;  %v5675_v41 = vpack.c.bf16 %v4777_v50, %v4776_v51  ;;  %v5689_v62 = vpack.c.bf16 %v4767_v2, %v4766_v58  ;;  %v4785_v12 = vld [vmem:[%s7519_s6 + $0xd8] sm:$0xff]  ;;  %v5005_v45 = vld [vmem:[%s7518_s5 + $0x11] ss:$0 sm:$0xff] }
 0xff5   :  { %5405 = vmatprep.subr.mxu0 %v7545_v55 }
 0xff7   :  { %5403 = vmatmul.mubr.msk.f32.vlgmr.msra.gmra.mrb[60].mxu0 %vm2558_vm13, %v3827_v47  ;;  %v5663_v47 = vpack.c.bf16 %v4571_v7, %v4570_v11 }
 0xff8   :  { %5406 = vmatpush3.msra.mxu0 %v7156_v52  ;;  %5407 = vmatprep.mubr.msk.f32.mxu0 %vm5919_vm1, %v7545_v55 }
 0xff9   :  { %5420 = vmatprep.subr.mxu0 %v7545_v55 }
 0xffc   :  { %v5890_v44 = vpop.eup %5889 }
 0xffd   :  { %v4233_v60 = vmul.f32 %v5890_v44, %v5884_v36  ;;  %v5892_v52 = vpop.eup %5891  ;;  %v4780_v36 = vld [vmem:[%s7519_s6 + $0xb0] sm:$0xff]  ;;  %v5691_v44 = vpack.c.bf16 %v4785_v12, %v4784_v5 }
 0xffe   :  { %v4118_v22 = vmul.f32 %v5892_v52, %v5882_v61  ;;  %v4763_v61 = vld [vmem:[%s7519_s6 + $0x28] sm:$0xff]  ;;  %v5683_v38 = vpack.c.bf16 %v4781_v31, %v4780_v36  ;;  %v4752_v31 = vld [vmem:[%s7515_s2 + $0x10] sm:$0xff] }
 0xfff   :  { %5408 = vmatmul.mubr.msk.f32.vlgmr.msra.gmra.mrb[60].mxu0 %vm2558_vm13, %v3713_v28  ;;  %v5681_v33 = vpack.c.bf16 %v4763_v61, %v4762_v19  ;;  %v4768_v28 = vld [vmem:[%s7519_s6 + $0x50] sm:$0xff]  ;;  %v4572_v52 = vld [vmem:[%s7517_s4 + $0x1a8] sm:$0xff] }
0x1000   :  { %5421 = vmatpush3.msra.mxu0 %v7168_v4  ;;  %5422 = vmatprep.mubr.msk.f32.mxu0 %vm5919_vm1, %v7545_v55  ;;  %v4562_v4 = vld [vmem:[%s7517_s4 + $0x80] sm:$0xff] }
0x1001   :  { %5425 = vmatprep.subr.mxu0 %v7545_v55 }
0x1003   :  { %5423 = vmatmul.mubr.msk.f32.vlgmr.msra.gmra.mrb[62].mxu0 %vm2558_vm13, %v4233_v60  ;;  %v4769_v60 = vld [vmem:[%s7519_s6 + $0x58] sm:$0xff] }
0x1004   :  { %5426 = vmatpush3.msra.mxu0 %v7172_v9  ;;  %5427 = vmatprep.mubr.msk.f32.mxu0 %vm5919_vm1, %v7545_v55  ;;  %v4564_v9 = vld [vmem:[%s7517_s4 + $0x110] sm:$0xff] }
0x1005   :  { %5649 = vmatprep.subr.bf16.mxu0 %v7552_v32  ;;  %v5655_v25 = vpack.c.bf16 %v4564_v9, %v4562_v4  ;;  %v5693_v4 = vpack.c.bf16 %v4769_v60, %v4768_v28 }
0x1007   :  { %5656 = vmatprep.subr.bf16.mxu1 %v5655_v25  ;;  %v4786_v25 = vld [vmem:[%s7519_s6 + $0xe0] sm:$0xff] }
0x100b   :  { %5428 = vmatmul.mubr.msk.f32.vlgmr.msra.gmra.mrb[62].mxu0 %vm2558_vm13, %v4118_v22  ;;  %v4573_v22 = vld [vmem:[%s7517_s4 + $0x238] sm:$0xff] }
0x100c   :  { %5651 = vmatpush3.bf16.msra.mxu0 %v5638_v54  ;;  %5449 = vmatprep.mubr.msk.f32.mxu0 %vm5919_vm1, %v7545_v55  ;;  %v4765_v54 = vld [vmem:[%s7519_s6 + $0x38] sm:$0xff]  ;;  %v5667_v9 = vpack.c.bf16 %v4573_v22, %v4572_v52 }
0x100d   :  { %5652 = vmatprep.subr.bf16.mxu0 %v7552_v32  ;;  %v7338_v32 = vld [vmem:[%s7518_s5 + $0xe] ss:$0 sm:$0xff]  ;;  %v5685_v43 = vpack.c.bf16 %v4765_v54, %v4764_v24 }
0x1010   :  { %5654 = vmatpush3.bf16.msra.mxu0 %v5641_v15  ;;  %v4783_v15 = vld [vmem:[%s7519_s6 + $0xc8] sm:$0xff] }
0x1011   :  { %v5687_v17 = vpack.c.bf16 %v4783_v15, %v4782_v23  ;;  %5664 = vmatprep.subr.bf16.mxu0 %v5663_v47 }
0x10c6   :  { %v3582_v18 = vpop.f32.mrb[58].mxu0 }
0x10c7   :  { %v3586_v8 = vadd.f32 %v3582_v18, %v3510_v0  ;;  %v5389_v13 = vpop.f32.mrb[59].mxu0  ;;  %v4787_v0 = vld [vmem:[%s7519_s6 + $0xe8] sm:$0xff] }
0x10c8   :  { %v5695_v18 = vpack.c.bf16 %v4787_v0, %v4786_v25  ;;  %v4771_v13 = vld [vmem:[%s7519_s6 + $0x68] sm:$0xff] }
0x10c9   :  { %v3593_v57 = vadd.f32 %v7338_v32, %v3586_v8  ;;  %v4770_v8 = vld [vmem:[%s7519_s6 + $0x60] sm:$0xff] }
0x10cb   :  { %3594 = vst.msk [vmem:[#allocation3] sm:$0xff] %vm51_vm0, %v3593_v57  ;;  %v5697_v57 = vpack.c.bf16 %v4771_v13, %v4770_v8 }
0x10d2   :  { %v4000_v35 = vpop.f32.mrb[60].mxu0  ;;  %v4559_v40 = vld [vmem:[#allocation3] sm:$0xff] }
0x10d3   :  { %v5409_v3 = vpop.f32.mrb[61].mxu0  ;;  %5439 = vmatmul.mubr.msk.f32.vlgmr.msra.gmra.mrb[68].mxu1 %vm51_vm0, %v4000_v35 }
0x10d4   :  { %5658 = vmatpush1.bf16.msra.mxu1 %v5657_v39  ;;  %4656 = vmatprep.mubr.f32.mxu1 %v7545_v55  ;;  %v4773_v39 = vld [vmem:[%s7519_s6 + $0x78] sm:$0xff] }
0x10d5   :  { %5660 = vmatprep.subr.bf16.mxu1 %v5659_v20  ;;  %v5701_v20 = vpack.c.bf16 %v4773_v39, %v4772_v34 }
0x10d8   :  { %5662 = vmatpush1.bf16.msra.mxu1 %v5661_v29  ;;  %v4569_v29 = vld [vmem:[%s7518_s5 + $0xf] sm:$0x3]  ;;  %s5920_s5 = smov [#allocation4]  }
0x10d9   :  { %5672 = vmatprep.subr.bf16.mxu1 %v5671_v63  ;;  %s4872_s30 = sshll.u32 %s5920_s5, 4  ;;  %s4873_s30 = int_to_ptr.vmem [resolvable:$true] %s4872_s30 }
0x10da   :  { %p5898_p1 = scmp.lt.s32.totalorder %s4873_s30, %s4873_s30 }
0x10db   :  { %5003 = vmatmul.mubr.msk.f32.vlgmr.msra.gmra.mrb[70].mxu1 %vm51_vm0, %v4559_v40 }
0x10dc   :  { %5674 = vmatpush3.bf16.msra.mxu1 %v5673_v59  ;;  %4662 = vmatprep.mubr.f32.mxu1 %v7545_v55  ;;  %v4761_v55 = vld [vmem:[%s7519_s6 + $0x18] sm:$0xff]  ;;  %v7560_v59 = vld [vmem:[#allocation9_spill] sm:$0xff] }
0x10dd   :  { %v5677_v1 = vpack.c.bf16 %v4761_v55, %v4760_v49  ;;  %5676 = vmatprep.subr.bf16.mxu1 %v5675_v41  ;;  %v4750_v49 = vld [vmem:[%s7515_s2] sm:$0xff] }
0x10de   :  { %v4406_v46 = vpop.f32.mrb[62].mxu0 }
0x10df   :  { %v5429_v21 = vpop.f32.mrb[63].mxu0  ;;  %5450 = vmatmul.mubr.msk.f32.vlgmr.msra.gmra.mrb[64].mxu0 %vm51_vm0, %v4406_v46  ;;  %v7561_v46 = vld [vmem:[#allocation8_spill] sm:$0xff] }
0x10e0   :  { %5460 = vmatprep.mubr.msk.f32.mxu0 %vm51_vm0, %v4559_v40  ;;  %5678 = vmatpush3.bf16.msra.mxu1 %v5677_v1  ;;  %v4583_v40 = vrot.slane %v4569_v29, %v7560_v59  ;;  %v4579_v21 = vrot.slane %v4569_v29, %v7561_v46 }
0x10e1   :  { %5680 = vmatprep.subr.bf16.mxu1 %v5679_v6  ;;  %5666 = vmatpush3.bf16.msra.mxu0 %v5663_v47 }
0x10e2   :  { %5668 = vmatprep.subr.bf16.mxu0 %v5667_v9 }
0x10e4   :  { %5682 = vmatpush3.bf16.msra.mxu1 %v5681_v33  ;;  %v4753_v33 = vld [vmem:[%s7515_s2 + $0x18] sm:$0xff] }
0x10e5   :  { %5684 = vmatprep.subr.bf16.mxu1 %v5683_v38  ;;  %5670 = vmatpush3.bf16.msra.mxu0 %v5667_v9 }
0x10e8   :  { %5686 = vmatpush3.bf16.msra.mxu1 %v5685_v43 }
0x10e9   :  { %5688 = vmatprep.subr.bf16.mxu1 %v5687_v17 }
0x10ec   :  { %5690 = vmatpush3.bf16.msra.mxu1 %v5689_v62 }
0x10ed   :  { %5692 = vmatprep.subr.bf16.mxu1 %v5691_v44 }
0x10f0   :  { %5694 = vmatpush3.bf16.msra.mxu1 %v5693_v4 }
0x10f1   :  { %5696 = vmatprep.subr.bf16.mxu1 %v5695_v18 }
0x10f4   :  { %5698 = vmatpush3.bf16.msra.mxu1 %v5697_v57 }
0x10f5   :  { %5700 = vmatprep.subr.bf16.mxu1 %v5699_v27 }
0x10f8   :  { %5702 = vmatpush3.bf16.msra.mxu1 %v5701_v20 }
0x11a6   :  { %v4479_v14 = vpop.f32.mrb[68].mxu1 }
0x11a7   :  { %v5440_v56 = vpop.f32.mrb[69].mxu1  ;;  %v4480_v10 = vadd.f32 %v7331_v37, %v4479_v14  ;;  %v4751_v37 = vld [vmem:[%s7515_s2 + $0x8] sm:$0xff]  ;;  %s5893_s2 = scalar_lea.vmem %s4873_s30, 256 }
0x11a8   :  { %p5894_p0 = scmp.ne.s32.totalorder %s4873_s30, %s5893_s2  ;;  %p5899_p2 = scmp.lt.s32.totalorder %s5893_s2, %s5893_s2 }
0x11aa   :  { %p5900_p3 = por %p5899_p2, %p5898_p1 }
0x11ac   :  { %p5901_p4 = pnand %p5900_p3, %p5894_p0 }
0x11ae   :  { %v4658_v35 = vpop.f32.mrb[70].mxu1 }
0x11af   :  { %v4660_v48 = vpop.f32.mrb[71].mxu1  ;;  %v4659_v50 = vadd.f32 %v4658_v35, %v4579_v21 }
0x11b0   :  { %v4661_v51 = vadd.f32 %v4660_v48, %v4583_v40 }
0x11b2   :  { %v4552_v3 = vpop.f32.mrb[64].mxu0  ;;  %v4755_v41 = vmul.f32 %v4751_v37, %v4661_v51 }
0x11b3   :  { %v4556_v63 = vadd.f32 %v4552_v3, %v4480_v10  ;;  %v5451_v30 = vpop.f32.mrb[65].mxu0 }
0x11b5   :  { %v4557_v26 = vadd.f32 %v7338_v32, %v4556_v63  ;;  %v4754_v32 = vmul.f32 %v4750_v49, %v4659_v50 }
0x11b7   :  { %4558 = vst.msk [vmem:[#allocation3 + $0x8] sm:$0xff] %vm51_vm0, %v4557_v26 }
0x11be   :  { %v4560_v55 = vld [vmem:[#allocation3 + $0x8] sm:$0xff] }
0x11bf   :  { %5004 = vmatmul.mubr.msk.f32.gmra.mrb[72].mxu1 %vm51_vm0, %v4560_v55  ;;  %5461 = vmatmul.mubr.msk.f32.vlgmr.msra.gmra.mrb[66].mxu0 %vm51_vm0, %v4560_v55 }
0x11c0   :  { %4854 = vmatprep.mubr.f32.mxu1 %v4755_v41 }
0x11c3   :  { %4855 = vmatmul.mubr.f32.vlgmr.msra.gmra.mrb[74].mxu1 %v4754_v32 }
0x1292   :  { %v4664_v53 = vpop.f32.mrb[72].mxu1  ;;  %v5462_v1 = vpop.f32.mrb[66].mxu0 }
0x1293   :  { %v4665_v6 = vadd.f32 %v4664_v53, %v4579_v21  ;;  %v4747_v19 = vadd.f32 %v5462_v1, %v5005_v45  ;;  %v4666_v61 = vpop.f32.mrb[73].mxu1  ;;  %v4741_v36 = vpop.f32.mrb[67].mxu0 }
0x1294   :  { %v4667_v24 = vadd.f32 %v4666_v61, %v4583_v40  ;;  %v4742_v15 = vadd.f32 %v5005_v45, %v4741_v36 }
0x1295   :  { %v4756_v43 = vmul.f32 %v4752_v31, %v4665_v6 }
0x1296   :  { %v4757_v38 = vmul.f32 %v4753_v33, %v4667_v24  ;;  %v5174_v54 = vpop.f32.mrb[74].mxu1 }
0x1297   :  { %v5175_v23 = vpop.f32.mrb[75].mxu1 }
0x1298   :  { %v5176_v58 = vadd.f32 %v5175_v23, %v5174_v54  ;;  %4859 = vmatprep.mubr.f32.mxu1 %v4757_v38 }
0x1299   :  { %4860 = vmatmul.mubr.f32.gmra.mrb[76].mxu1 %v4756_v43 }
0x129a   :  { %v4857_v17 = vadd.f32 %v5176_v58, %v4742_v15 }
0x129c   :  { %4865 = vst.msk [vmem:[#allocation4] sm:$0xff] %vm2558_vm13, %v4857_v17 }
0x136c   :  { %v5177_v2 = vpop.f32.mrb[76].mxu1 }
0x136d   :  { %v5178_v11 = vpop.f32.mrb[77].mxu1 }
0x136e   :  { %v5179_v7 = vadd.f32 %v5178_v11, %v5177_v2 }
0x1370   :  { %v4862_v62 = vadd.f32 %v5179_v7, %v4747_v19 }
0x1372   :  { %4866 = vst.msk [vmem:[#allocation4 + $0x8] sm:$0xff] %vm2558_vm13, %v4862_v62 }
0x1373   :  { %5904 = shalt.err (!%p5901_p4)
}
0x1374   :  { %s5905_s9 = scalar_lea.hbm %s7520_s7, 256 }
0x1375   :  { %p5906_p5 = scmp.ne.s32.totalorder %s7520_s7, %s5905_s9  ;;  %p5909_p6 = scmp.lt.u32.totalorder %s5905_s9, %s7520_s7 }
0x1377   :  { %p5911_p7 = pnand %p5909_p6, %p5906_p5 }
0x1379   :  { %5914 = shalt.err (!%p5911_p7)
}
0x137a   :  { %s5921_s13 = smov 128   ;;  %s5922_s14 = smov 8  }
0x137b   :  { %4878 = dma.vmem_to_hbm [thread:$0]  %s4873_s30, 256, %s7520_s7, [#allocation5], %s5921_s13, %s5921_s13, %s5922_s14  }
0x137c   :  { %5915 = dma.done.wait [#allocation5], 256  }
0x137d   :  { %5916 = vsyncadd [#allocation5], 4294967040 }
0x137e   :  { %4882 = vsyncpa [#allocation5], 1 }

</bundles_post_ra>
